<compile_context>
chip_gen: v5e
topology: v5e:2x2
jax: 0.10.0
libtpu: 0.0.40
codegen_flags: <defaults>
</compile_context>

<pallas_src>
import functools

import jax
import jax.numpy as jnp
import numpy as np
from jax.experimental import pallas as pl
from jax.experimental.pallas import tpu as pltpu

BN_EPS = 1e-5
EMB_DIM = 64          # feature_embedding_dim is hard-coded to 64 in the module
HID = EMB_DIM // 2    # GRU hidden size (32)
HP = 128              # per-gate lane padding (vreg-aligned gate slices)
GP = 3 * HP           # padded width of the 3 stacked GRU gates
CLS_PAD = EMB_DIM     # classifier logits padded to 64 lanes -> [N, 128] output

_ARG_ORDER = ("m1", "c1", "m2", "c2", "m3", "c3",
              "wih", "bih", "whh", "bhh",
              "w1", "b1", "w2", "b2", "w3", "b3", "wc", "bc")
_WEIGHT_NAMES = ("m1", "m2", "m3", "wih", "whh", "w1", "w2", "w3", "wc")
_BIAS_NAMES = ("c1", "c2", "c3", "bih", "bhh", "b1", "b2", "b3", "bc")


# ----------------------------------------------------------------------------
# The fused kernel: conv1..3 (+BN+ReLU) + GRU + fc1..3 + classifier per branch
# ----------------------------------------------------------------------------
def _encoder_kernel(x_ref, m1_ref, c1_ref, m2_ref, c2_ref, m3_ref, c3_ref,
                    wih_ref, bih_ref, whh_ref, bhh_ref,
                    w1_ref, b1_ref, w2_ref, b2_ref, w3_ref, b3_ref,
                    wc_ref, bc_ref, out_ref):
    """One ReferenceEncoder_64 branch + its classifier, all VMEM resident."""
    f32, bf16 = jnp.float32, jnp.bfloat16

    def dense(x, w_ref, b_ref):                      # bf16 MXU matmul, f32 acc
        return jnp.dot(x.astype(bf16), w_ref[...],
                       preferred_element_type=f32) + b_ref[...]

    # conv1/2/3 as pre-expanded dense operators (+ folded BN bias) + ReLU.
    a = jnp.maximum(dense(x_ref[...], m1_ref, c1_ref), 0.0)
    a = jnp.maximum(dense(a, m2_ref, c2_ref), 0.0)
    a = jnp.maximum(dense(a, m3_ref, c3_ref), 0.0)   # [N, T*C*W], (t,c,w) order

    # Hoisted GRU input projection (block-diagonal over the T time steps).
    gi_all = dense(a, wih_ref, bih_ref)              # [N, T*GP]

    whh = whh_ref[...]
    bhh = bhh_ref[...]
    N = x_ref.shape[0]
    T = wih_ref.shape[1] // GP

    # GRU recurrence: gates padded to 128 lanes so every slice is vreg-aligned.
    # Padded lanes provably stay exactly 0 (zero weights/biases in padding).
    # TODO(synk): for large T switch to lax.fori_loop(..., unroll=True).
    h = jnp.zeros((N, HP), f32)
    for t in range(T):                               # static T, fully unrolled
        gi = gi_all[:, t * GP:(t + 1) * GP]
        gh = jnp.dot(h.astype(bf16), whh, preferred_element_type=f32) + bhh
        r = jax.nn.sigmoid(gi[:, 0:HP] + gh[:, 0:HP])
        z = jax.nn.sigmoid(gi[:, HP:2 * HP] + gh[:, HP:2 * HP])
        n = jnp.tanh(gi[:, 2 * HP:3 * HP] + r * gh[:, 2 * HP:3 * HP])
        h = (1.0 - z) * n + z * h                    # carried in registers

    h1 = jnp.maximum(dense(h, w1_ref, b1_ref), 0.0)
    h2 = jnp.maximum(dense(h1, w2_ref, b2_ref), 0.0)
    emb = jax.nn.sigmoid(dense(h2, w3_ref, b3_ref))  # [N, 64]
    logits = dense(emb, wc_ref, bc_ref)              # [N, 64] (classes padded)

    # Single lane-dense [N, 128] output block per branch: emb | padded logits.
    D = emb.shape[1]
    out_ref[:, 0:D] = emb
    out_ref[:, D:D + CLS_PAD] = logits


# ----------------------------------------------------------------------------
# Wrapper: one pallas_call for the whole EDM_64 forward
# ----------------------------------------------------------------------------
def _branch_map(e):
    return (e, 0, 0)


def edm64_forward(mels, kp):
    """Returns the packed [2, N, 128] (emb | padded logits) tensor."""
    N = mels.shape[0]
    x_flat = mels.reshape(N, -1)                     # (C=1,H,W) flatten == raw
    in_w = x_flat.shape[1]

    args = [kp[name] for name in _ARG_ORDER]
    in_specs = [pl.BlockSpec((N, in_w), lambda e: (0, 0))]
    in_specs += [pl.BlockSpec((None,) + a.shape[1:], _branch_map) for a in args]

    return pl.pallas_call(
        _encoder_kernel,
        out_shape=jax.ShapeDtypeStruct((2, N, EMB_DIM + CLS_PAD), jnp.float32),
        grid=(2,),                                   # 2 = encoder branches
        in_specs=in_specs,
        out_specs=pl.BlockSpec((None, N, EMB_DIM + CLS_PAD), _branch_map),
        compiler_params=pltpu.CompilerParams(
            dimension_semantics=("parallel",)),      # v7x: one branch per TC
    )(x_flat, *args)


def edm64_apply(mels, kp, n_gender, n_intonation):
    out = edm64_forward(mels, kp)
    emb1 = out[0, :, :EMB_DIM]
    emb2 = out[1, :, :EMB_DIM]
    pred1 = out[0, :, EMB_DIM:EMB_DIM + n_gender]
    pred2 = out[1, :, EMB_DIM:EMB_DIM + n_intonation]
    return emb1, emb2, pred1, pred2


# ----------------------------------------------------------------------------
# Host-side (one-time, outside jit) parameter preprocessing
# ----------------------------------------------------------------------------
def _conv_bn_dense(layer, H, W, out_order):
    """3x3/stride-2/pad-1 conv + folded eval BN as dense matrix + bias.

    Input flat order is (C, H, W); output order 'chw' or 'hcw' (time-major,
    GRU-ready)."""
    w = np.asarray(layer["w"], np.float32)            # [Cout, Cin, 3, 3]
    b = np.asarray(layer["b"], np.float32)
    scale = (np.asarray(layer["gamma"], np.float32)
             / np.sqrt(np.asarray(layer["var"], np.float32) + BN_EPS))
    w_eff = w * scale[:, None, None, None]
    b_eff = (b - np.asarray(layer["mean"], np.float32)) * scale \
        + np.asarray(layer["beta"], np.float32)

    Cout, Cin, _, _ = w.shape
    oh = (H - 3 + 2) // 2 + 1
    ow = (W - 3 + 2) // 2 + 1

    def out_idx(co, oi, oj):
        if out_order == "chw":
            return co * (oh * ow) + oi * ow + oj
        return oi * (Cout * ow) + co * ow + oj        # (t, c, w)

    M = np.zeros((Cin * H * W, Cout * oh * ow), np.float32)
    bias = np.zeros((Cout * oh * ow,), np.float32)
    ci = np.arange(Cin)
    for kh in range(3):
        for kw in range(3):
            wk = w_eff[:, :, kh, kw].T                # [Cin, Cout]
            for oi in range(oh):
                ih = 2 * oi + kh - 1
                if ih < 0 or ih >= H:
                    continue
                for oj in range(ow):
                    iw = 2 * oj + kw - 1
                    if iw < 0 or iw >= W:
                        continue
                    rows = ci * (H * W) + ih * W + iw
                    cols = np.array([out_idx(co, oi, oj) for co in range(Cout)])
                    M[np.ix_(rows, cols)] += wk
    for co in range(Cout):
        for oi in range(oh):
            for oj in range(ow):
                bias[out_idx(co, oi, oj)] = b_eff[co]
    return M, bias, oh, ow


def _gru_padded(gru, T):
    """Pad each GRU gate to 128 lanes and build the hoisted block-diagonal
    input projection over T steps."""
    w_ih = np.asarray(gru["w_ih"], np.float32)        # [I, 3H]
    w_hh = np.asarray(gru["w_hh"], np.float32)        # [H, 3H]
    b_ih = np.asarray(gru["b_ih"], np.float32).reshape(-1)
    b_hh = np.asarray(gru["b_hh"], np.float32).reshape(-1)
    I, H = w_ih.shape[0], w_hh.shape[0]

    wih_p = np.zeros((I, GP), np.float32)
    whh_p = np.zeros((HP, GP), np.float32)
    bih_p = np.zeros((GP,), np.float32)
    bhh_p = np.zeros((GP,), np.float32)
    for g in range(3):                                # gate order (r, z, n)
        wih_p[:, g * HP:g * HP + H] = w_ih[:, g * H:(g + 1) * H]
        whh_p[:H, g * HP:g * HP + H] = w_hh[:, g * H:(g + 1) * H]
        bih_p[g * HP:g * HP + H] = b_ih[g * H:(g + 1) * H]
        bhh_p[g * HP:g * HP + H] = b_hh[g * H:(g + 1) * H]

    wih_big = np.zeros((T * I, T * GP), np.float32)
    bih_big = np.zeros((T * GP,), np.float32)
    for t in range(T):
        wih_big[t * I:(t + 1) * I, t * GP:(t + 1) * GP] = wih_p
        bih_big[t * GP:(t + 1) * GP] = bih_p
    return wih_big, bih_big, whh_p, bhh_p


def preprocess_encoder(raw, Ty, n_mel):
    """Raw (PyTorch-like) params -> kernel-ready dense operators for one branch."""
    assert len(raw["convs"]) == 3, "kernel is specialized for K=3 conv layers"
    arrs = {}
    H, W = Ty, n_mel
    for li, layer in enumerate(raw["convs"]):
        order = "hcw" if li == 2 else "chw"           # last layer -> GRU layout
        M, bias, H, W = _conv_bn_dense(layer, H, W, order)
        arrs[f"m{li + 1}"], arrs[f"c{li + 1}"] = M, bias
    T = H                                             # time steps after convs

    arrs["wih"], arrs["bih"], arrs["whh"], arrs["bhh"] = _gru_padded(raw["gru"], T)

    f = raw["fc"]
    w1p = np.zeros((HP, EMB_DIM), np.float32)         # pad hidden 32 -> 128 rows
    w1p[:HID, :] = np.asarray(f["w1"], np.float32)
    arrs["w1"], arrs["b1"] = w1p, np.asarray(f["b1"], np.float32).reshape(-1)
    arrs["w2"], arrs["b2"] = (np.asarray(f["w2"], np.float32),
                              np.asarray(f["b2"], np.float32).reshape(-1))
    arrs["w3"], arrs["b3"] = (np.asarray(f["w3"], np.float32),
                              np.asarray(f["b3"], np.float32).reshape(-1))

    c = raw["cls"]
    wc = np.asarray(c["w"], np.float32)               # [64, n_cls]
    n_cls = wc.shape[1]
    wcp = np.zeros((EMB_DIM, CLS_PAD), np.float32)
    wcp[:, :n_cls] = wc
    bcp = np.zeros((CLS_PAD,), np.float32)
    bcp[:n_cls] = np.asarray(c["b"], np.float32).reshape(-1)
    arrs["wc"], arrs["bc"] = wcp, bcp
    return arrs


def stack_encoders(enc_list):
    """Stack the two branches on a leading axis of 2 (grid axis)."""
    kp = {}
    for name in _WEIGHT_NAMES:
        kp[name] = jnp.asarray(np.stack([e[name] for e in enc_list]),
                               jnp.bfloat16)
    for name in _BIAS_NAMES:
        kp[name] = jnp.asarray(np.stack([e[name][None, :] for e in enc_list]),
                               jnp.float32)           # [2, 1, B]
    return kp


# ----------------------------------------------------------------------------
# Deterministic synthetic parameters (PyTorch-like layout)
# ----------------------------------------------------------------------------
class _KeyGen:
    def __init__(self, key):
        self._key, self._i = key, 0

    def __call__(self):
        self._i += 1
        return jax.random.fold_in(self._key, self._i)


def make_encoder_params(keygen, ref_enc_filters, n_mel_channels, n_classes):
    filters = [1] + list(ref_enc_filters)
    K = len(ref_enc_filters)
    out_w = n_mel_channels
    for _ in range(K):
        out_w = (out_w - 3 + 2) // 2 + 1
    gru_in = ref_enc_filters[-1] * out_w

    convs = []
    for i in range(K):
        cin, cout = filters[i], filters[i + 1]
        convs.append(dict(
            w=0.1 * jax.random.normal(keygen(), (cout, cin, 3, 3), jnp.float32),
            b=0.1 * jax.random.normal(keygen(), (cout,), jnp.float32),
            gamma=1.0 + 0.1 * jax.random.normal(keygen(), (cout,), jnp.float32),
            beta=0.1 * jax.random.normal(keygen(), (cout,), jnp.float32),
            mean=0.1 * jax.random.normal(keygen(), (cout,), jnp.float32),
            var=1.0 + 0.1 * jax.random.normal(keygen(), (cout,), jnp.float32) ** 2,
        ))
    # NOTE: PyTorch stores weight_ih_l0 / weight_hh_l0 as [3H, I] / [3H, H]
    # (gate order r, z, n); real checkpoints need a transpose on load.  The
    # synthetic weights here are laid out directly as (I, 3H) / (H, 3H).
    gru = dict(
        w_ih=0.1 * jax.random.normal(keygen(), (gru_in, 3 * HID), jnp.float32),
        w_hh=0.1 * jax.random.normal(keygen(), (HID, 3 * HID), jnp.float32),
        b_ih=0.1 * jax.random.normal(keygen(), (3 * HID,), jnp.float32),
        b_hh=0.1 * jax.random.normal(keygen(), (3 * HID,), jnp.float32),
    )
    fc = dict(
        w1=0.1 * jax.random.normal(keygen(), (HID, EMB_DIM), jnp.float32),
        b1=0.1 * jax.random.normal(keygen(), (EMB_DIM,), jnp.float32),
        w2=0.1 * jax.random.normal(keygen(), (EMB_DIM, EMB_DIM), jnp.float32),
        b2=0.1 * jax.random.normal(keygen(), (EMB_DIM,), jnp.float32),
        w3=0.1 * jax.random.normal(keygen(), (EMB_DIM, EMB_DIM), jnp.float32),
        b3=0.1 * jax.random.normal(keygen(), (EMB_DIM,), jnp.float32),
    )
    cls = dict(
        w=0.1 * jax.random.normal(keygen(), (EMB_DIM, n_classes), jnp.float32),
        b=0.1 * jax.random.normal(keygen(), (n_classes,), jnp.float32),
    )
    return dict(convs=convs, gru=gru, fc=fc, cls=cls)


# ----------------------------------------------------------------------------
# Pure-JAX f32 reference (for correctness check only)
# ----------------------------------------------------------------------------
def _reference_forward(mels, raw, n_mel):
    N = mels.shape[0]
    x = mels.reshape(N, 1, -1, n_mel)                 # NCHW
    for layer in raw["convs"]:
        x = jax.lax.conv_general_dilated(
            x, layer["w"], window_strides=(2, 2), padding=((1, 1), (1, 1)),
            dimension_numbers=("NCHW", "OIHW", "NCHW"))
        x = x + layer["b"][None, :, None, None]
        scale = layer["gamma"] / jnp.sqrt(layer["var"] + BN_EPS)
        x = ((x - layer["mean"][None, :, None, None])
             * scale[None, :, None, None] + layer["beta"][None, :, None, None])
        x = jnp.maximum(x, 0.0)
    Nn, C, T, W = x.shape
    seq = jnp.transpose(x, (0, 2, 1, 3)).reshape(Nn, T, C * W)
    g = raw["gru"]
    Hh = g["w_hh"].shape[0]
    h = jnp.zeros((Nn, Hh), jnp.float32)
    for t in range(T):
        gi = seq[:, t, :] @ g["w_ih"] + g["b_ih"]
        gh = h @ g["w_hh"] + g["b_hh"]
        r = jax.nn.sigmoid(gi[:, :Hh] + gh[:, :Hh])
        z = jax.nn.sigmoid(gi[:, Hh:2 * Hh] + gh[:, Hh:2 * Hh])
        n = jnp.tanh(gi[:, 2 * Hh:] + r * gh[:, 2 * Hh:])
        h = (1.0 - z) * n + z * h
    f = raw["fc"]
    h1 = jnp.maximum(h @ f["w1"] + f["b1"], 0.0)
    h2 = jnp.maximum(h1 @ f["w2"] + f["b2"], 0.0)
    emb = jax.nn.sigmoid(h2 @ f["w3"] + f["b3"])
    c = raw["cls"]
    return emb, emb @ c["w"] + c["b"]


# ----------------------------------------------------------------------------
if __name__ == "__main__":
    ref_enc_filters = [4, 8, 16]       # K = 3 conv layers
    n_mel_channels = 16
    n_gender = 2
    n_intonation = 4

    N, Ty = 2, 32                      # conv stack -> T = 4 GRU time steps

    key = jax.random.PRNGKey(0)
    k_in, k_p = jax.random.split(key)
    mels = jax.random.normal(k_in, (N, Ty, n_mel_channels), jnp.float32)

    kg = _KeyGen(k_p)
    raw1 = make_encoder_params(kg, ref_enc_filters, n_mel_channels, n_gender)
    raw2 = make_encoder_params(kg, ref_enc_filters, n_mel_channels, n_intonation)

    # One-time host-side weight preprocessing (BN fold + dense conv operators
    # + GRU gate padding + classifier padding), outside the jitted forward.
    kp = stack_encoders([
        preprocess_encoder(raw1, Ty, n_mel_channels),
        preprocess_encoder(raw2, Ty, n_mel_channels),
    ])

    fwd = jax.jit(functools.partial(edm64_apply,
                                    n_gender=n_gender,
                                    n_intonation=n_intonation))
    emb1, emb2, pred1, pred2 = fwd(mels, kp)
    jax.block_until_ready((emb1, emb2, pred1, pred2))

    # Shape / sanity checks.
    assert emb1.shape == (N, EMB_DIM), emb1.shape
    assert emb2.shape == (N, EMB_DIM), emb2.shape
    assert pred1.shape == (N, n_gender), pred1.shape
    assert pred2.shape == (N, n_intonation), pred2.shape
    for a in (emb1, emb2, pred1, pred2):
        assert bool(jnp.all(jnp.isfinite(a)))
    assert bool(jnp.all((emb1 >= 0.0) & (emb1 <= 1.0)))   # sigmoid outputs
    assert bool(jnp.all((emb2 >= 0.0) & (emb2 <= 1.0)))

    # Numerical check vs a pure-JAX f32 reference (bf16 matmul drift expected).
    r_emb1, r_pred1 = _reference_forward(mels, raw1, n_mel_channels)
    r_emb2, r_pred2 = _reference_forward(mels, raw2, n_mel_channels)
    for got, ref in ((emb1, r_emb1), (pred1, r_pred1),
                     (emb2, r_emb2), (pred2, r_pred2)):
        assert bool(jnp.allclose(got, ref, rtol=6e-2, atol=6e-2)), \
            float(jnp.max(jnp.abs(got - ref)))

    print("KERNEL_OK")
</pallas_src>

<mosaic_0001>
module attributes {stable_mosaic.version = 11 : i64} {
  func.func @_encoder_kernel(%arg0: i32, %arg1: memref<2x512xf32, #tpu.memory_space<vmem>>, %arg2: memref<1x512x512xbf16, #tpu.memory_space<vmem>>, %arg3: memref<1x1x512xf32, #tpu.memory_space<vmem>>, %arg4: memref<1x512x256xbf16, #tpu.memory_space<vmem>>, %arg5: memref<1x1x256xf32, #tpu.memory_space<vmem>>, %arg6: memref<1x256x128xbf16, #tpu.memory_space<vmem>>, %arg7: memref<1x1x128xf32, #tpu.memory_space<vmem>>, %arg8: memref<1x128x1536xbf16, #tpu.memory_space<vmem>>, %arg9: memref<1x1x1536xf32, #tpu.memory_space<vmem>>, %arg10: memref<1x128x384xbf16, #tpu.memory_space<vmem>>, %arg11: memref<1x1x384xf32, #tpu.memory_space<vmem>>, %arg12: memref<1x128x64xbf16, #tpu.memory_space<vmem>>, %arg13: memref<1x1x64xf32, #tpu.memory_space<vmem>>, %arg14: memref<1x64x64xbf16, #tpu.memory_space<vmem>>, %arg15: memref<1x1x64xf32, #tpu.memory_space<vmem>>, %arg16: memref<1x64x64xbf16, #tpu.memory_space<vmem>>, %arg17: memref<1x1x64xf32, #tpu.memory_space<vmem>>, %arg18: memref<1x64x64xbf16, #tpu.memory_space<vmem>>, %arg19: memref<1x1x64xf32, #tpu.memory_space<vmem>>, %arg20: memref<1x2x128xf32, #tpu.memory_space<vmem>>) attributes {dimension_semantics = [#tpu.dimension_semantics<parallel>], iteration_bounds = array<i64: 2>, scalar_prefetch = 0 : i64, scratch_operands = 0 : i64, tpu.core_type = #tpu.core_type<tc>, window_params = [{pipeline_mode = #tpu.pipeline_mode<synchronous>, transform_indices = @transform_0, window_bounds = array<i64: 2, 512>}, {transform_indices = @transform_1, window_bounds = array<i64: 1, 512, 512>}, {transform_indices = @transform_2, window_bounds = array<i64: 1, 1, 512>}, {transform_indices = @transform_3, window_bounds = array<i64: 1, 512, 256>}, {transform_indices = @transform_4, window_bounds = array<i64: 1, 1, 256>}, {transform_indices = @transform_5, window_bounds = array<i64: 1, 256, 128>}, {transform_indices = @transform_6, window_bounds = array<i64: 1, 1, 128>}, {transform_indices = @transform_7, window_bounds = array<i64: 1, 128, 1536>}, {transform_indices = @transform_8, window_bounds = array<i64: 1, 1, 1536>}, {transform_indices = @transform_9, window_bounds = array<i64: 1, 128, 384>}, {transform_indices = @transform_10, window_bounds = array<i64: 1, 1, 384>}, {transform_indices = @transform_11, window_bounds = array<i64: 1, 128, 64>}, {transform_indices = @transform_12, window_bounds = array<i64: 1, 1, 64>}, {transform_indices = @transform_13, window_bounds = array<i64: 1, 64, 64>}, {transform_indices = @transform_14, window_bounds = array<i64: 1, 1, 64>}, {transform_indices = @transform_15, window_bounds = array<i64: 1, 64, 64>}, {transform_indices = @transform_16, window_bounds = array<i64: 1, 1, 64>}, {transform_indices = @transform_17, window_bounds = array<i64: 1, 64, 64>}, {transform_indices = @transform_18, window_bounds = array<i64: 1, 1, 64>}, {transform_indices = @transform_19, window_bounds = array<i64: 1, 2, 128>}]} {
    %c0 = arith.constant 0 : index
    %c0_0 = arith.constant 0 : index
    %0 = vector.load %arg1[%c0, %c0_0] : memref<2x512xf32, #tpu.memory_space<vmem>>, vector<2x512xf32>
    %1 = arith.truncf %0 : vector<2x512xf32> to vector<2x512xbf16>
    %c0_1 = arith.constant 0 : index
    %c0_2 = arith.constant 0 : index
    %c0_3 = arith.constant 0 : index
    %2 = vector.load %arg2[%c0_1, %c0_2, %c0_3] : memref<1x512x512xbf16, #tpu.memory_space<vmem>>, vector<1x512x512xbf16>
    %3 = vector.shape_cast %2 : vector<1x512x512xbf16> to vector<512x512xbf16>
    %cst = arith.constant dense<0.000000e+00> : vector<2x512xf32>
    %4 = tpu.matmul %1, %3, %cst {dimension_numbers = #tpu.dot_dimension_numbers<[1], [0], [0], [1], [0, 0, 1, 1], [], []>} : vector<2x512xbf16>, vector<512x512xbf16>, vector<2x512xf32> -> vector<2x512xf32>
    %c0_4 = arith.constant 0 : index
    %c0_5 = arith.constant 0 : index
    %c0_6 = arith.constant 0 : index
    %5 = vector.load %arg3[%c0_4, %c0_5, %c0_6] : memref<1x1x512xf32, #tpu.memory_space<vmem>>, vector<1x1x512xf32>
    %6 = vector.shape_cast %5 : vector<1x1x512xf32> to vector<1x512xf32>
    %7 = vector.broadcast %6 : vector<1x512xf32> to vector<2x512xf32>
    %8 = arith.addf %4, %7 : vector<2x512xf32>
    %cst_7 = arith.constant 0.000000e+00 : f32
    %9 = vector.broadcast %cst_7 : f32 to vector<2x512xf32>
    %10 = arith.maximumf %8, %9 : vector<2x512xf32>
    %11 = arith.truncf %10 : vector<2x512xf32> to vector<2x512xbf16>
    %c0_8 = arith.constant 0 : index
    %c0_9 = arith.constant 0 : index
    %c0_10 = arith.constant 0 : index
    %12 = vector.load %arg4[%c0_8, %c0_9, %c0_10] : memref<1x512x256xbf16, #tpu.memory_space<vmem>>, vector<1x512x256xbf16>
    %13 = vector.shape_cast %12 : vector<1x512x256xbf16> to vector<512x256xbf16>
    %cst_11 = arith.constant dense<0.000000e+00> : vector<2x256xf32>
    %14 = tpu.matmul %11, %13, %cst_11 {dimension_numbers = #tpu.dot_dimension_numbers<[1], [0], [0], [1], [0, 0, 1, 1], [], []>} : vector<2x512xbf16>, vector<512x256xbf16>, vector<2x256xf32> -> vector<2x256xf32>
    %c0_12 = arith.constant 0 : index
    %c0_13 = arith.constant 0 : index
    %c0_14 = arith.constant 0 : index
    %15 = vector.load %arg5[%c0_12, %c0_13, %c0_14] : memref<1x1x256xf32, #tpu.memory_space<vmem>>, vector<1x1x256xf32>
    %16 = vector.shape_cast %15 : vector<1x1x256xf32> to vector<1x256xf32>
    %17 = vector.broadcast %16 : vector<1x256xf32> to vector<2x256xf32>
    %18 = arith.addf %14, %17 : vector<2x256xf32>
    %cst_15 = arith.constant 0.000000e+00 : f32
    %19 = vector.broadcast %cst_15 : f32 to vector<2x256xf32>
    %20 = arith.maximumf %18, %19 : vector<2x256xf32>
    %21 = arith.truncf %20 : vector<2x256xf32> to vector<2x256xbf16>
    %c0_16 = arith.constant 0 : index
    %c0_17 = arith.constant 0 : index
    %c0_18 = arith.constant 0 : index
    %22 = vector.load %arg6[%c0_16, %c0_17, %c0_18] : memref<1x256x128xbf16, #tpu.memory_space<vmem>>, vector<1x256x128xbf16>
    %23 = vector.shape_cast %22 : vector<1x256x128xbf16> to vector<256x128xbf16>
    %cst_19 = arith.constant dense<0.000000e+00> : vector<2x128xf32>
    %24 = tpu.matmul %21, %23, %cst_19 {dimension_numbers = #tpu.dot_dimension_numbers<[1], [0], [0], [1], [0, 0, 1, 1], [], []>} : vector<2x256xbf16>, vector<256x128xbf16>, vector<2x128xf32> -> vector<2x128xf32>
    %c0_20 = arith.constant 0 : index
    %c0_21 = arith.constant 0 : index
    %c0_22 = arith.constant 0 : index
    %25 = vector.load %arg7[%c0_20, %c0_21, %c0_22] : memref<1x1x128xf32, #tpu.memory_space<vmem>>, vector<1x1x128xf32>
    %26 = vector.shape_cast %25 : vector<1x1x128xf32> to vector<1x128xf32>
    %27 = vector.broadcast %26 : vector<1x128xf32> to vector<2x128xf32>
    %28 = arith.addf %24, %27 : vector<2x128xf32>
    %cst_23 = arith.constant 0.000000e+00 : f32
    %29 = vector.broadcast %cst_23 : f32 to vector<2x128xf32>
    %30 = arith.maximumf %28, %29 : vector<2x128xf32>
    %31 = arith.truncf %30 : vector<2x128xf32> to vector<2x128xbf16>
    %c0_24 = arith.constant 0 : index
    %c0_25 = arith.constant 0 : index
    %c0_26 = arith.constant 0 : index
    %32 = vector.load %arg8[%c0_24, %c0_25, %c0_26] : memref<1x128x1536xbf16, #tpu.memory_space<vmem>>, vector<1x128x1536xbf16>
    %33 = vector.shape_cast %32 : vector<1x128x1536xbf16> to vector<128x1536xbf16>
    %cst_27 = arith.constant dense<0.000000e+00> : vector<2x1536xf32>
    %34 = tpu.matmul %31, %33, %cst_27 {dimension_numbers = #tpu.dot_dimension_numbers<[1], [0], [0], [1], [0, 0, 1, 1], [], []>} : vector<2x128xbf16>, vector<128x1536xbf16>, vector<2x1536xf32> -> vector<2x1536xf32>
    %c0_28 = arith.constant 0 : index
    %c0_29 = arith.constant 0 : index
    %c0_30 = arith.constant 0 : index
    %35 = vector.load %arg9[%c0_28, %c0_29, %c0_30] : memref<1x1x1536xf32, #tpu.memory_space<vmem>>, vector<1x1x1536xf32>
    %36 = vector.shape_cast %35 : vector<1x1x1536xf32> to vector<1x1536xf32>
    %37 = vector.broadcast %36 : vector<1x1536xf32> to vector<2x1536xf32>
    %38 = arith.addf %34, %37 : vector<2x1536xf32>
    %c0_31 = arith.constant 0 : index
    %c0_32 = arith.constant 0 : index
    %c0_33 = arith.constant 0 : index
    %39 = vector.load %arg10[%c0_31, %c0_32, %c0_33] : memref<1x128x384xbf16, #tpu.memory_space<vmem>>, vector<1x128x384xbf16>
    %40 = vector.shape_cast %39 : vector<1x128x384xbf16> to vector<128x384xbf16>
    %c0_34 = arith.constant 0 : index
    %c0_35 = arith.constant 0 : index
    %c0_36 = arith.constant 0 : index
    %41 = vector.load %arg11[%c0_34, %c0_35, %c0_36] : memref<1x1x384xf32, #tpu.memory_space<vmem>>, vector<1x1x384xf32>
    %42 = vector.shape_cast %41 : vector<1x1x384xf32> to vector<1x384xf32>
    %cst_37 = arith.constant 0.000000e+00 : f32
    %43 = vector.broadcast %cst_37 : f32 to vector<2x128xf32>
    %44 = vector.extract_strided_slice %38 {offsets = [0, 0], sizes = [2, 384], strides = [1, 1]} : vector<2x1536xf32> to vector<2x384xf32>
    %45 = arith.truncf %43 : vector<2x128xf32> to vector<2x128xbf16>
    %cst_38 = arith.constant dense<0.000000e+00> : vector<2x384xf32>
    %46 = tpu.matmul %45, %40, %cst_38 {dimension_numbers = #tpu.dot_dimension_numbers<[1], [0], [0], [1], [0, 0, 1, 1], [], []>} : vector<2x128xbf16>, vector<128x384xbf16>, vector<2x384xf32> -> vector<2x384xf32>
    %47 = vector.broadcast %42 : vector<1x384xf32> to vector<2x384xf32>
    %48 = arith.addf %46, %47 : vector<2x384xf32>
    %49 = vector.extract_strided_slice %44 {offsets = [0, 0], sizes = [2, 128], strides = [1, 1]} : vector<2x384xf32> to vector<2x128xf32>
    %50 = vector.extract_strided_slice %48 {offsets = [0, 0], sizes = [2, 128], strides = [1, 1]} : vector<2x384xf32> to vector<2x128xf32>
    %51 = arith.addf %49, %50 : vector<2x128xf32>
    %52 = arith.negf %51 : vector<2x128xf32>
    %53 = math.exp %52 : vector<2x128xf32>
    %cst_39 = arith.constant 1.000000e+00 : f32
    %54 = vector.broadcast %cst_39 : f32 to vector<2x128xf32>
    %55 = arith.addf %54, %53 : vector<2x128xf32>
    %56 = arith.divf %54, %55 : vector<2x128xf32>
    %57 = vector.extract_strided_slice %44 {offsets = [0, 128], sizes = [2, 128], strides = [1, 1]} : vector<2x384xf32> to vector<2x128xf32>
    %58 = vector.extract_strided_slice %48 {offsets = [0, 128], sizes = [2, 128], strides = [1, 1]} : vector<2x384xf32> to vector<2x128xf32>
    %59 = arith.addf %57, %58 : vector<2x128xf32>
    %60 = arith.negf %59 : vector<2x128xf32>
    %61 = math.exp %60 : vector<2x128xf32>
    %cst_40 = arith.constant 1.000000e+00 : f32
    %62 = vector.broadcast %cst_40 : f32 to vector<2x128xf32>
    %63 = arith.addf %62, %61 : vector<2x128xf32>
    %64 = arith.divf %62, %63 : vector<2x128xf32>
    %65 = vector.extract_strided_slice %44 {offsets = [0, 256], sizes = [2, 128], strides = [1, 1]} : vector<2x384xf32> to vector<2x128xf32>
    %66 = vector.extract_strided_slice %48 {offsets = [0, 256], sizes = [2, 128], strides = [1, 1]} : vector<2x384xf32> to vector<2x128xf32>
    %67 = arith.mulf %56, %66 : vector<2x128xf32>
    %68 = arith.addf %65, %67 : vector<2x128xf32>
    %69 = math.tanh %68 : vector<2x128xf32>
    %cst_41 = arith.constant 1.000000e+00 : f32
    %70 = vector.broadcast %cst_41 : f32 to vector<2x128xf32>
    %71 = arith.subf %70, %64 : vector<2x128xf32>
    %72 = arith.mulf %71, %69 : vector<2x128xf32>
    %73 = arith.mulf %64, %43 : vector<2x128xf32>
    %74 = arith.addf %72, %73 : vector<2x128xf32>
    %75 = vector.extract_strided_slice %38 {offsets = [0, 384], sizes = [2, 384], strides = [1, 1]} : vector<2x1536xf32> to vector<2x384xf32>
    %76 = arith.truncf %74 : vector<2x128xf32> to vector<2x128xbf16>
    %cst_42 = arith.constant dense<0.000000e+00> : vector<2x384xf32>
    %77 = tpu.matmul %76, %40, %cst_42 {dimension_numbers = #tpu.dot_dimension_numbers<[1], [0], [0], [1], [0, 0, 1, 1], [], []>} : vector<2x128xbf16>, vector<128x384xbf16>, vector<2x384xf32> -> vector<2x384xf32>
    %78 = vector.broadcast %42 : vector<1x384xf32> to vector<2x384xf32>
    %79 = arith.addf %77, %78 : vector<2x384xf32>
    %80 = vector.extract_strided_slice %75 {offsets = [0, 0], sizes = [2, 128], strides = [1, 1]} : vector<2x384xf32> to vector<2x128xf32>
    %81 = vector.extract_strided_slice %79 {offsets = [0, 0], sizes = [2, 128], strides = [1, 1]} : vector<2x384xf32> to vector<2x128xf32>
    %82 = arith.addf %80, %81 : vector<2x128xf32>
    %83 = arith.negf %82 : vector<2x128xf32>
    %84 = math.exp %83 : vector<2x128xf32>
    %cst_43 = arith.constant 1.000000e+00 : f32
    %85 = vector.broadcast %cst_43 : f32 to vector<2x128xf32>
    %86 = arith.addf %85, %84 : vector<2x128xf32>
    %87 = arith.divf %85, %86 : vector<2x128xf32>
    %88 = vector.extract_strided_slice %75 {offsets = [0, 128], sizes = [2, 128], strides = [1, 1]} : vector<2x384xf32> to vector<2x128xf32>
    %89 = vector.extract_strided_slice %79 {offsets = [0, 128], sizes = [2, 128], strides = [1, 1]} : vector<2x384xf32> to vector<2x128xf32>
    %90 = arith.addf %88, %89 : vector<2x128xf32>
    %91 = arith.negf %90 : vector<2x128xf32>
    %92 = math.exp %91 : vector<2x128xf32>
    %cst_44 = arith.constant 1.000000e+00 : f32
    %93 = vector.broadcast %cst_44 : f32 to vector<2x128xf32>
    %94 = arith.addf %93, %92 : vector<2x128xf32>
    %95 = arith.divf %93, %94 : vector<2x128xf32>
    %96 = vector.extract_strided_slice %75 {offsets = [0, 256], sizes = [2, 128], strides = [1, 1]} : vector<2x384xf32> to vector<2x128xf32>
    %97 = vector.extract_strided_slice %79 {offsets = [0, 256], sizes = [2, 128], strides = [1, 1]} : vector<2x384xf32> to vector<2x128xf32>
    %98 = arith.mulf %87, %97 : vector<2x128xf32>
    %99 = arith.addf %96, %98 : vector<2x128xf32>
    %100 = math.tanh %99 : vector<2x128xf32>
    %cst_45 = arith.constant 1.000000e+00 : f32
    %101 = vector.broadcast %cst_45 : f32 to vector<2x128xf32>
    %102 = arith.subf %101, %95 : vector<2x128xf32>
    %103 = arith.mulf %102, %100 : vector<2x128xf32>
    %104 = arith.mulf %95, %74 : vector<2x128xf32>
    %105 = arith.addf %103, %104 : vector<2x128xf32>
    %106 = vector.extract_strided_slice %38 {offsets = [0, 768], sizes = [2, 384], strides = [1, 1]} : vector<2x1536xf32> to vector<2x384xf32>
    %107 = arith.truncf %105 : vector<2x128xf32> to vector<2x128xbf16>
    %cst_46 = arith.constant dense<0.000000e+00> : vector<2x384xf32>
    %108 = tpu.matmul %107, %40, %cst_46 {dimension_numbers = #tpu.dot_dimension_numbers<[1], [0], [0], [1], [0, 0, 1, 1], [], []>} : vector<2x128xbf16>, vector<128x384xbf16>, vector<2x384xf32> -> vector<2x384xf32>
    %109 = vector.broadcast %42 : vector<1x384xf32> to vector<2x384xf32>
    %110 = arith.addf %108, %109 : vector<2x384xf32>
    %111 = vector.extract_strided_slice %106 {offsets = [0, 0], sizes = [2, 128], strides = [1, 1]} : vector<2x384xf32> to vector<2x128xf32>
    %112 = vector.extract_strided_slice %110 {offsets = [0, 0], sizes = [2, 128], strides = [1, 1]} : vector<2x384xf32> to vector<2x128xf32>
    %113 = arith.addf %111, %112 : vector<2x128xf32>
    %114 = arith.negf %113 : vector<2x128xf32>
    %115 = math.exp %114 : vector<2x128xf32>
    %cst_47 = arith.constant 1.000000e+00 : f32
    %116 = vector.broadcast %cst_47 : f32 to vector<2x128xf32>
    %117 = arith.addf %116, %115 : vector<2x128xf32>
    %118 = arith.divf %116, %117 : vector<2x128xf32>
    %119 = vector.extract_strided_slice %106 {offsets = [0, 128], sizes = [2, 128], strides = [1, 1]} : vector<2x384xf32> to vector<2x128xf32>
    %120 = vector.extract_strided_slice %110 {offsets = [0, 128], sizes = [2, 128], strides = [1, 1]} : vector<2x384xf32> to vector<2x128xf32>
    %121 = arith.addf %119, %120 : vector<2x128xf32>
    %122 = arith.negf %121 : vector<2x128xf32>
    %123 = math.exp %122 : vector<2x128xf32>
    %cst_48 = arith.constant 1.000000e+00 : f32
    %124 = vector.broadcast %cst_48 : f32 to vector<2x128xf32>
    %125 = arith.addf %124, %123 : vector<2x128xf32>
    %126 = arith.divf %124, %125 : vector<2x128xf32>
    %127 = vector.extract_strided_slice %106 {offsets = [0, 256], sizes = [2, 128], strides = [1, 1]} : vector<2x384xf32> to vector<2x128xf32>
    %128 = vector.extract_strided_slice %110 {offsets = [0, 256], sizes = [2, 128], strides = [1, 1]} : vector<2x384xf32> to vector<2x128xf32>
    %129 = arith.mulf %118, %128 : vector<2x128xf32>
    %130 = arith.addf %127, %129 : vector<2x128xf32>
    %131 = math.tanh %130 : vector<2x128xf32>
    %cst_49 = arith.constant 1.000000e+00 : f32
    %132 = vector.broadcast %cst_49 : f32 to vector<2x128xf32>
    %133 = arith.subf %132, %126 : vector<2x128xf32>
    %134 = arith.mulf %133, %131 : vector<2x128xf32>
    %135 = arith.mulf %126, %105 : vector<2x128xf32>
    %136 = arith.addf %134, %135 : vector<2x128xf32>
    %137 = vector.extract_strided_slice %38 {offsets = [0, 1152], sizes = [2, 384], strides = [1, 1]} : vector<2x1536xf32> to vector<2x384xf32>
    %138 = arith.truncf %136 : vector<2x128xf32> to vector<2x128xbf16>
    %cst_50 = arith.constant dense<0.000000e+00> : vector<2x384xf32>
    %139 = tpu.matmul %138, %40, %cst_50 {dimension_numbers = #tpu.dot_dimension_numbers<[1], [0], [0], [1], [0, 0, 1, 1], [], []>} : vector<2x128xbf16>, vector<128x384xbf16>, vector<2x384xf32> -> vector<2x384xf32>
    %140 = vector.broadcast %42 : vector<1x384xf32> to vector<2x384xf32>
    %141 = arith.addf %139, %140 : vector<2x384xf32>
    %142 = vector.extract_strided_slice %137 {offsets = [0, 0], sizes = [2, 128], strides = [1, 1]} : vector<2x384xf32> to vector<2x128xf32>
    %143 = vector.extract_strided_slice %141 {offsets = [0, 0], sizes = [2, 128], strides = [1, 1]} : vector<2x384xf32> to vector<2x128xf32>
    %144 = arith.addf %142, %143 : vector<2x128xf32>
    %145 = arith.negf %144 : vector<2x128xf32>
    %146 = math.exp %145 : vector<2x128xf32>
    %cst_51 = arith.constant 1.000000e+00 : f32
    %147 = vector.broadcast %cst_51 : f32 to vector<2x128xf32>
    %148 = arith.addf %147, %146 : vector<2x128xf32>
    %149 = arith.divf %147, %148 : vector<2x128xf32>
    %150 = vector.extract_strided_slice %137 {offsets = [0, 128], sizes = [2, 128], strides = [1, 1]} : vector<2x384xf32> to vector<2x128xf32>
    %151 = vector.extract_strided_slice %141 {offsets = [0, 128], sizes = [2, 128], strides = [1, 1]} : vector<2x384xf32> to vector<2x128xf32>
    %152 = arith.addf %150, %151 : vector<2x128xf32>
    %153 = arith.negf %152 : vector<2x128xf32>
    %154 = math.exp %153 : vector<2x128xf32>
    %cst_52 = arith.constant 1.000000e+00 : f32
    %155 = vector.broadcast %cst_52 : f32 to vector<2x128xf32>
    %156 = arith.addf %155, %154 : vector<2x128xf32>
    %157 = arith.divf %155, %156 : vector<2x128xf32>
    %158 = vector.extract_strided_slice %137 {offsets = [0, 256], sizes = [2, 128], strides = [1, 1]} : vector<2x384xf32> to vector<2x128xf32>
    %159 = vector.extract_strided_slice %141 {offsets = [0, 256], sizes = [2, 128], strides = [1, 1]} : vector<2x384xf32> to vector<2x128xf32>
    %160 = arith.mulf %149, %159 : vector<2x128xf32>
    %161 = arith.addf %158, %160 : vector<2x128xf32>
    %162 = math.tanh %161 : vector<2x128xf32>
    %cst_53 = arith.constant 1.000000e+00 : f32
    %163 = vector.broadcast %cst_53 : f32 to vector<2x128xf32>
    %164 = arith.subf %163, %157 : vector<2x128xf32>
    %165 = arith.mulf %164, %162 : vector<2x128xf32>
    %166 = arith.mulf %157, %136 : vector<2x128xf32>
    %167 = arith.addf %165, %166 : vector<2x128xf32>
    %168 = arith.truncf %167 : vector<2x128xf32> to vector<2x128xbf16>
    %c0_54 = arith.constant 0 : index
    %c0_55 = arith.constant 0 : index
    %c0_56 = arith.constant 0 : index
    %169 = vector.load %arg12[%c0_54, %c0_55, %c0_56] : memref<1x128x64xbf16, #tpu.memory_space<vmem>>, vector<1x128x64xbf16>
    %170 = vector.shape_cast %169 : vector<1x128x64xbf16> to vector<128x64xbf16>
    %cst_57 = arith.constant dense<0.000000e+00> : vector<2x64xf32>
    %171 = tpu.matmul %168, %170, %cst_57 {dimension_numbers = #tpu.dot_dimension_numbers<[1], [0], [0], [1], [0, 0, 1, 1], [], []>} : vector<2x128xbf16>, vector<128x64xbf16>, vector<2x64xf32> -> vector<2x64xf32>
    %c0_58 = arith.constant 0 : index
    %c0_59 = arith.constant 0 : index
    %c0_60 = arith.constant 0 : index
    %172 = vector.load %arg13[%c0_58, %c0_59, %c0_60] : memref<1x1x64xf32, #tpu.memory_space<vmem>>, vector<1x1x64xf32>
    %173 = vector.shape_cast %172 : vector<1x1x64xf32> to vector<1x64xf32>
    %174 = vector.broadcast %173 : vector<1x64xf32> to vector<2x64xf32>
    %175 = arith.addf %171, %174 : vector<2x64xf32>
    %cst_61 = arith.constant 0.000000e+00 : f32
    %176 = vector.broadcast %cst_61 : f32 to vector<2x64xf32>
    %177 = arith.maximumf %175, %176 : vector<2x64xf32>
    %178 = arith.truncf %177 : vector<2x64xf32> to vector<2x64xbf16>
    %c0_62 = arith.constant 0 : index
    %c0_63 = arith.constant 0 : index
    %c0_64 = arith.constant 0 : index
    %179 = vector.load %arg14[%c0_62, %c0_63, %c0_64] : memref<1x64x64xbf16, #tpu.memory_space<vmem>>, vector<1x64x64xbf16>
    %180 = vector.shape_cast %179 : vector<1x64x64xbf16> to vector<64x64xbf16>
    %cst_65 = arith.constant dense<0.000000e+00> : vector<2x64xf32>
    %181 = tpu.matmul %178, %180, %cst_65 {dimension_numbers = #tpu.dot_dimension_numbers<[1], [0], [0], [1], [0, 0, 1, 1], [], []>} : vector<2x64xbf16>, vector<64x64xbf16>, vector<2x64xf32> -> vector<2x64xf32>
    %c0_66 = arith.constant 0 : index
    %c0_67 = arith.constant 0 : index
    %c0_68 = arith.constant 0 : index
    %182 = vector.load %arg15[%c0_66, %c0_67, %c0_68] : memref<1x1x64xf32, #tpu.memory_space<vmem>>, vector<1x1x64xf32>
    %183 = vector.shape_cast %182 : vector<1x1x64xf32> to vector<1x64xf32>
    %184 = vector.broadcast %183 : vector<1x64xf32> to vector<2x64xf32>
    %185 = arith.addf %181, %184 : vector<2x64xf32>
    %cst_69 = arith.constant 0.000000e+00 : f32
    %186 = vector.broadcast %cst_69 : f32 to vector<2x64xf32>
    %187 = arith.maximumf %185, %186 : vector<2x64xf32>
    %188 = arith.truncf %187 : vector<2x64xf32> to vector<2x64xbf16>
    %c0_70 = arith.constant 0 : index
    %c0_71 = arith.constant 0 : index
    %c0_72 = arith.constant 0 : index
    %189 = vector.load %arg16[%c0_70, %c0_71, %c0_72] : memref<1x64x64xbf16, #tpu.memory_space<vmem>>, vector<1x64x64xbf16>
    %190 = vector.shape_cast %189 : vector<1x64x64xbf16> to vector<64x64xbf16>
    %cst_73 = arith.constant dense<0.000000e+00> : vector<2x64xf32>
    %191 = tpu.matmul %188, %190, %cst_73 {dimension_numbers = #tpu.dot_dimension_numbers<[1], [0], [0], [1], [0, 0, 1, 1], [], []>} : vector<2x64xbf16>, vector<64x64xbf16>, vector<2x64xf32> -> vector<2x64xf32>
    %c0_74 = arith.constant 0 : index
    %c0_75 = arith.constant 0 : index
    %c0_76 = arith.constant 0 : index
    %192 = vector.load %arg17[%c0_74, %c0_75, %c0_76] : memref<1x1x64xf32, #tpu.memory_space<vmem>>, vector<1x1x64xf32>
    %193 = vector.shape_cast %192 : vector<1x1x64xf32> to vector<1x64xf32>
    %194 = vector.broadcast %193 : vector<1x64xf32> to vector<2x64xf32>
    %195 = arith.addf %191, %194 : vector<2x64xf32>
    %196 = arith.negf %195 : vector<2x64xf32>
    %197 = math.exp %196 : vector<2x64xf32>
    %cst_77 = arith.constant 1.000000e+00 : f32
    %198 = vector.broadcast %cst_77 : f32 to vector<2x64xf32>
    %199 = arith.addf %198, %197 : vector<2x64xf32>
    %200 = arith.divf %198, %199 : vector<2x64xf32>
    %201 = arith.truncf %200 : vector<2x64xf32> to vector<2x64xbf16>
    %c0_78 = arith.constant 0 : index
    %c0_79 = arith.constant 0 : index
    %c0_80 = arith.constant 0 : index
    %202 = vector.load %arg18[%c0_78, %c0_79, %c0_80] : memref<1x64x64xbf16, #tpu.memory_space<vmem>>, vector<1x64x64xbf16>
    %203 = vector.shape_cast %202 : vector<1x64x64xbf16> to vector<64x64xbf16>
    %cst_81 = arith.constant dense<0.000000e+00> : vector<2x64xf32>
    %204 = tpu.matmul %201, %203, %cst_81 {dimension_numbers = #tpu.dot_dimension_numbers<[1], [0], [0], [1], [0, 0, 1, 1], [], []>} : vector<2x64xbf16>, vector<64x64xbf16>, vector<2x64xf32> -> vector<2x64xf32>
    %c0_82 = arith.constant 0 : index
    %c0_83 = arith.constant 0 : index
    %c0_84 = arith.constant 0 : index
    %205 = vector.load %arg19[%c0_82, %c0_83, %c0_84] : memref<1x1x64xf32, #tpu.memory_space<vmem>>, vector<1x1x64xf32>
    %206 = vector.shape_cast %205 : vector<1x1x64xf32> to vector<1x64xf32>
    %207 = vector.broadcast %206 : vector<1x64xf32> to vector<2x64xf32>
    %208 = arith.addf %204, %207 : vector<2x64xf32>
    %c0_85 = arith.constant 0 : index
    %c0_86 = arith.constant 0 : index
    %c0_87 = arith.constant 0 : index
    %209 = vector.load %arg20[%c0_85, %c0_86, %c0_87] : memref<1x2x128xf32, #tpu.memory_space<vmem>>, vector<1x2x64xf32>
    %210 = vector.shape_cast %209 : vector<1x2x64xf32> to vector<2x64xf32>
    %211 = vector.shape_cast %200 : vector<2x64xf32> to vector<1x2x64xf32>
    tpu.vector_store %arg20[%c0_85, %c0_86, %c0_87], %211 {strides = array<i32>} : memref<1x2x128xf32, #tpu.memory_space<vmem>>, vector<1x2x64xf32>,
    %c0_88 = arith.constant 0 : index
    %c0_89 = arith.constant 0 : index
    %c64 = arith.constant 64 : index
    %212 = vector.load %arg20[%c0_88, %c0_89, %c64] : memref<1x2x128xf32, #tpu.memory_space<vmem>>, vector<1x2x64xf32>
    %213 = vector.shape_cast %212 : vector<1x2x64xf32> to vector<2x64xf32>
    %214 = vector.shape_cast %208 : vector<2x64xf32> to vector<1x2x64xf32>
    tpu.vector_store %arg20[%c0_88, %c0_89, %c64], %214 {strides = array<i32>} : memref<1x2x128xf32, #tpu.memory_space<vmem>>, vector<1x2x64xf32>,
    return
  }
  func.func @transform_0(%arg0: i32) -> (i32, i32) {
    %c0_i32 = arith.constant 0 : i32
    %c0_i32_0 = arith.constant 0 : i32
    %c0_i32_1 = arith.constant 0 : i32
    return %c0_i32, %c0_i32_0 : i32, i32
  }
  func.func @transform_1(%arg0: i32) -> (i32, i32, i32) {
    %c0_i32 = arith.constant 0 : i32
    %c0_i32_0 = arith.constant 0 : i32
    %c0_i32_1 = arith.constant 0 : i32
    return %arg0, %c0_i32, %c0_i32_0 : i32, i32, i32
  }
  func.func @transform_2(%arg0: i32) -> (i32, i32, i32) {
    %c0_i32 = arith.constant 0 : i32
    %c0_i32_0 = arith.constant 0 : i32
    %c0_i32_1 = arith.constant 0 : i32
    return %arg0, %c0_i32, %c0_i32_0 : i32, i32, i32
  }
  func.func @transform_3(%arg0: i32) -> (i32, i32, i32) {
    %c0_i32 = arith.constant 0 : i32
    %c0_i32_0 = arith.constant 0 : i32
    %c0_i32_1 = arith.constant 0 : i32
    return %arg0, %c0_i32, %c0_i32_0 : i32, i32, i32
  }
  func.func @transform_4(%arg0: i32) -> (i32, i32, i32) {
    %c0_i32 = arith.constant 0 : i32
    %c0_i32_0 = arith.constant 0 : i32
    %c0_i32_1 = arith.constant 0 : i32
    return %arg0, %c0_i32, %c0_i32_0 : i32, i32, i32
  }
  func.func @transform_5(%arg0: i32) -> (i32, i32, i32) {
    %c0_i32 = arith.constant 0 : i32
    %c0_i32_0 = arith.constant 0 : i32
    %c0_i32_1 = arith.constant 0 : i32
    return %arg0, %c0_i32, %c0_i32_0 : i32, i32, i32
  }
  func.func @transform_6(%arg0: i32) -> (i32, i32, i32) {
    %c0_i32 = arith.constant 0 : i32
    %c0_i32_0 = arith.constant 0 : i32
    %c0_i32_1 = arith.constant 0 : i32
    return %arg0, %c0_i32, %c0_i32_0 : i32, i32, i32
  }
  func.func @transform_7(%arg0: i32) -> (i32, i32, i32) {
    %c0_i32 = arith.constant 0 : i32
    %c0_i32_0 = arith.constant 0 : i32
    %c0_i32_1 = arith.constant 0 : i32
    return %arg0, %c0_i32, %c0_i32_0 : i32, i32, i32
  }
  func.func @transform_8(%arg0: i32) -> (i32, i32, i32) {
    %c0_i32 = arith.constant 0 : i32
    %c0_i32_0 = arith.constant 0 : i32
    %c0_i32_1 = arith.constant 0 : i32
    return %arg0, %c0_i32, %c0_i32_0 : i32, i32, i32
  }
  func.func @transform_9(%arg0: i32) -> (i32, i32, i32) {
    %c0_i32 = arith.constant 0 : i32
    %c0_i32_0 = arith.constant 0 : i32
    %c0_i32_1 = arith.constant 0 : i32
    return %arg0, %c0_i32, %c0_i32_0 : i32, i32, i32
  }
  func.func @transform_10(%arg0: i32) -> (i32, i32, i32) {
    %c0_i32 = arith.constant 0 : i32
    %c0_i32_0 = arith.constant 0 : i32
    %c0_i32_1 = arith.constant 0 : i32
    return %arg0, %c0_i32, %c0_i32_0 : i32, i32, i32
  }
  func.func @transform_11(%arg0: i32) -> (i32, i32, i32) {
    %c0_i32 = arith.constant 0 : i32
    %c0_i32_0 = arith.constant 0 : i32
    %c0_i32_1 = arith.constant 0 : i32
    return %arg0, %c0_i32, %c0_i32_0 : i32, i32, i32
  }
  func.func @transform_12(%arg0: i32) -> (i32, i32, i32) {
    %c0_i32 = arith.constant 0 : i32
    %c0_i32_0 = arith.constant 0 : i32
    %c0_i32_1 = arith.constant 0 : i32
    return %arg0, %c0_i32, %c0_i32_0 : i32, i32, i32
  }
  func.func @transform_13(%arg0: i32) -> (i32, i32, i32) {
    %c0_i32 = arith.constant 0 : i32
    %c0_i32_0 = arith.constant 0 : i32
    %c0_i32_1 = arith.constant 0 : i32
    return %arg0, %c0_i32, %c0_i32_0 : i32, i32, i32
  }
  func.func @transform_14(%arg0: i32) -> (i32, i32, i32) {
    %c0_i32 = arith.constant 0 : i32
    %c0_i32_0 = arith.constant 0 : i32
    %c0_i32_1 = arith.constant 0 : i32
    return %arg0, %c0_i32, %c0_i32_0 : i32, i32, i32
  }
  func.func @transform_15(%arg0: i32) -> (i32, i32, i32) {
    %c0_i32 = arith.constant 0 : i32
    %c0_i32_0 = arith.constant 0 : i32
    %c0_i32_1 = arith.constant 0 : i32
    return %arg0, %c0_i32, %c0_i32_0 : i32, i32, i32
  }
  func.func @transform_16(%arg0: i32) -> (i32, i32, i32) {
    %c0_i32 = arith.constant 0 : i32
    %c0_i32_0 = arith.constant 0 : i32
    %c0_i32_1 = arith.constant 0 : i32
    return %arg0, %c0_i32, %c0_i32_0 : i32, i32, i32
  }
  func.func @transform_17(%arg0: i32) -> (i32, i32, i32) {
    %c0_i32 = arith.constant 0 : i32
    %c0_i32_0 = arith.constant 0 : i32
    %c0_i32_1 = arith.constant 0 : i32
    return %arg0, %c0_i32, %c0_i32_0 : i32, i32, i32
  }
  func.func @transform_18(%arg0: i32) -> (i32, i32, i32) {
    %c0_i32 = arith.constant 0 : i32
    %c0_i32_0 = arith.constant 0 : i32
    %c0_i32_1 = arith.constant 0 : i32
    return %arg0, %c0_i32, %c0_i32_0 : i32, i32, i32
  }
  func.func @transform_19(%arg0: i32) -> (i32, i32, i32) {
    %c0_i32 = arith.constant 0 : i32
    %c0_i32_0 = arith.constant 0 : i32
    %c0_i32_1 = arith.constant 0 : i32
    return %arg0, %c0_i32, %c0_i32_0 : i32, i32, i32
  }
}

</mosaic_0001>

<bundles_post_ra>
// kernel: edm64_apply.1
= control target key start
LH: loop header
LB: loop body
LE: loop exit
PB: predicated region body
PF: predicated region fallthrough
CT: control target
= control target key end

     0   :  { %s8473_s0 = inlined_call_operand.vmem [shape: f32[2,512], index: 0, kind: input, shape index: {}]   ;;  %s8474_s1 = inlined_call_operand.hbm [shape: bf16[2,512,512], index: 1, kind: input, shape index: {}]   ;;  %s8475_s2 = inlined_call_operand.vmem [shape: f32[2,1,512], index: 2, kind: input, shape index: {}]   ;;  %s8476_s3 = inlined_call_operand.hbm [shape: bf16[2,512,256], index: 3, kind: input, shape index: {}]   ;;  %s8477_s4 = inlined_call_operand.vmem [shape: f32[2,1,256], index: 4, kind: input, shape index: {}]   ;;  %s8478_s5 = inlined_call_operand.vmem [shape: bf16[2,256,128], index: 5, kind: input, shape index: {}]   ;;  %s8479_s6 = inlined_call_operand.vmem [shape: f32[2,1,128], index: 6, kind: input, shape index: {}]   ;;  %s8480_s7 = inlined_call_operand.hbm [shape: bf16[2,128,1536], index: 7, kind: input, shape index: {}]   ;;  %s8481_s8 = inlined_call_operand.vmem [shape: f32[2,1,1536], index: 8, kind: input, shape index: {}]   ;;  %s8482_s9 = inlined_call_operand.hbm [shape: bf16[2,128,384], index: 9, kind: input, shape index: {}]   ;;  %s8483_s10 = inlined_call_operand.vmem [shape: f32[2,1,384], index: 10, kind: input, shape index: {}]   ;;  %s8484_s11 = inlined_call_operand.vmem [shape: bf16[2,128,64], index: 11, kind: input, shape index: {}]   ;;  %s8485_s12 = inlined_call_operand.hbm [shape: f32[2,1,64], index: 12, kind: input, shape index: {}]   ;;  %s8486_s13 = inlined_call_operand.hbm [shape: bf16[2,64,64], index: 13, kind: input, shape index: {}]   ;;  %s8487_s14 = inlined_call_operand.hbm [shape: f32[2,1,64], index: 14, kind: input, shape index: {}]   ;;  %s8488_s15 = inlined_call_operand.hbm [shape: bf16[2,64,64], index: 15, kind: input, shape index: {}]   ;;  %s8489_s16 = inlined_call_operand.hbm [shape: f32[2,1,64], index: 16, kind: input, shape index: {}]   ;;  %s8490_s17 = inlined_call_operand.hbm [shape: bf16[2,64,64], index: 17, kind: input, shape index: {}]   ;;  %s8491_s18 = inlined_call_operand.hbm [shape: f32[2,1,64], index: 18, kind: input, shape index: {}]   ;;  %s8492_s19 = inlined_call_operand.vmem [shape: f32[2,2,128], index: 19, kind: output, shape index: {}]  }
   0x1   :  { %8509 = sst [smem:[#allocation31_spill]] %s8473_s0 }
   0x2   :  { %8510 = sst [smem:[#allocation32_spill]] %s8474_s1 }
   0x3   :  { %8511 = sst [smem:[#allocation33_spill]] %s8475_s2 }
   0x4   :  { %8512 = sst [smem:[#allocation34_spill]] %s8476_s3 }
   0x5   :  { %8513 = sst [smem:[#allocation35_spill]] %s8477_s4 }
   0x6   :  { %8514 = sst [smem:[#allocation36_spill]] %s8478_s5 }
   0x7   :  { %8515 = sst [smem:[#allocation37_spill]] %s8479_s6 }
   0x8   :  { %8516 = sst [smem:[#allocation38_spill]] %s8481_s8 }
   0x9   :  { %8517 = sst [smem:[#allocation39_spill]] %s8482_s9 }
   0xa   :  { %8518 = sst [smem:[#allocation40_spill]] %s8483_s10 }
   0xb   :  { %8519 = sst [smem:[#allocation41_spill]] %s8484_s11 }
   0xc   :  { %8520 = sst [smem:[#allocation42_spill]] %s8486_s13 }
   0xd   :  { %8521 = sst [smem:[#allocation43_spill]] %s8488_s15 }
   0xe   :  { %8522 = sst [smem:[#allocation44_spill]] %s8492_s19 }
   0xf   :  { %24 = vsyncpa [#allocation3], 0 }
  0x10   :  { %26 = vsyncpa [#allocation3 + $0x1], 0 }
  0x11   :  { %27 = vsyncpa [#allocation5], 0 }
  0x12   :  { %29 = vsyncpa [#allocation5 + $0x1], 0 }
  0x13   :  { %30 = vsyncpa [#allocation8], 0 }
  0x14   :  { %32 = vsyncpa [#allocation8 + $0x1], 0 }
  0x15   :  { %33 = vsyncpa [#allocation11], 0 }
  0x16   :  { %35 = vsyncpa [#allocation11 + $0x1], 0 }
  0x17   :  { %36 = vsyncpa [#allocation14], 0 }
  0x18   :  { %38 = vsyncpa [#allocation14 + $0x1], 0 }
  0x19   :  { %39 = vsyncpa [#allocation17], 0 }
  0x1a   :  { %41 = vsyncpa [#allocation17 + $0x1], 0  ;;  %s7131_s0 = smov 0   ;;  %s7133_s30 = smov 0  }
  0x1b   :  { %s7135_s20 = smov 0   ;;  %s7137_s21 = smov 0  }
  0x1c LB: > { %8523 = sst [smem:[#allocation25_spill]] %s7009_s30  ;;  %s7150_s1 = sadd.s32 4294967295, %s7017_s21   ;;  %s7017_s21 = sphi %s7137_s21, %s8556_s21   ;;  %s7013_s20 = sphi %s7135_s20, %s8559_s20   ;;  %s7009_s30 = sphi %s7133_s30, %s8558_s30   ;;  %s7005_s0 = sphi %s7131_s0, %s8557_s0  }
  0x1d   : > { %8524 = sst [smem:[#allocation26_spill]] %s7013_s20  ;;  %s7153_s22 = sadd.s32 1, %s7017_s21  }
  0x1e   : > { %8525 = sst [smem:[#allocation27_spill]] %s7150_s1  ;;  %s72_s2 = ssub.s32 %s7017_s21, %s7153_s22 }
  0x1f   : > { %8526 = sst [smem:[#allocation28_spill]] %s7153_s22  ;;  %s75_s23 = sadd.s32 1, %s7013_s20 }
  0x20   : > { %p73_p0 = scmp.eq.s32.totalorder %s72_s2, 0  ;;  %p82_p1 = scmp.ne.s32.totalorder %s7013_s20, %s7009_s30 }
  0x21   : > { %p83_p2 = scmp.eq.s32.totalorder %s7017_s21, 0  ;;  %p88_p3 = scmp.ne.s32.totalorder %s7009_s30, %s7005_s0 }
  0x22   : > { %s7163_s24 = scalar_select %p73_p0, %s7013_s20, %s75_s23  }
  0x23   : > { %p84_p4 = por %p83_p2, %p82_p1  ;;  %p89_p5 = scmp.eq.s32.totalorder %s7150_s1, 0 }
  0x24   : > { %8527 = sst [smem:[#allocation29_spill]] %s7163_s24  ;;  %p6539_p6 = scmp.lt.s32.totalorder %s7017_s21, 2 }
  0x25   : > { %p7167_p7 = por %p89_p5, %p88_p3  ;;  %s7172_s3 = sand.u32 1, %s7013_s20  }
  0x26   : > { %p7174_p8 = pnand %p6539_p6, %p84_p4  ;;  %s7179_s27 = sand.u32 1, %s7017_s21  }
  0x27   : > { %s8528_s25 = scalar_select %p7167_p7, 1, 0 }
  0x28   : > { %s4687_s28 = sshll.u32 %s7172_s3, 9  ;;  %s6121_s29 = sshll.u32 %s7017_s21, 9 }
  0x29   : > { %8529 = sst [smem:[#allocation30_spill]] %s8528_s25  ;;  %s616_s0 = scalar_lea.vmem [#allocation4], %s4687_s28 }
  0x2a   : > { %s624_s2 = sshll.u32 %s616_s0, 4  ;;  %s8531_s22 = sld [smem:[#allocation34_spill]]  ;;  %s625_s2 = int_to_ptr.vmem [resolvable:$true] %s624_s2 }
  0x2b   : > { %p7189_p10 = pneg %p7174_p8 }
  0x30   : > { %s621_s19 = scalar_lea.hbm %s8531_s22, %s6121_s29  ;;  %s6640_s29 = scalar_lea.hbm %s8531_s22, 1024 }
  0x31   : > { %s622_s20 = sshll.u32 %s621_s19, 4  ;;  %s623_s20 = int_to_ptr.hbm [resolvable:$true] %s622_s20 }
  0x32   : > { %s6633_s10 = sshra.s32 %s623_s20, 4  ;;  %s6634_s10 = int_to_ptr.hbm [resolvable:$true] %s6633_s10 }
  0x33   : > { %s6635_s8 = scalar_lea.hbm %s6634_s10, 512  ;;  %p6641_p13 = scmp.lt.s32.totalorder %s6634_s10, %s8531_s22 }
  0x34   : > { %p6636_p9 = scmp.ne.s32.totalorder %s6634_s10, %s6635_s8  ;;  %p6642_p0 = scmp.lt.s32.totalorder %s6640_s29, %s6635_s8 }
  0x36   : > { %p6638_p11 = pnand %p7189_p10, %p6636_p9  ;;  %p6643_p1 = por %p6642_p0, %p6641_p13 }
  0x38   : > { %p6639_p12 = pneg %p6638_p11 }
  0x3a   : > { %p6644_p2 = pnand %p6643_p1, %p6639_p12 }
  0x3c   : > { %6647 = shalt.err (!%p6644_p2)
}
  0x3d   : > { %s7019_s23 = smov 128   ;;  %s7020_s11 = smov 8  }
  0x3e   : > { %s8533_s28 = scalar_lea.sflag [#allocation5], %s7179_s27  ;;  %p4701_p3 = scmp.ge.s32.totalorder %s7017_s21, 1 }
  0x3f   : > { %6511 = dma.hbm_to_vmem [thread:$0]  (!%p7174_p8), %s623_s20, 8192, %s625_s2, %s8533_s28, %s7019_s23, %s7019_s23, %s7020_s11  }
  0x40   : > { %p853_p4 = scmp.lt.s32.totalorder %s7017_s21, 3  ;;  %s6477_s10 = smul.u32 192, %s7172_s3 }
  0x41   : > { %s6478_s24 = smul.u32 192, %s7017_s21  ;;  %s8535_s9 = sld [smem:[#allocation39_spill]] }
  0x42   : > { %p7208_p5 = pnand %p4701_p3, %p853_p4  ;;  %s688_s22 = scalar_lea.vmem [#allocation7], %s6477_s10 }
  0x43   : > { %s696_s5 = sshll.u32 %s688_s22, 4  ;;  %s8504_s1 = scalar_lea.sflag [#allocation8], %s7179_s27  ;;  %s697_s5 = int_to_ptr.vmem [resolvable:$true] %s696_s5 }
  0x47   : > { %s693_s0 = scalar_lea.hbm %s8535_s9, %s6478_s24  ;;  %s6670_s28 = scalar_lea.hbm %s8535_s9, 384 }
  0x48   : > { %s694_s6 = sshll.u32 %s693_s0, 4  ;;  %s695_s6 = int_to_ptr.hbm [resolvable:$true] %s694_s6 }
  0x49   : > { %s6663_s11 = sshra.s32 %s695_s6, 4  ;;  %s6664_s11 = int_to_ptr.hbm [resolvable:$true] %s6663_s11 }
  0x4a   : > { %s6665_s20 = scalar_lea.hbm %s6664_s11, 192  ;;  %p6671_p12 = scmp.lt.s32.totalorder %s6664_s11, %s8535_s9 }
  0x4b   : > { %p6666_p6 = scmp.ne.s32.totalorder %s6664_s11, %s6665_s20  ;;  %p6672_p13 = scmp.lt.s32.totalorder %s6670_s28, %s6665_s20 }
  0x4d   : > { %p6668_p9 = pnand %p6666_p6, %p7189_p10  ;;  %p6673_p0 = por %p6672_p13, %p6671_p12 }
  0x4f   : > { %p6669_p11 = pneg %p6668_p9 }
  0x51   : > { %p6674_p1 = pnand %p6673_p0, %p6669_p11 }
  0x53   : > { %6677 = shalt.err (!%p6674_p1)
}
  0x54   : > { %s7021_s22 = smov 192   ;;  %s7022_s10 = smov 12  }
  0x55   : > { %6517 = dma.hbm_to_vmem [thread:$0]  (!%p7174_p8), %s695_s6, 3072, %s697_s5, %s8504_s1, %s7021_s22, %s7021_s22, %s7022_s10  }
  0x56   : > { %s7230_s24 = sshll.u32 %s7172_s3, 5  ;;  %s7233_s25 = sshll.u32 %s7017_s21, 5 }
  0x57   : > { %s8536_s13 = sld [smem:[#allocation42_spill]]  ;;  %s742_s20 = scalar_lea.vmem [#allocation10], %s7230_s24 }
  0x58   : > { %s750_s2 = sshll.u32 %s742_s20, 4  ;;  %s8506_s28 = scalar_lea.sflag [#allocation11], %s7179_s27  ;;  %s751_s2 = int_to_ptr.vmem [resolvable:$true] %s750_s2 }
  0x5d   : > { %s747_s11 = scalar_lea.hbm %s8536_s13, %s7233_s25  ;;  %s6700_s22 = scalar_lea.hbm %s8536_s13, 64 }
  0x5e   : > { %s748_s23 = sshll.u32 %s747_s11, 4  ;;  %s749_s23 = int_to_ptr.hbm [resolvable:$true] %s748_s23 }
  0x5f   : > { %s6693_s29 = sshra.s32 %s749_s23, 4  ;;  %s6694_s29 = int_to_ptr.hbm [resolvable:$true] %s6693_s29 }
  0x60   : > { %s6695_s9 = scalar_lea.hbm %s6694_s29, 32  ;;  %p6701_p6 = scmp.lt.s32.totalorder %s6694_s29, %s8536_s13 }
  0x61   : > { %p6696_p2 = scmp.ne.s32.totalorder %s6694_s29, %s6695_s9  ;;  %p6702_p9 = scmp.lt.s32.totalorder %s6700_s22, %s6695_s9 }
  0x63   : > { %p6698_p3 = pnand %p6696_p2, %p7189_p10  ;;  %p6703_p11 = por %p6702_p9, %p6701_p6 }
  0x65   : > { %p6699_p4 = pneg %p6698_p3 }
  0x67   : > { %p6704_p12 = pnand %p6703_p11, %p6699_p4 }
  0x69   : > { %6707 = shalt.err (!%p6704_p12)
}
  0x6a   : > { %s7023_s0 = smov 64   ;;  %s7024_s11 = smov 4  }
  0x6b   : > { %6523 = dma.hbm_to_vmem [thread:$0]  (!%p7174_p8), %s749_s23, 512, %s751_s2, %s8506_s28, %s7023_s0, %s7023_s0, %s7024_s11  }
  0x6c   : > { %s8537_s15 = sld [smem:[#allocation43_spill]]  ;;  %s781_s6 = scalar_lea.vmem [#allocation13], %s7230_s24 }
  0x6d   : > { %s789_s22 = sshll.u32 %s781_s6, 4  ;;  %s8508_s10 = scalar_lea.sflag [#allocation14], %s7179_s27  ;;  %s790_s22 = int_to_ptr.vmem [resolvable:$true] %s789_s22 }
  0x72   : > { %s786_s9 = scalar_lea.hbm %s8537_s15, %s7233_s25  ;;  %s6730_s2 = scalar_lea.hbm %s8537_s15, 64 }
  0x73   : > { %s787_s5 = sshll.u32 %s786_s9, 4  ;;  %s788_s5 = int_to_ptr.hbm [resolvable:$true] %s787_s5 }
  0x74   : > { %s6723_s19 = sshra.s32 %s788_s5, 4  ;;  %s6724_s19 = int_to_ptr.hbm [resolvable:$true] %s6723_s19 }
  0x75   : > { %s6725_s1 = scalar_lea.hbm %s6724_s19, 32  ;;  %p6731_p2 = scmp.lt.s32.totalorder %s6724_s19, %s8537_s15 }
  0x76   : > { %p6726_p13 = scmp.ne.s32.totalorder %s6724_s19, %s6725_s1  ;;  %p6732_p3 = scmp.lt.s32.totalorder %s6730_s2, %s6725_s1 }
  0x78   : > { %p6728_p0 = pnand %p6726_p13, %p7189_p10  ;;  %p6733_p4 = por %p6732_p3, %p6731_p2 }
  0x7a   : > { %p6729_p1 = pneg %p6728_p0 }
  0x7c   : > { %p6734_p6 = pnand %p6733_p4, %p6729_p1 }
  0x7e   : > { %6737 = shalt.err (!%p6734_p6)
}
  0x7f   : > { %6529 = dma.hbm_to_vmem [thread:$0]  (!%p7174_p8), %s788_s5, 512, %s790_s22, %s8508_s10, %s7023_s0, %s7023_s0, %s7024_s11  }
  0x80   : > { %s825_s29 = scalar_lea.hbm %s8490_s17, %s7233_s25  ;;  %s820_s1 = scalar_lea.vmem [#allocation16], %s7230_s24 }
  0x81   : > { %s828_s9 = sshll.u32 %s820_s1, 4  ;;  %s826_s6 = sshll.u32 %s825_s29, 4  ;;  %s829_s9 = int_to_ptr.vmem [resolvable:$true] %s828_s9  ;;  %s827_s6 = int_to_ptr.hbm [resolvable:$true] %s826_s6 }
  0x82   : > { %s8507_s19 = scalar_lea.sflag [#allocation17], %s7179_s27  ;;  %s6753_s2 = sshra.s32 %s827_s6, 4  ;;  %s6754_s2 = int_to_ptr.hbm [resolvable:$true] %s6753_s2 }
  0x83   : > { %s6755_s23 = scalar_lea.hbm %s6754_s2, 32  ;;  %s6760_s5 = scalar_lea.hbm %s8490_s17, 64 }
  0x84   : > { %p6756_p9 = scmp.ne.s32.totalorder %s6754_s2, %s6755_s23  ;;  %p6761_p13 = scmp.lt.s32.totalorder %s6754_s2, %s8490_s17 }
  0x85   : > { %p6762_p0 = scmp.lt.s32.totalorder %s6760_s5, %s6755_s23 }
  0x86   : > { %p6758_p11 = pnand %p6756_p9, %p7189_p10 }
  0x87   : > { %p6763_p1 = por %p6762_p0, %p6761_p13 }
  0x88   : > { %p6759_p12 = pneg %p6758_p11 }
  0x8a   : > { %p6764_p2 = pnand %p6763_p1, %p6759_p12 }
  0x8c   : > { %6767 = shalt.err (!%p6764_p2)
}
  0x8d   : > { %6535 = dma.hbm_to_vmem [thread:$0]  (!%p7174_p8), %s827_s6, 512, %s829_s9, %s8507_s19, %s7023_s0, %s7023_s0, %s7024_s11  }
  0x8e   : > { %s4684_s24 = sshll.u32 %s7172_s3, 10  ;;  %s6120_s25 = sshll.u32 %s7017_s21, 10 }
  0x8f   : > { %s8538_s29 = sld [smem:[#allocation32_spill]]  ;;  %s587_s23 = scalar_lea.vmem [#allocation2], %s4684_s24 }
  0x90   : > { %s595_s20 = sshll.u32 %s587_s23, 4  ;;  %s584_s5 = scalar_lea.sflag [#allocation3], %s7172_s3  ;;  %s596_s20 = int_to_ptr.vmem [resolvable:$true] %s595_s20 }
  0x95   : > { %s592_s1 = scalar_lea.hbm %s8538_s29, %s6120_s25  ;;  %s6790_s9 = scalar_lea.hbm %s8538_s29, 2048 }
  0x96   : > { %s593_s2 = sshll.u32 %s592_s1, 4  ;;  %s594_s2 = int_to_ptr.hbm [resolvable:$true] %s593_s2 }
  0x97   : > { %s6783_s22 = sshra.s32 %s594_s2, 4  ;;  %s6784_s22 = int_to_ptr.hbm [resolvable:$true] %s6783_s22 }
  0x98   : > { %s6785_s13 = scalar_lea.hbm %s6784_s22, 1024  ;;  %p6791_p9 = scmp.lt.s32.totalorder %s6784_s22, %s8538_s29 }
  0x99   : > { %p6786_p3 = scmp.ne.s32.totalorder %s6784_s22, %s6785_s13  ;;  %p6792_p11 = scmp.lt.s32.totalorder %s6790_s9, %s6785_s13 }
  0x9b   : > { %p6788_p4 = pnand %p6786_p3, %p7189_p10  ;;  %p6793_p12 = por %p6792_p11, %p6791_p9 }
  0x9d   : > { %p6789_p6 = pneg %p6788_p4 }
  0x9f   : > { %p6794_p13 = pnand %p6793_p12, %p6789_p6 }
  0xa1   : > { %6797 = shalt.err (!%p6794_p13)
}
  0xa2   : > { %s7025_s24 = smov 256   ;;  %s7026_s25 = smov 16  }
  0xa3   : > { %6508 = dma.hbm_to_vmem [thread:$0]  (!%p7174_p8), %s594_s2, 16384, %s596_s20, %s584_s5, %s7025_s24, %s7025_s24, %s7026_s25  }
  0xa4   : > { %s6475_s30 = smul.u32 768, %s7172_s3  ;;  %s727_s19 = scalar_lea.hbm %s8485_s12, %s7017_s21 }
  0xa5   : > { %s6476_s1 = smul.u32 768, %s7017_s21  ;;  %s6820_s5 = scalar_lea.hbm %s8480_s7, 1536 }
  0xa6   : > { %s659_s22 = scalar_lea.vmem [#allocation6], %s6475_s30 }
  0xa7   : > { %s664_s11 = scalar_lea.hbm %s8480_s7, %s6476_s1  ;;  %s667_s13 = sshll.u32 %s659_s22, 4  ;;  %s668_s13 = int_to_ptr.vmem [resolvable:$true] %s667_s13 }
  0xa8   : > { %s665_s9 = sshll.u32 %s664_s11, 4  ;;  %s666_s9 = int_to_ptr.hbm [resolvable:$true] %s665_s9 }
  0xa9   : > { %s6813_s10 = sshra.s32 %s666_s9, 4  ;;  %s6814_s10 = int_to_ptr.hbm [resolvable:$true] %s6813_s10 }
  0xaa   : > { %s6815_s15 = scalar_lea.hbm %s6814_s10, 768  ;;  %p6821_p3 = scmp.lt.s32.totalorder %s6814_s10, %s8480_s7 }
  0xab   : > { %p6816_p0 = scmp.ne.s32.totalorder %s6814_s10, %s6815_s15  ;;  %p6822_p4 = scmp.lt.s32.totalorder %s6820_s5, %s6815_s15 }
  0xad   : > { %p6818_p1 = pnand %p6816_p0, %p7189_p10  ;;  %p6823_p6 = por %p6822_p4, %p6821_p3 }
  0xaf   : > { %p6819_p2 = pneg %p6818_p1 }
  0xb1   : > { %p6824_p9 = pnand %p6823_p6, %p6819_p2 }
  0xb3   : > { %6827 = shalt.err (!%p6824_p9)
}
  0xb4   : > { %s7027_s30 = smov 768   ;;  %s7028_s1 = smov 48  }
  0xb5   : > { %s8539_s23 = scalar_lea.sflag [#allocation5], %s7179_s27  ;;  %s729_s0 = sshll.u32 %s727_s19, 4  ;;  %s730_s0 = int_to_ptr.hbm [resolvable:$true] %s729_s0 }
  0xb6   : > { %6514 = dma.hbm_to_vmem [thread:$0]  (!%p7174_p8), %s666_s9, 12288, %s668_s13, %s8539_s23, %s7027_s30, %s7027_s30, %s7028_s1  }
  0xb7   : > { %s724_s11 = scalar_lea.vmem [#allocation9], %s7172_s3  ;;  %s6843_s6 = sshra.s32 %s730_s0, 4  ;;  %s6844_s6 = int_to_ptr.hbm [resolvable:$true] %s6843_s6 }
  0xb8   : > { %s731_s22 = sshll.u32 %s724_s11, 4  ;;  %s6845_s15 = scalar_lea.hbm %s6844_s6, 1  ;;  %s732_s22 = int_to_ptr.vmem [resolvable:$true] %s731_s22 }
  0xb9   : > { %p6846_p11 = scmp.ne.s32.totalorder %s6844_s6, %s6845_s15  ;;  %s6850_s2 = scalar_lea.hbm %s8485_s12, 2 }
  0xba   : > { %p6851_p0 = scmp.lt.s32.totalorder %s6844_s6, %s8485_s12  ;;  %p6852_p1 = scmp.lt.s32.totalorder %s6850_s2, %s6845_s15 }
  0xbb   : > { %p6848_p12 = pnand %p6846_p11, %p7189_p10 }
  0xbc   : > { %p6853_p2 = por %p6852_p1, %p6851_p0 }
  0xbd   : > { %p6849_p13 = pneg %p6848_p12 }
  0xbf   : > { %p6854_p3 = pnand %p6853_p2, %p6849_p13 }
  0xc1   : > { %6857 = shalt.err (!%p6854_p3)
}
  0xc2   : > { %s8540_s19 = scalar_lea.sflag [#allocation8], %s7179_s27  ;;  %s766_s24 = scalar_lea.hbm %s8487_s14, %s7017_s21 }
  0xc3   : > { %6520 = dma.hbm_to_vmem [thread:$0]  (!%p7174_p8), %s730_s0, 16, %s732_s22, %s8540_s19  }
  0xc4   : > { %s768_s25 = sshll.u32 %s766_s24, 4  ;;  %s763_s30 = scalar_lea.vmem [#allocation12], %s7172_s3  ;;  %s769_s25 = int_to_ptr.hbm [resolvable:$true] %s768_s25 }
  0xc5   : > { %s770_s1 = sshll.u32 %s763_s30, 4  ;;  %s6873_s23 = sshra.s32 %s769_s25, 4  ;;  %s771_s1 = int_to_ptr.vmem [resolvable:$true] %s770_s1  ;;  %s6874_s23 = int_to_ptr.hbm [resolvable:$true] %s6873_s23 }
  0xc6   : > { %s6875_s11 = scalar_lea.hbm %s6874_s23, 1  ;;  %s6880_s0 = scalar_lea.hbm %s8487_s14, 2 }
  0xc7   : > { %p6876_p4 = scmp.ne.s32.totalorder %s6874_s23, %s6875_s11  ;;  %p6881_p11 = scmp.lt.s32.totalorder %s6874_s23, %s8487_s14 }
  0xc8   : > { %p6882_p12 = scmp.lt.s32.totalorder %s6880_s0, %s6875_s11 }
  0xc9   : > { %p6878_p6 = pnand %p6876_p4, %p7189_p10 }
  0xca   : > { %p6883_p13 = por %p6882_p12, %p6881_p11 }
  0xcb   : > { %p6879_p9 = pneg %p6878_p6 }
  0xcd   : > { %p6884_p0 = pnand %p6883_p13, %p6879_p9 }
  0xcf   : > { %6887 = shalt.err (!%p6884_p0)
}
  0xd0   : > { %s8541_s28 = scalar_lea.sflag [#allocation11], %s7179_s27  ;;  %s805_s5 = scalar_lea.hbm %s8489_s16, %s7017_s21 }
  0xd1   : > { %6526 = dma.hbm_to_vmem [thread:$0]  (!%p7174_p8), %s769_s25, 16, %s771_s1, %s8541_s28  }
  0xd2   : > { %s807_s19 = sshll.u32 %s805_s5, 4  ;;  %s802_s13 = scalar_lea.vmem [#allocation15], %s7172_s3  ;;  %s808_s19 = int_to_ptr.hbm [resolvable:$true] %s807_s19 }
  0xd3   : > { %s809_s9 = sshll.u32 %s802_s13, 4  ;;  %s6903_s24 = sshra.s32 %s808_s19, 4  ;;  %s810_s9 = int_to_ptr.vmem [resolvable:$true] %s809_s9  ;;  %s6904_s24 = int_to_ptr.hbm [resolvable:$true] %s6903_s24 }
  0xd4   : > { %s6905_s30 = scalar_lea.hbm %s6904_s24, 1  ;;  %s6910_s25 = scalar_lea.hbm %s8489_s16, 2 }
  0xd5   : > { %p6906_p1 = scmp.ne.s32.totalorder %s6904_s24, %s6905_s30  ;;  %p6911_p4 = scmp.lt.s32.totalorder %s6904_s24, %s8489_s16 }
  0xd6   : > { %p6912_p6 = scmp.lt.s32.totalorder %s6910_s25, %s6905_s30 }
  0xd7   : > { %p6908_p2 = pnand %p6906_p1, %p7189_p10 }
  0xd8   : > { %p6913_p9 = por %p6912_p6, %p6911_p4 }
  0xd9   : > { %p6909_p3 = pneg %p6908_p2 }
  0xdb   : > { %p6914_p11 = pnand %p6913_p9, %p6909_p3 }
  0xdd   : > { %6917 = shalt.err (!%p6914_p11)
}
  0xde   : > { %s8542_s15 = scalar_lea.sflag [#allocation14], %s7179_s27  ;;  %s844_s10 = scalar_lea.hbm %s8491_s18, %s7017_s21 }
  0xdf   : > { %6532 = dma.hbm_to_vmem [thread:$0]  (!%p7174_p8), %s808_s19, 16, %s810_s9, %s8542_s15  }
  0xe0   : > { %s846_s28 = sshll.u32 %s844_s10, 4  ;;  %s841_s2 = scalar_lea.vmem [#allocation18], %s7172_s3  ;;  %s847_s28 = int_to_ptr.hbm [resolvable:$true] %s846_s28 }
  0xe1   : > { %s848_s20 = sshll.u32 %s841_s2, 4  ;;  %s6933_s5 = sshra.s32 %s847_s28, 4  ;;  %s849_s20 = int_to_ptr.vmem [resolvable:$true] %s848_s20  ;;  %s6934_s5 = int_to_ptr.hbm [resolvable:$true] %s6933_s5 }
  0xe2   : > { %s6935_s13 = scalar_lea.hbm %s6934_s5, 1  ;;  %s6940_s19 = scalar_lea.hbm %s8491_s18, 2 }
  0xe3   : > { %p6936_p12 = scmp.ne.s32.totalorder %s6934_s5, %s6935_s13  ;;  %p6941_p1 = scmp.lt.s32.totalorder %s6934_s5, %s8491_s18 }
  0xe4   : > { %p6942_p2 = scmp.lt.s32.totalorder %s6940_s19, %s6935_s13 }
  0xe5   : > { %p6938_p13 = pnand %p6936_p12, %p7189_p10 }
  0xe6   : > { %p6943_p3 = por %p6942_p2, %p6941_p1 }
  0xe7   : > { %p6939_p0 = pneg %p6938_p13 }
  0xe9   : > { %p6944_p4 = pnand %p6943_p3, %p6939_p0 }
  0xeb   : > { %6947 = shalt.err (!%p6944_p4)
}
  0xec   : > { %s8543_s21 = scalar_lea.sflag [#allocation17], %s7179_s27  ;;  %857 = sbr.rel (%p7208_p5) target bundleno = 2290 (0x8f2), region = 96 }
  0xed   : > { %6538 = dma.hbm_to_vmem [thread:$0]  (!%p7174_p8), %s847_s28, 16, %s849_s20, %s8543_s21  }
  0xee   : > { %s8544_s4 = sld [smem:[#allocation25_spill]] (!%p7208_p5) }
  0xf4   : > { %s7402_s11 = sand.u32 1, %s8544_s4  }
  0xf5   : > { %s4702_s25 = sshll.u32 %s7402_s11, 10  ;;  %s860_s1 = scalar_lea.sflag [#allocation3], %s7402_s11 }
  0xf6   : > { %s7406_s6 = scalar_lea.vmem [#allocation2], %s4702_s25 }
  0xf7   : > { %6980 = dma.done.wait (%p7167_p7), %s860_s1, 16384  }
  0xf8   : > { %6982 = vsyncadd (%p7167_p7), %s860_s1, 4294950912  ;;  %s8546_s26 = sld [smem:[#allocation27_spill]]  ;;  %s4703_s8 = sshll.u32 %s7402_s11, 9 }
  0xf9   : > { %s7414_s0 = scalar_lea.vmem [#allocation4], %s4703_s8 }
  0xfe   : > { %s869_s27 = sand.u32 1, %s8546_s26  }
  0xff   : > { %s870_s15 = scalar_lea.sflag [#allocation5], %s869_s27 }
 0x100   : > { %6984 = dma.done.wait (%p7167_p7), %s870_s15, 20480  }
 0x101   : > { %6986 = vsyncadd (%p7167_p7), %s870_s15, 4294946816  ;;  %s6479_s22 = smul.u32 768, %s7402_s11  ;;  %s890_s2 = scalar_lea.sflag [#allocation8], %s869_s27 }
 0x102   : > { %s6480_s10 = smul.u32 192, %s7402_s11 }
 0x103   : > { %s7422_s28 = scalar_lea.vmem [#allocation6], %s6479_s22 }
 0x104   : > { %s7424_s20 = scalar_lea.vmem [#allocation7], %s6480_s10 }
 0x105   : > { %6988 = dma.done.wait (%p7167_p7), %s890_s2, 3088  }
 0x106   : > { %6990 = vsyncadd (%p7167_p7), %s890_s2, 4294964208  ;;  %s4704_s5 = sshll.u32 %s7402_s11, 5  ;;  %s902_s13 = scalar_lea.vmem [#allocation9], %s7402_s11 }
 0x107   : > { %s909_s24 = scalar_lea.sflag [#allocation11], %s869_s27  ;;  %s7432_s30 = scalar_lea.vmem [#allocation10], %s4704_s5 }
 0x108   : > { %6992 = dma.done.wait (%p7167_p7), %s909_s24, 528  }
 0x109   : > { %6994 = vsyncadd (%p7167_p7), %s909_s24, 4294966768  ;;  %s921_s19 = scalar_lea.vmem [#allocation12], %s7402_s11  ;;  %s928_s9 = scalar_lea.sflag [#allocation14], %s869_s27 }
 0x10a   : > { %s7439_s23 = scalar_lea.vmem [#allocation13], %s4704_s5 }
 0x10b   : > { %6996 = dma.done.wait (%p7167_p7), %s928_s9, 528  }
 0x10c   : > { %6998 = vsyncadd (%p7167_p7), %s928_s9, 4294966768  ;;  %s940_s21 = scalar_lea.vmem [#allocation15], %s7402_s11  ;;  %s947_s4 = scalar_lea.sflag [#allocation17], %s869_s27 }
 0x10d   : > { %s7446_s25 = scalar_lea.vmem [#allocation16], %s4704_s5 }
 0x10e   : > { %7000 = dma.done.wait (%p7167_p7), %s947_s4, 528  }
 0x10f   : > { %7002 = vsyncadd (%p7167_p7), %s947_s4, 4294966768  ;;  %v4828_v0 = vld [vmem:[%s7406_s6 + $0xe0] sm:$0xf]  ;;  %v6157_v1 = vld [vmem:[%s7406_s6 + $0xec] sm:$0xf0]  ;;  %s8547_s27 = sld [smem:[#allocation31_spill]] }
 0x110   : > { %v4956_v2 = vld [vmem:[%s7406_s6 + $0x1e0] sm:$0xf]  ;;  %v4829_v3 = vor.u32 %v6157_v1, %v4828_v0  ;;  %v6189_v4 = vld [vmem:[%s7406_s6 + $0x1ec] sm:$0xf0]  ;;  %p1089_p7 = scmp.lt.s32.totalorder %s8546_s26, 1  ;;  %s8548_s22 = sld [smem:[#allocation33_spill]] }
 0x111   : > { %v5084_v5 = vld [vmem:[%s7406_s6 + $0x2e0] sm:$0xf]  ;;  %v6221_v6 = vld [vmem:[%s7406_s6 + $0x2ec] sm:$0xf0]  ;;  %v4957_v7 = vor.u32 %v6189_v4, %v4956_v2  ;;  %s8549_s5 = sld [smem:[#allocation37_spill]] }
 0x112   : > { %v5085_v8 = vor.u32 %v6221_v6, %v5084_v5  ;;  %v5212_v9 = vld [vmem:[%s7406_s6 + $0x3e0] sm:$0xf]  ;;  %v6253_v10 = vld [vmem:[%s7406_s6 + $0x3ec] sm:$0xf0]  ;;  %1916 = vmatpush.bf16.msra.mxu0 %v4829_v3  ;;  %s8561_s26 = smov (!%p1089_p7, %s8546_s26), 1  ;;  %s8550_s1 = sld [smem:[#allocation36_spill]] }
 0x113   : > { %v4812_v11 = vld [vmem:[%s7406_s6 + $0xc0] sm:$0xf]  ;;  %v5213_v12 = vor.u32 %v6253_v10, %v5212_v9  ;;  %v6153_v13 = vld [vmem:[%s7406_s6 + $0xcc] sm:$0xf0]  ;;  %1929 = vmatpush.bf16.msra.mxu1 %v4957_v7  ;;  %s6125_s9 = sshll.u32 %s8561_s26, 7  ;;  %s6482_s3 = smul.u32 3, %s8561_s26 }
 0x114   : > { %v4940_v14 = vld [vmem:[%s7406_s6 + $0x1c0] sm:$0xf]  ;;  %v6185_v15 = vld [vmem:[%s7406_s6 + $0x1cc] sm:$0xf0]  ;;  %1942 = vmatpush.bf16.msra.mxu2 %v5085_v8  ;;  %v4813_v16 = vor.u32 %v6153_v13, %v4812_v11  ;;  %s8553_s8 = sld [smem:[#allocation40_spill]] }
 0x115   : > { %v4941_v17 = vor.u32 %v6185_v15, %v4940_v14  ;;  %v5068_v18 = vld [vmem:[%s7406_s6 + $0x2c0] sm:$0xf]  ;;  %v6217_v19 = vld [vmem:[%s7406_s6 + $0x2cc] sm:$0xf0]  ;;  %1955 = vmatpush.bf16.msra.mxu3 %v5213_v12  ;;  %s8554_s2 = sld [smem:[#allocation41_spill]] }
 0x116   : > { %v5196_v20 = vld [vmem:[%s7406_s6 + $0x3c0] sm:$0xf]  ;;  %v5069_v21 = vor.u32 %v6217_v19, %v5068_v18  ;;  %v6249_v22 = vld [vmem:[%s7406_s6 + $0x3cc] sm:$0xf0]  ;;  %1917 = vmatpush.bf16.msra.mxu0 %v4813_v16 }
 0x117   : > { %v4796_v23 = vld [vmem:[%s7406_s6 + $0xa0] sm:$0xf]  ;;  %v6149_v24 = vld [vmem:[%s7406_s6 + $0xac] sm:$0xf0]  ;;  %v5197_v25 = vor.u32 %v6249_v22, %v5196_v20  ;;  %1930 = vmatpush.bf16.msra.mxu1 %v4941_v17  ;;  %s1104_s24 = scalar_lea.vmem %s8549_s5, %s8561_s26 }
 0x118   : > { %v4924_v26 = vld [vmem:[%s7406_s6 + $0x1a0] sm:$0xf]  ;;  %v6181_v27 = vld [vmem:[%s7406_s6 + $0x1ac] sm:$0xf0]  ;;  %v4797_v29 = vor.u32 %v6149_v24, %v4796_v23  ;;  %1943 = vmatpush.bf16.msra.mxu2 %v5069_v21 }
 0x119   : > { %v5052_v28 = vld [vmem:[%s7406_s6 + $0x2a0] sm:$0xf]  ;;  %v6213_v30 = vld [vmem:[%s7406_s6 + $0x2ac] sm:$0xf0]  ;;  %v4925_v33 = vor.u32 %v6181_v27, %v4924_v26  ;;  %1956 = vmatpush.bf16.msra.mxu3 %v5197_v25 }
 0x11a   : > { %v5180_v31 = vld [vmem:[%s7406_s6 + $0x3a0] sm:$0xf]  ;;  %v6245_v32 = vld [vmem:[%s7406_s6 + $0x3ac] sm:$0xf0]  ;;  %v5053_v34 = vor.u32 %v6213_v30, %v5052_v28  ;;  %1918 = vmatpush.bf16.msra.mxu0 %v4797_v29  ;;  %v6155_v28 = vld [vmem:[%s7406_s6 + $0xe4] sm:$0xf]  ;;  %s1112_s15 = scalar_lea.vmem %s8553_s8, %s6482_s3 }
 0x11b   : > { %v4780_v35 = vld [vmem:[%s7406_s6 + $0x80] sm:$0xf]  ;;  %v6145_v36 = vld [vmem:[%s7406_s6 + $0x8c] sm:$0xf0]  ;;  %v5181_v38 = vor.u32 %v6245_v32, %v5180_v31  ;;  %1931 = vmatpush.bf16.msra.mxu1 %v4925_v33  ;;  %v4830_v29 = vld [vmem:[%s7406_s6 + $0xf0] sm:$0xf0] }
 0x11c   : > { %v4908_v37 = vld [vmem:[%s7406_s6 + $0x180] sm:$0xf]  ;;  %v6177_v39 = vld [vmem:[%s7406_s6 + $0x18c] sm:$0xf0]  ;;  %v4781_v44 = vor.u32 %v6145_v36, %v4780_v35  ;;  %1944 = vmatpush.bf16.msra.mxu2 %v5053_v34  ;;  %v6187_v30 = vld [vmem:[%s7406_s6 + $0x1e4] sm:$0xf] }
 0x11d   : > { %v5036_v40 = vld [vmem:[%s7406_s6 + $0x280] sm:$0xf]  ;;  %v6209_v41 = vld [vmem:[%s7406_s6 + $0x28c] sm:$0xf0]  ;;  %v4909_v45 = vor.u32 %v6177_v39, %v4908_v37  ;;  %1957 = vmatpush.bf16.msra.mxu3 %v5181_v38  ;;  %v4958_v31 = vld [vmem:[%s7406_s6 + $0x1f0] sm:$0xf0] }
 0x11e   : > { %v5164_v42 = vld [vmem:[%s7406_s6 + $0x380] sm:$0xf]  ;;  %v6241_v43 = vld [vmem:[%s7406_s6 + $0x38c] sm:$0xf0]  ;;  %v5037_v46 = vor.u32 %v6209_v41, %v5036_v40  ;;  %1919 = vmatpush.bf16.msra.mxu0 %v4781_v44  ;;  %v1123_v32 = vld [vmem:[%s8547_s27] sm:$0xff]  ;;  %v4833_v41 = vor.u32 %v6155_v28, %v4830_v29  ;;  %s7891_s27 = scalar_lea.vmem %s8550_s1, %s6125_s9  ;;  %s8552_s9 = sld [smem:[#allocation38_spill]] }
 0x11f   : > { %v4764_v47 = vld [vmem:[%s7406_s6 + $0x60] sm:$0xf]  ;;  %v6141_v48 = vld [vmem:[%s7406_s6 + $0x6c] sm:$0xf0]  ;;  %v5165_v50 = vor.u32 %v6241_v43, %v5164_v42  ;;  %1932 = vmatpush.bf16.msra.mxu1 %v4909_v45  ;;  %v6219_v34 = vld [vmem:[%s7406_s6 + $0x2e4] sm:$0xf]  ;;  %v4961_v43 = vor.u32 %v6187_v30, %v4958_v31 }
 0x120   : > { %v4892_v49 = vld [vmem:[%s7406_s6 + $0x160] sm:$0xf]  ;;  %v6173_v51 = vld [vmem:[%s7406_s6 + $0x16c] sm:$0xf0]  ;;  %v4765_v56 = vor.u32 %v6141_v48, %v4764_v47  ;;  %1945 = vmatpush.bf16.msra.mxu2 %v5037_v46  ;;  %v5086_v35 = vld [vmem:[%s7406_s6 + $0x2f0] sm:$0xf0] }
 0x121   : > { %v5020_v52 = vld [vmem:[%s7406_s6 + $0x260] sm:$0xf]  ;;  %v6205_v53 = vld [vmem:[%s7406_s6 + $0x26c] sm:$0xf0]  ;;  %v4893_v57 = vor.u32 %v6173_v51, %v4892_v49  ;;  %1958 = vmatpush.bf16.msra.mxu3 %v5165_v50  ;;  %1125 = vst [vmem:[#allocation1] ss:$4 sm:$0xff] %v1123_v32  ;;  %v5089_v44 = vor.u32 %v6219_v34, %v5086_v35 }
 0x122   : > { %v5148_v54 = vld [vmem:[%s7406_s6 + $0x360] sm:$0xf]  ;;  %v6237_v55 = vld [vmem:[%s7406_s6 + $0x36c] sm:$0xf0]  ;;  %v5021_v58 = vor.u32 %v6205_v53, %v5020_v52  ;;  %1920 = vmatpush.bf16.msra.mxu0 %v4765_v56  ;;  %v6251_v38 = vld [vmem:[%s7406_s6 + $0x3e4] sm:$0xf] }
 0x123   : > { %v4748_v59 = vld [vmem:[%s7406_s6 + $0x40] sm:$0xf]  ;;  %v6137_v60 = vld [vmem:[%s7406_s6 + $0x4c] sm:$0xf0]  ;;  %v5149_v62 = vor.u32 %v6237_v55, %v5148_v54  ;;  %1933 = vmatpush.bf16.msra.mxu1 %v4893_v57  ;;  %v5214_v39 = vld [vmem:[%s7406_s6 + $0x3f0] sm:$0xf0] }
 0x124   : > { %v4876_v61 = vld [vmem:[%s7406_s6 + $0x140] sm:$0xf]  ;;  %v6169_v63 = vld [vmem:[%s7406_s6 + $0x14c] sm:$0xf0]  ;;  %v4749_v4 = vor.u32 %v6137_v60, %v4748_v59  ;;  %1946 = vmatpush.bf16.msra.mxu2 %v5021_v58  ;;  %v6151_v42 = vld [vmem:[%s7406_s6 + $0xc4] sm:$0xf]  ;;  %v5217_v48 = vor.u32 %v6251_v38, %v5214_v39 }
 0x125   : > { %v5004_v0 = vld [vmem:[%s7406_s6 + $0x240] sm:$0xf]  ;;  %v6201_v1 = vld [vmem:[%s7406_s6 + $0x24c] sm:$0xf0]  ;;  %v4877_v5 = vor.u32 %v6169_v63, %v4876_v61  ;;  %1959 = vmatpush.bf16.msra.mxu3 %v5149_v62  ;;  %v4814_v45 = vld [vmem:[%s7406_s6 + $0xd0] sm:$0xf0] }
 0x126   : > { %v5132_v2 = vld [vmem:[%s7406_s6 + $0x340] sm:$0xf]  ;;  %v6233_v3 = vld [vmem:[%s7406_s6 + $0x34c] sm:$0xf0]  ;;  %v5005_v6 = vor.u32 %v6201_v1, %v5004_v0  ;;  %1921 = vmatpush.bf16.msra.mxu0 %v4749_v4  ;;  %v6183_v46 = vld [vmem:[%s7406_s6 + $0x1c4] sm:$0xf]  ;;  %v4817_v55 = vor.u32 %v6151_v42, %v4814_v45 }
 0x127   : > { %v4732_v7 = vld [vmem:[%s7406_s6 + $0x20] sm:$0xf]  ;;  %v6133_v8 = vld [vmem:[%s7406_s6 + $0x2c] sm:$0xf0]  ;;  %v5133_v10 = vor.u32 %v6233_v3, %v5132_v2  ;;  %1934 = vmatpush.bf16.msra.mxu1 %v4877_v5  ;;  %v4942_v47 = vld [vmem:[%s7406_s6 + $0x1d0] sm:$0xf0] }
 0x128   : > { %v4860_v9 = vld [vmem:[%s7406_s6 + $0x120] sm:$0xf]  ;;  %v6165_v11 = vld [vmem:[%s7406_s6 + $0x12c] sm:$0xf0]  ;;  %v4733_v17 = vor.u32 %v6133_v8, %v4732_v7  ;;  %1947 = vmatpush.bf16.msra.mxu2 %v5005_v6  ;;  %v6215_v49 = vld [vmem:[%s7406_s6 + $0x2c4] sm:$0xf]  ;;  %v4945_v60 = vor.u32 %v6183_v46, %v4942_v47 }
 0x129   : > { %v4988_v12 = vld [vmem:[%s7406_s6 + $0x220] sm:$0xf]  ;;  %v6197_v13 = vld [vmem:[%s7406_s6 + $0x22c] sm:$0xf0]  ;;  %v4861_v21 = vor.u32 %v6165_v11, %v4860_v9  ;;  %1960 = vmatpush.bf16.msra.mxu3 %v5133_v10  ;;  %v5070_v50 = vld [vmem:[%s7406_s6 + $0x2d0] sm:$0xf0] }
 0x12a   : > { %v5116_v14 = vld [vmem:[%s7406_s6 + $0x320] sm:$0xf]  ;;  %v6229_v15 = vld [vmem:[%s7406_s6 + $0x32c] sm:$0xf0]  ;;  %v4989_v22 = vor.u32 %v6197_v13, %v4988_v12  ;;  %1922 = vmatpush.bf16.msra.mxu0 %v4733_v17  ;;  %v6247_v51 = vld [vmem:[%s7406_s6 + $0x3c4] sm:$0xf]  ;;  %v5073_v61 = vor.u32 %v6215_v49, %v5070_v50 }
 0x12b   : > { %v4716_v16 = vld [vmem:[%s7406_s6] sm:$0xf]  ;;  %v6129_v18 = vld [vmem:[%s7406_s6 + $0xc] sm:$0xf0]  ;;  %v5117_v26 = vor.u32 %v6229_v15, %v5116_v14  ;;  %1935 = vmatpush.bf16.msra.mxu1 %v4861_v21  ;;  %v5198_v52 = vld [vmem:[%s7406_s6 + $0x3d0] sm:$0xf0] }
 0x12c   : > { %v4844_v19 = vld [vmem:[%s7406_s6 + $0x100] sm:$0xf]  ;;  %v6161_v20 = vld [vmem:[%s7406_s6 + $0x10c] sm:$0xf0]  ;;  %v4717_v33 = vor.u32 %v6129_v18, %v4716_v16  ;;  %1948 = vmatpush.bf16.msra.mxu2 %v4989_v22  ;;  %v6147_v53 = vld [vmem:[%s7406_s6 + $0xa4] sm:$0xf]  ;;  %v5201_v0 = vor.u32 %v6247_v51, %v5198_v52 }
 0x12d   : > { %v4972_v23 = vld [vmem:[%s7406_s6 + $0x200] sm:$0xf]  ;;  %v6193_v24 = vld [vmem:[%s7406_s6 + $0x20c] sm:$0xf0]  ;;  %v4845_v36 = vor.u32 %v6161_v20, %v4844_v19  ;;  %1961 = vmatpush.bf16.msra.mxu3 %v5117_v26  ;;  %v4798_v54 = vld [vmem:[%s7406_s6 + $0xb0] sm:$0xf0] }
 0x12e   : > { %v5100_v25 = vld [vmem:[%s7406_s6 + $0x300] sm:$0xf]  ;;  %v6225_v27 = vld [vmem:[%s7406_s6 + $0x30c] sm:$0xf0]  ;;  %v4973_v37 = vor.u32 %v6193_v24, %v4972_v23  ;;  %1923 = vmatpush.bf16.msra.mxu0 %v4717_v33  ;;  %v6179_v56 = vld [vmem:[%s7406_s6 + $0x1a4] sm:$0xf]  ;;  %v4801_v9 = vor.u32 %v6147_v53, %v4798_v54 }
 0x12f   : > { %v5101_v40 = vor.u32 %v6225_v27, %v5100_v25  ;;  %1936 = vmatpush.bf16.msra.mxu1 %v4845_v36  ;;  %v4926_v57 = vld [vmem:[%s7406_s6 + $0x1b0] sm:$0xf0]  ;;  %v6211_v58 = vld [vmem:[%s7406_s6 + $0x2a4] sm:$0xf] }
 0x130   : > { %1949 = vmatpush.bf16.msra.mxu2 %v4973_v37  ;;  %v5054_v59 = vld [vmem:[%s7406_s6 + $0x2b0] sm:$0xf0]  ;;  %v1128_v62 = vld.sshfl [vmem:[#allocation1 + $0x10] sm:$0xff pattern:$0x73625140]  ;;  %v4929_v10 = vor.u32 %v6179_v56, %v4926_v57 }
 0x131   : > { %1962 = vmatpush.bf16.msra.mxu3 %v5101_v40  ;;  %v1126_v63 = vld.sshfl [vmem:[#allocation1] sm:$0xff pattern:$0x73625140]  ;;  %v7541_v1 = vpack.c.bf16 %v1128_v62, %v1128_v62  ;;  %v1129_v3 = vld.sshfl [vmem:[#allocation1 + $0x18] sm:$0xff pattern:$0x73625140]  ;;  %v5057_v11 = vor.u32 %v6211_v58, %v5054_v59 }
 0x132   : > { %1968 = vmatpush.bf16.msrb.mxu0 %v4833_v41  ;;  %v7543_v2 = vpack.c.bf16 %v1126_v63, %v1126_v63  ;;  %v1127_v4 = vld.sshfl [vmem:[#allocation1 + $0x8] sm:$0xff pattern:$0x73625140]  ;;  %v7545_v5 = vpack.c.bf16 %v1129_v3, %v1129_v3  ;;  %v5182_v7 = vld [vmem:[%s7406_s6 + $0x3b0] sm:$0xf0] }
 0x133   : > { %1981 = vmatpush.bf16.msrb.mxu1 %v4961_v43  ;;  %v6243_v6 = vld [vmem:[%s7406_s6 + $0x3a4] sm:$0xf]  ;;  %v7549_v8 = vpack.c.bf16 %v1127_v4, %v1127_v4  ;;  %1950 = vmatmul.bf16.vlgmr.msra.gmra.mxu2 %v7541_v1  ;;  %v4782_v13 = vld [vmem:[%s7406_s6 + $0x90] sm:$0xf0] }
 0x134   : > { %1994 = vmatpush.bf16.msrb.mxu2 %v5089_v44  ;;  %v6143_v12 = vld [vmem:[%s7406_s6 + $0x84] sm:$0xf]  ;;  %1924 = vmatmul.bf16.vlgmr.msra.gmra.mxu0 %v7543_v2  ;;  %v5185_v15 = vor.u32 %v6243_v6, %v5182_v7  ;;  %v4910_v16 = vld [vmem:[%s7406_s6 + $0x190] sm:$0xf0] }
 0x135   : > { %2007 = vmatpush.bf16.msrb.mxu3 %v5217_v48  ;;  %v6175_v14 = vld [vmem:[%s7406_s6 + $0x184] sm:$0xf]  ;;  %v5038_v18 = vld [vmem:[%s7406_s6 + $0x290] sm:$0xf0]  ;;  %1937 = vmatmul.bf16.vlgmr.msra.gmra.mxu1 %v7549_v8  ;;  %v4785_v21 = vor.u32 %v6143_v12, %v4782_v13  ;;  %v6190_v13 = vld [vmem:[%s7406_s6 + $0x1f4] sm:$0xf0] }
 0x136   : > { %1969 = vmatpush.bf16.msrb.mxu0 %v4817_v55  ;;  %v6207_v17 = vld [vmem:[%s7406_s6 + $0x284] sm:$0xf]  ;;  %1963 = vmatmul.bf16.vlgmr.msra.gmra.mxu3 %v7545_v5  ;;  %v5166_v20 = vld [vmem:[%s7406_s6 + $0x390] sm:$0xf0]  ;;  %v4913_v22 = vor.u32 %v6175_v14, %v4910_v16  ;;  %v5092_v14 = vld [vmem:[%s7406_s6 + $0x2e8] sm:$0xf] }
 0x137   : > { %1982 = vmatpush.bf16.msrb.mxu1 %v4945_v60  ;;  %v6239_v19 = vld [vmem:[%s7406_s6 + $0x384] sm:$0xf]  ;;  %v5041_v23 = vor.u32 %v6207_v17, %v5038_v18  ;;  %v4766_v25 = vld [vmem:[%s7406_s6 + $0x70] sm:$0xf0]  ;;  %v5220_v18 = vld [vmem:[%s7406_s6 + $0x3e8] sm:$0xf] }
 0x138   : > { %1995 = vmatpush.bf16.msrb.mxu2 %v5073_v61  ;;  %v6139_v24 = vld [vmem:[%s7406_s6 + $0x64] sm:$0xf]  ;;  %v5169_v27 = vor.u32 %v6239_v19, %v5166_v20  ;;  %v4894_v28 = vld [vmem:[%s7406_s6 + $0x170] sm:$0xf0]  ;;  %v6254_v19 = vld [vmem:[%s7406_s6 + $0x3f4] sm:$0xf0] }
 0x139   : > { %2008 = vmatpush.bf16.msrb.mxu3 %v5201_v0  ;;  %v6171_v26 = vld [vmem:[%s7406_s6 + $0x164] sm:$0xf]  ;;  %v5022_v30 = vld [vmem:[%s7406_s6 + $0x270] sm:$0xf0]  ;;  %v4769_v33 = vor.u32 %v6139_v24, %v4766_v25  ;;  %v4820_v24 = vld [vmem:[%s7406_s6 + $0xc8] sm:$0xf] }
 0x13a   : > { %1970 = vmatpush.bf16.msrb.mxu0 %v4801_v9  ;;  %v6203_v29 = vld [vmem:[%s7406_s6 + $0x264] sm:$0xf]  ;;  %v5150_v32 = vld [vmem:[%s7406_s6 + $0x370] sm:$0xf0]  ;;  %v4897_v34 = vor.u32 %v6171_v26, %v4894_v28  ;;  %v4836_v9 = vld [vmem:[%s7406_s6 + $0xe8] sm:$0xf] }
 0x13b   : > { %1983 = vmatpush.bf16.msrb.mxu1 %v4929_v10  ;;  %v6235_v31 = vld [vmem:[%s7406_s6 + $0x364] sm:$0xf]  ;;  %v5025_v35 = vor.u32 %v6203_v29, %v5022_v30  ;;  %v4750_v37 = vld [vmem:[%s7406_s6 + $0x50] sm:$0xf0]  ;;  %v6158_v10 = vld [vmem:[%s7406_s6 + $0xf4] sm:$0xf0] }
 0x13c   : > { %1996 = vmatpush.bf16.msrb.mxu2 %v5057_v11  ;;  %v6135_v36 = vld [vmem:[%s7406_s6 + $0x44] sm:$0xf]  ;;  %v5153_v39 = vor.u32 %v6235_v31, %v5150_v32  ;;  %v4878_v40 = vld [vmem:[%s7406_s6 + $0x150] sm:$0xf0]  ;;  %v4964_v11 = vld [vmem:[%s7406_s6 + $0x1e8] sm:$0xf] }
 0x13d   : > { %2009 = vmatpush.bf16.msrb.mxu3 %v5185_v15  ;;  %v6167_v38 = vld [vmem:[%s7406_s6 + $0x144] sm:$0xf]  ;;  %v5006_v42 = vld [vmem:[%s7406_s6 + $0x250] sm:$0xf0]  ;;  %v4753_v45 = vor.u32 %v6135_v36, %v4750_v37  ;;  %v6222_v15 = vld [vmem:[%s7406_s6 + $0x2f4] sm:$0xf0] }
 0x13e   : > { %1971 = vmatpush.bf16.msrb.mxu0 %v4785_v21  ;;  %v6199_v41 = vld [vmem:[%s7406_s6 + $0x244] sm:$0xf]  ;;  %v5134_v44 = vld [vmem:[%s7406_s6 + $0x350] sm:$0xf0]  ;;  %v4881_v46 = vor.u32 %v6167_v38, %v4878_v40  ;;  %v4837_v21 = vor.u32 %v6158_v10, %v4836_v9  ;;  %v6154_v25 = vld [vmem:[%s7406_s6 + $0xd4] sm:$0xf0] }
 0x13f   : > { %1984 = vmatpush.bf16.msrb.mxu1 %v4913_v22  ;;  %v6231_v43 = vld [vmem:[%s7406_s6 + $0x344] sm:$0xf]  ;;  %v5009_v47 = vor.u32 %v6199_v41, %v5006_v42  ;;  %v4734_v49 = vld [vmem:[%s7406_s6 + $0x30] sm:$0xf0]  ;;  %v4965_v22 = vor.u32 %v6190_v13, %v4964_v11  ;;  %v4948_v26 = vld [vmem:[%s7406_s6 + $0x1c8] sm:$0xf] }
 0x140   : > { %1997 = vmatpush.bf16.msrb.mxu2 %v5041_v23  ;;  %v6131_v48 = vld [vmem:[%s7406_s6 + $0x24] sm:$0xf]  ;;  %v5137_v51 = vor.u32 %v6231_v43, %v5134_v44  ;;  %v4862_v52 = vld [vmem:[%s7406_s6 + $0x130] sm:$0xf0]  ;;  %v5093_v23 = vor.u32 %v6222_v15, %v5092_v14  ;;  %v6186_v28 = vld [vmem:[%s7406_s6 + $0x1d4] sm:$0xf0] }
 0x141   : > { %2010 = vmatpush.bf16.msrb.mxu3 %v5169_v27  ;;  %v6163_v50 = vld [vmem:[%s7406_s6 + $0x124] sm:$0xf]  ;;  %v4990_v54 = vld [vmem:[%s7406_s6 + $0x230] sm:$0xf0]  ;;  %v4737_v57 = vor.u32 %v6131_v48, %v4734_v49  ;;  %v5221_v27 = vor.u32 %v6254_v19, %v5220_v18  ;;  %v5076_v29 = vld [vmem:[%s7406_s6 + $0x2c8] sm:$0xf] }
 0x142   : > { %1972 = vmatpush.bf16.msrb.mxu0 %v4769_v33  ;;  %v6195_v53 = vld [vmem:[%s7406_s6 + $0x224] sm:$0xf]  ;;  %v5118_v56 = vld [vmem:[%s7406_s6 + $0x330] sm:$0xf0]  ;;  %v4865_v60 = vor.u32 %v6163_v50, %v4862_v52  ;;  %v6218_v30 = vld [vmem:[%s7406_s6 + $0x2d4] sm:$0xf0]  ;;  %v4821_v33 = vor.u32 %v6154_v25, %v4820_v24 }
 0x143   : > { %1985 = vmatpush.bf16.msrb.mxu1 %v4897_v34  ;;  %v6227_v55 = vld [vmem:[%s7406_s6 + $0x324] sm:$0xf]  ;;  %v4718_v59 = vld [vmem:[%s7406_s6 + $0x10] sm:$0xf0]  ;;  %v4993_v61 = vor.u32 %v6195_v53, %v4990_v54  ;;  %v5204_v31 = vld [vmem:[%s7406_s6 + $0x3c8] sm:$0xf]  ;;  %v4949_v34 = vor.u32 %v6186_v28, %v4948_v26 }
 0x144   : > { %1998 = vmatpush.bf16.msrb.mxu2 %v5025_v35  ;;  %v6127_v58 = vld [vmem:[%s7406_s6 + $0x4] sm:$0xf]  ;;  %v4846_v63 = vld [vmem:[%s7406_s6 + $0x110] sm:$0xf0]  ;;  %v5121_v3 = vor.u32 %v6227_v55, %v5118_v56  ;;  %v6250_v32 = vld [vmem:[%s7406_s6 + $0x3d4] sm:$0xf0]  ;;  %v5077_v35 = vor.u32 %v6218_v30, %v5076_v29 }
 0x145   : > { %2011 = vmatpush.bf16.msrb.mxu3 %v5153_v39  ;;  %v6159_v62 = vld [vmem:[%s7406_s6 + $0x104] sm:$0xf]  ;;  %v4974_v4 = vld [vmem:[%s7406_s6 + $0x210] sm:$0xf0]  ;;  %v4721_v12 = vor.u32 %v6127_v58, %v4718_v59  ;;  %v4804_v36 = vld [vmem:[%s7406_s6 + $0xa8] sm:$0xf]  ;;  %v5205_v39 = vor.u32 %v6250_v32, %v5204_v31 }
 0x146   : > { %1973 = vmatpush.bf16.msrb.mxu0 %v4753_v45  ;;  %v6191_v0 = vld [vmem:[%s7406_s6 + $0x204] sm:$0xf]  ;;  %v5102_v7 = vld [vmem:[%s7406_s6 + $0x310] sm:$0xf0]  ;;  %v4849_v16 = vor.u32 %v6159_v62, %v4846_v63  ;;  %v6150_v37 = vld [vmem:[%s7406_s6 + $0xb4] sm:$0xf0] }
 0x147   : > { %1986 = vmatpush.bf16.msrb.mxu1 %v4881_v46  ;;  %v6223_v6 = vld [vmem:[%s7406_s6 + $0x304] sm:$0xf]  ;;  %v4977_v17 = vor.u32 %v6191_v0, %v4974_v4  ;;  %v4932_v38 = vld [vmem:[%s7406_s6 + $0x1a8] sm:$0xf]  ;;  %v6182_v40 = vld [vmem:[%s7406_s6 + $0x1b4] sm:$0xf0]  ;;  %v4805_v45 = vor.u32 %v6150_v37, %v4804_v36 }
 0x148   : > { %1999 = vmatpush.bf16.msrb.mxu2 %v5009_v47  ;;  %v5105_v20 = vor.u32 %v6223_v6, %v5102_v7  ;;  %v5060_v41 = vld [vmem:[%s7406_s6 + $0x2a8] sm:$0xf]  ;;  %v6214_v42 = vld [vmem:[%s7406_s6 + $0x2b4] sm:$0xf0]  ;;  %v4933_v46 = vor.u32 %v6182_v40, %v4932_v38 }
 0x149   : > { %2012 = vmatpush.bf16.msrb.mxu3 %v5137_v51  ;;  %v5188_v43 = vld [vmem:[%s7406_s6 + $0x3a8] sm:$0xf]  ;;  %v6246_v44 = vld [vmem:[%s7406_s6 + $0x3b4] sm:$0xf0]  ;;  %v5061_v47 = vor.u32 %v6214_v42, %v5060_v41 }
 0x14a   : > { %1974 = vmatpush.bf16.msrb.mxu0 %v4737_v57  ;;  %v4788_v48 = vld [vmem:[%s7406_s6 + $0x88] sm:$0xf]  ;;  %v6146_v49 = vld [vmem:[%s7406_s6 + $0x94] sm:$0xf0]  ;;  %v5189_v51 = vor.u32 %v6246_v44, %v5188_v43 }
 0x14b   : > { %1987 = vmatpush.bf16.msrb.mxu1 %v4865_v60  ;;  %v4916_v50 = vld [vmem:[%s7406_s6 + $0x188] sm:$0xf]  ;;  %v6178_v52 = vld [vmem:[%s7406_s6 + $0x194] sm:$0xf0]  ;;  %v4789_v57 = vor.u32 %v6146_v49, %v4788_v48  ;;  %v4966_v49 = vld [vmem:[%s7406_s6 + $0x1f8] sm:$0xf0] }
 0x14c   : > { %2000 = vmatpush.bf16.msrb.mxu2 %v4993_v61  ;;  %v5044_v53 = vld [vmem:[%s7406_s6 + $0x288] sm:$0xf]  ;;  %v6210_v54 = vld [vmem:[%s7406_s6 + $0x294] sm:$0xf0]  ;;  %v4917_v58 = vor.u32 %v6178_v52, %v4916_v50  ;;  %v6220_v50 = vld [vmem:[%s7406_s6 + $0x2ec] sm:$0xf] }
 0x14d   : > { %2013 = vmatpush.bf16.msrb.mxu3 %v5121_v3  ;;  %v5172_v55 = vld [vmem:[%s7406_s6 + $0x388] sm:$0xf]  ;;  %v6242_v56 = vld [vmem:[%s7406_s6 + $0x394] sm:$0xf0]  ;;  %v5045_v59 = vor.u32 %v6210_v54, %v5044_v53  ;;  %v6252_v54 = vld [vmem:[%s7406_s6 + $0x3ec] sm:$0xf] }
 0x14e   : > { %1975 = vmatpush.bf16.msrb.mxu0 %v4721_v12  ;;  %v4772_v60 = vld [vmem:[%s7406_s6 + $0x68] sm:$0xf]  ;;  %v6142_v61 = vld [vmem:[%s7406_s6 + $0x74] sm:$0xf0]  ;;  %v5173_v63 = vor.u32 %v6242_v56, %v5172_v55  ;;  %v5222_v55 = vld [vmem:[%s7406_s6 + $0x3f8] sm:$0xf0] }
 0x14f   : > { %1988 = vmatpush.bf16.msrb.mxu1 %v4849_v16  ;;  %v4900_v62 = vld [vmem:[%s7406_s6 + $0x168] sm:$0xf]  ;;  %v6174_v0 = vld [vmem:[%s7406_s6 + $0x174] sm:$0xf0]  ;;  %v4773_v9 = vor.u32 %v6142_v61, %v4772_v60  ;;  %v6152_v60 = vld [vmem:[%s7406_s6 + $0xcc] sm:$0xf] }
 0x150   : > { %2001 = vmatpush.bf16.msrb.mxu2 %v4977_v17  ;;  %v5028_v3 = vld [vmem:[%s7406_s6 + $0x268] sm:$0xf]  ;;  %v6206_v4 = vld [vmem:[%s7406_s6 + $0x274] sm:$0xf0]  ;;  %v4901_v10 = vor.u32 %v6174_v0, %v4900_v62  ;;  %v4822_v61 = vld [vmem:[%s7406_s6 + $0xd8] sm:$0xf0] }
 0x151   : > { %2014 = vmatpush.bf16.msrb.mxu3 %v5105_v20  ;;  %1976 = vmatmul.bf16.vlgmr.msrb.gmra.mxu0 %v7543_v2  ;;  %v5156_v6 = vld [vmem:[%s7406_s6 + $0x368] sm:$0xf]  ;;  %v6238_v7 = vld [vmem:[%s7406_s6 + $0x374] sm:$0xf0]  ;;  %v5029_v11 = vor.u32 %v6206_v4, %v5028_v3  ;;  %v6184_v62 = vld [vmem:[%s7406_s6 + $0x1cc] sm:$0xf] }
 0x152   : > { %2020 = vmatpush.bf16.msra.mxu0 %v4837_v21  ;;  %1989 = vmatmul.bf16.vlgmr.msrb.gmra.mxu1 %v7549_v8  ;;  %v4756_v12 = vld [vmem:[%s7406_s6 + $0x48] sm:$0xf]  ;;  %v6138_v13 = vld [vmem:[%s7406_s6 + $0x54] sm:$0xf0]  ;;  %v5157_v15 = vor.u32 %v6238_v7, %v5156_v6  ;;  %v4950_v0 = vld [vmem:[%s7406_s6 + $0x1d8] sm:$0xf0] }
 0x153   : > { %2033 = vmatpush.bf16.msra.mxu1 %v4965_v22  ;;  %2002 = vmatmul.bf16.vlgmr.msrb.gmra.mxu2 %v7541_v1  ;;  %v4884_v14 = vld [vmem:[%s7406_s6 + $0x148] sm:$0xf]  ;;  %v6170_v16 = vld [vmem:[%s7406_s6 + $0x154] sm:$0xf0]  ;;  %v4757_v21 = vor.u32 %v6138_v13, %v4756_v12  ;;  %v6216_v3 = vld [vmem:[%s7406_s6 + $0x2cc] sm:$0xf] }
 0x154   : > { %2046 = vmatpush.bf16.msra.mxu2 %v5093_v23  ;;  %2015 = vmatmul.bf16.vlgmr.msrb.gmra.mxu3 %v7545_v5  ;;  %v5012_v17 = vld [vmem:[%s7406_s6 + $0x248] sm:$0xf]  ;;  %v6202_v18 = vld [vmem:[%s7406_s6 + $0x254] sm:$0xf0]  ;;  %v4885_v23 = vor.u32 %v6170_v16, %v4884_v14  ;;  %v5078_v4 = vld [vmem:[%s7406_s6 + $0x2d8] sm:$0xf0] }
 0x155   : > { %2059 = vmatpush.bf16.msra.mxu3 %v5221_v27  ;;  %v5140_v19 = vld [vmem:[%s7406_s6 + $0x348] sm:$0xf]  ;;  %v6234_v20 = vld [vmem:[%s7406_s6 + $0x354] sm:$0xf0]  ;;  %v5013_v24 = vor.u32 %v6202_v18, %v5012_v17  ;;  %v6248_v6 = vld [vmem:[%s7406_s6 + $0x3cc] sm:$0xf] }
 0x156   : > { %2021 = vmatpush.bf16.msra.mxu0 %v4821_v33  ;;  %v4740_v22 = vld [vmem:[%s7406_s6 + $0x28] sm:$0xf]  ;;  %v6134_v25 = vld [vmem:[%s7406_s6 + $0x34] sm:$0xf0]  ;;  %v5141_v28 = vor.u32 %v6234_v20, %v5140_v19  ;;  %v5206_v7 = vld [vmem:[%s7406_s6 + $0x3d8] sm:$0xf0] }
 0x157   : > { %2034 = vmatpush.bf16.msra.mxu1 %v4949_v34  ;;  %v4868_v26 = vld [vmem:[%s7406_s6 + $0x128] sm:$0xf]  ;;  %v6166_v27 = vld [vmem:[%s7406_s6 + $0x134] sm:$0xf0]  ;;  %v6148_v12 = vld [vmem:[%s7406_s6 + $0xac] sm:$0xf] }
 0x158   : > { %2047 = vmatpush.bf16.msra.mxu2 %v5077_v35  ;;  %v4996_v29 = vld [vmem:[%s7406_s6 + $0x228] sm:$0xf]  ;;  %v6198_v30 = vld [vmem:[%s7406_s6 + $0x234] sm:$0xf0]  ;;  %v4741_v35 = vor.u32 %v6134_v25, %v4740_v22  ;;  %v4869_v38 = vor.u32 %v6166_v27, %v4868_v26  ;;  %v4806_v13 = vld [vmem:[%s7406_s6 + $0xb8] sm:$0xf0] }
 0x159   : > { %2060 = vmatpush.bf16.msra.mxu3 %v5205_v39  ;;  %v5124_v31 = vld [vmem:[%s7406_s6 + $0x328] sm:$0xf]  ;;  %v6230_v32 = vld [vmem:[%s7406_s6 + $0x334] sm:$0xf0]  ;;  %v4997_v39 = vor.u32 %v6198_v30, %v4996_v29  ;;  %v6180_v14 = vld [vmem:[%s7406_s6 + $0x1ac] sm:$0xf] }
 0x15a   : > { %2022 = vmatpush.bf16.msra.mxu0 %v4805_v45  ;;  %v4724_v33 = vld [vmem:[%s7406_s6 + $0x8] sm:$0xf]  ;;  %v6130_v34 = vld [vmem:[%s7406_s6 + $0x14] sm:$0xf0]  ;;  %v5125_v43 = vor.u32 %v6230_v32, %v5124_v31  ;;  %v6156_v45 = vld [vmem:[%s7406_s6 + $0xec] sm:$0xf] }
 0x15b   : > { %2035 = vmatpush.bf16.msra.mxu1 %v4933_v46  ;;  %v4852_v36 = vld [vmem:[%s7406_s6 + $0x108] sm:$0xf]  ;;  %v6162_v37 = vld [vmem:[%s7406_s6 + $0x114] sm:$0xf0]  ;;  %v4838_v46 = vld [vmem:[%s7406_s6 + $0xf8] sm:$0xf0]  ;;  %v4725_v48 = vor.u32 %v6130_v34, %v4724_v33 }
 0x15c   : > { %2048 = vmatpush.bf16.msra.mxu2 %v5061_v47  ;;  %v4980_v40 = vld [vmem:[%s7406_s6 + $0x208] sm:$0xf]  ;;  %v6194_v41 = vld [vmem:[%s7406_s6 + $0x214] sm:$0xf0]  ;;  %v6188_v47 = vld [vmem:[%s7406_s6 + $0x1ec] sm:$0xf]  ;;  %v4853_v52 = vor.u32 %v6162_v37, %v4852_v36 }
 0x15d   : > { %2061 = vmatpush.bf16.msra.mxu3 %v5189_v51  ;;  %v5108_v42 = vld [vmem:[%s7406_s6 + $0x308] sm:$0xf]  ;;  %v6226_v44 = vld [vmem:[%s7406_s6 + $0x314] sm:$0xf0]  ;;  %v5094_v51 = vld [vmem:[%s7406_s6 + $0x2f8] sm:$0xf0]  ;;  %v4981_v53 = vor.u32 %v6194_v41, %v4980_v40 }
 0x15e   : > { %2023 = vmatpush.bf16.msra.mxu0 %v4789_v57  ;;  %v5109_v56 = vor.u32 %v6226_v44, %v5108_v42  ;;  %v4841_v57 = vor.u32 %v6156_v45, %v4838_v46  ;;  %v4934_v16 = vld [vmem:[%s7406_s6 + $0x1b8] sm:$0xf0]  ;;  %v6212_v17 = vld [vmem:[%s7406_s6 + $0x2ac] sm:$0xf] }
 0x15f   : > { %2036 = vmatpush.bf16.msra.mxu1 %v4917_v58  ;;  %v4969_v58 = vor.u32 %v6188_v47, %v4966_v49  ;;  %v5062_v18 = vld [vmem:[%s7406_s6 + $0x2b8] sm:$0xf0]  ;;  %v6244_v19 = vld [vmem:[%s7406_s6 + $0x3ac] sm:$0xf]  ;;  %v4937_v22 = vor.u32 %v6180_v14, %v4934_v16 }
 0x160   : > { %2049 = vmatpush.bf16.msra.mxu2 %v5045_v59  ;;  %v5097_v59 = vor.u32 %v6220_v50, %v5094_v51  ;;  %v5190_v20 = vld [vmem:[%s7406_s6 + $0x3b8] sm:$0xf0]  ;;  %v6176_v26 = vld [vmem:[%s7406_s6 + $0x18c] sm:$0xf] }
 0x161   : > { %2062 = vmatpush.bf16.msra.mxu3 %v5173_v63  ;;  %v5225_v63 = vor.u32 %v6252_v54, %v5222_v55  ;;  %v4790_v25 = vld [vmem:[%s7406_s6 + $0x98] sm:$0xf0]  ;;  %v5193_v27 = vor.u32 %v6244_v19, %v5190_v20  ;;  %v6208_v29 = vld [vmem:[%s7406_s6 + $0x28c] sm:$0xf] }
 0x162   : > { %2024 = vmatpush.bf16.msra.mxu0 %v4773_v9  ;;  %v4825_v9 = vor.u32 %v6152_v60, %v4822_v61  ;;  %v5046_v30 = vld [vmem:[%s7406_s6 + $0x298] sm:$0xf0]  ;;  %v6240_v31 = vld [vmem:[%s7406_s6 + $0x38c] sm:$0xf] }
 0x163   : > { %2037 = vmatpush.bf16.msra.mxu1 %v4901_v10  ;;  %v4953_v10 = vor.u32 %v6184_v62, %v4950_v0  ;;  %v5174_v32 = vld [vmem:[%s7406_s6 + $0x398] sm:$0xf0]  ;;  %v6140_v36 = vld [vmem:[%s7406_s6 + $0x6c] sm:$0xf] }
 0x164   : > { %2050 = vmatpush.bf16.msra.mxu2 %v5029_v11  ;;  %v5081_v11 = vor.u32 %v6216_v3, %v5078_v4  ;;  %v4774_v37 = vld [vmem:[%s7406_s6 + $0x78] sm:$0xf0]  ;;  %v6204_v41 = vld [vmem:[%s7406_s6 + $0x26c] sm:$0xf] }
 0x165   : > { %2063 = vmatpush.bf16.msra.mxu3 %v5157_v15  ;;  %v5209_v15 = vor.u32 %v6248_v6, %v5206_v7  ;;  %v4902_v40 = vld [vmem:[%s7406_s6 + $0x178] sm:$0xf0]  ;;  %v4777_v45 = vor.u32 %v6140_v36, %v4774_v37  ;;  %v6168_v50 = vld [vmem:[%s7406_s6 + $0x14c] sm:$0xf]  ;;  %v5268_v36 = vld [vmem:[%s7414_s0 + $0x50] sm:$0xf] }
 0x166   : > { %2025 = vmatpush.bf16.msra.mxu0 %v4757_v21  ;;  %v4809_v21 = vor.u32 %v6148_v12, %v4806_v13  ;;  %v5030_v42 = vld [vmem:[%s7406_s6 + $0x278] sm:$0xf0]  ;;  %v6232_v55 = vld [vmem:[%s7406_s6 + $0x34c] sm:$0xf]  ;;  %v6266_v37 = vld [vmem:[%s7414_s0 + $0x54] sm:$0xf0] }
 0x167   : > { %2038 = vmatpush.bf16.msra.mxu1 %v4885_v23  ;;  %v5065_v23 = vor.u32 %v6212_v17, %v5062_v18  ;;  %v5158_v44 = vld [vmem:[%s7406_s6 + $0x378] sm:$0xf0]  ;;  %v5033_v47 = vor.u32 %v6204_v41, %v5030_v42  ;;  %v6132_v60 = vld [vmem:[%s7406_s6 + $0x2c] sm:$0xf]  ;;  %v6264_v41 = vld [vmem:[%s7414_s0 + $0x44] sm:$0xf0] }
 0x168   : > { %2051 = vmatpush.bf16.msra.mxu2 %v5013_v24  ;;  %v6144_v24 = vld [vmem:[%s7406_s6 + $0x8c] sm:$0xf]  ;;  %v4758_v49 = vld [vmem:[%s7406_s6 + $0x58] sm:$0xf0]  ;;  %v5252_v42 = vld [vmem:[%s7414_s0 + $0x30] sm:$0xf] }
 0x169   : > { %2064 = vmatpush.bf16.msra.mxu3 %v5141_v28  ;;  %v4918_v28 = vld [vmem:[%s7406_s6 + $0x198] sm:$0xf0]  ;;  %v4793_v33 = vor.u32 %v6144_v24, %v4790_v25  ;;  %v6164_v62 = vld [vmem:[%s7406_s6 + $0x12c] sm:$0xf]  ;;  %v5348_v24 = vld [vmem:[%s7414_s0 + $0xf0] sm:$0xf] }
 0x16a   : > { %2026 = vmatpush.bf16.msra.mxu0 %v4741_v35  ;;  %v4921_v34 = vor.u32 %v6176_v26, %v4918_v28  ;;  %v5049_v35 = vor.u32 %v6208_v29, %v5046_v30  ;;  %v5014_v54 = vld [vmem:[%s7406_s6 + $0x258] sm:$0xf0]  ;;  %v6196_v3 = vld [vmem:[%s7406_s6 + $0x22c] sm:$0xf]  ;;  %v6286_v25 = vld [vmem:[%s7414_s0 + $0xf4] sm:$0xf0] }
 0x16b   : > { %2039 = vmatpush.bf16.msra.mxu1 %v4869_v38  ;;  %v6172_v38 = vld [vmem:[%s7406_s6 + $0x16c] sm:$0xf]  ;;  %v4742_v61 = vld [vmem:[%s7406_s6 + $0x38] sm:$0xf0]  ;;  %v5276_v30 = vld [vmem:[%s7414_s0 + $0x60] sm:$0xf] }
 0x16c   : > { %2052 = vmatpush.bf16.msra.mxu2 %v4997_v39  ;;  %v5177_v39 = vor.u32 %v6240_v31, %v5174_v32  ;;  %v4905_v46 = vor.u32 %v6172_v38, %v4902_v40  ;;  %v4870_v0 = vld [vmem:[%s7406_s6 + $0x138] sm:$0xf0]  ;;  %v6228_v6 = vld [vmem:[%s7406_s6 + $0x32c] sm:$0xf]  ;;  %v6268_v31 = vld [vmem:[%s7414_s0 + $0x64] sm:$0xf0]  ;;  %v5349_v32 = vor.u32 %v6286_v25, %v5348_v24 }
 0x16d   : > { %2065 = vmatpush.bf16.msra.mxu3 %v5125_v43  ;;  %v6236_v43 = vld [vmem:[%s7406_s6 + $0x36c] sm:$0xf]  ;;  %v4998_v4 = vld [vmem:[%s7406_s6 + $0x238] sm:$0xf0]  ;;  %v5260_v40 = vld [vmem:[%s7414_s0 + $0x40] sm:$0xf] }
 0x16e   : > { %2027 = vmatpush.bf16.msra.mxu0 %v4725_v48  ;;  %v6136_v48 = vld [vmem:[%s7406_s6 + $0x4c] sm:$0xf]  ;;  %v5161_v51 = vor.u32 %v6236_v43, %v5158_v44  ;;  %v5126_v7 = vld [vmem:[%s7406_s6 + $0x338] sm:$0xf0]  ;;  %v5001_v12 = vor.u32 %v6196_v3, %v4998_v4  ;;  %v6262_v43 = vld [vmem:[%s7414_s0 + $0x34] sm:$0xf0] }
 0x16f   : > { %2040 = vmatpush.bf16.msra.mxu1 %v4853_v52  ;;  %v4886_v52 = vld [vmem:[%s7406_s6 + $0x158] sm:$0xf0]  ;;  %v6160_v14 = vld [vmem:[%s7406_s6 + $0x10c] sm:$0xf]  ;;  %v5129_v16 = vor.u32 %v6228_v6, %v5126_v7  ;;  %v5244_v44 = vld [vmem:[%s7414_s0 + $0x20] sm:$0xf] }
 0x170   : > { %2053 = vmatpush.bf16.msra.mxu2 %v4981_v53  ;;  %v6200_v53 = vld [vmem:[%s7406_s6 + $0x24c] sm:$0xf]  ;;  %v4726_v13 = vld [vmem:[%s7406_s6 + $0x18] sm:$0xf0]  ;;  %v6267_v3 = vld [vmem:[%s7414_s0 + $0x64] sm:$0xf] }
 0x171   : > { %2066 = vmatpush.bf16.msra.mxu3 %v5109_v56  ;;  %2028 = vmatmul.bf16.vlgmr.msra.gmra.mxu0 %v7543_v2  ;;  %v5142_v56 = vld [vmem:[%s7406_s6 + $0x358] sm:$0xf0]  ;;  %v6192_v17 = vld [vmem:[%s7406_s6 + $0x20c] sm:$0xf]  ;;  %v5300_v7 = vld [vmem:[%s7414_s0 + $0x90] sm:$0xf] }
 0x172   : > { %2072 = vmatpush.bf16.msrb.mxu0 %v4841_v57  ;;  %2041 = vmatmul.bf16.vlgmr.msra.gmra.mxu1 %v7549_v8  ;;  %v4761_v57 = vor.u32 %v6136_v48, %v4758_v49  ;;  %v4982_v18 = vld [vmem:[%s7406_s6 + $0x218] sm:$0xf0]  ;;  %v6224_v19 = vld [vmem:[%s7406_s6 + $0x30c] sm:$0xf]  ;;  %v5236_v48 = vld [vmem:[%s7414_s0 + $0x10] sm:$0xf] }
 0x173   : > { %2085 = vmatpush.bf16.msrb.mxu1 %v4969_v58  ;;  %2054 = vmatmul.bf16.vlgmr.msra.gmra.mxu2 %v7541_v1  ;;  %v4889_v58 = vor.u32 %v6168_v50, %v4886_v52  ;;  %v5110_v20 = vld [vmem:[%s7406_s6 + $0x318] sm:$0xf0]  ;;  %v6258_v49 = vld [vmem:[%s7414_s0 + $0x14] sm:$0xf0]  ;;  %v5324_v50 = vld [vmem:[%s7414_s0 + $0xc0] sm:$0xf] }
 0x174   : > { %2098 = vmatpush.bf16.msrb.mxu2 %v5097_v59  ;;  %2067 = vmatmul.bf16.vlgmr.msra.gmra.mxu3 %v7545_v5  ;;  %v5017_v59 = vor.u32 %v6200_v53, %v5014_v54  ;;  %v5113_v28 = vor.u32 %v6224_v19, %v5110_v20  ;;  %v5237_v53 = vor.u32 %v6258_v49, %v5236_v48  ;;  %v5228_v54 = vld [vmem:[%s7414_s0] sm:$0xf]  ;;  %v5278_v6 = vld [vmem:[%s7414_s0 + $0x68] sm:$0xf0]  ;;  %v6285_v19 = vld [vmem:[%s7414_s0 + $0xf4] sm:$0xf] }
 0x175   : > { %2111 = vmatpush.bf16.msrb.mxu3 %v5225_v63  ;;  %v5145_v63 = vor.u32 %v6232_v55, %v5142_v56  ;;  %v6256_v55 = vld [vmem:[%s7414_s0 + $0x4] sm:$0xf0]  ;;  %v5316_v56 = vld [vmem:[%s7414_s0 + $0xb0] sm:$0xf]  ;;  %v5350_v20 = vld [vmem:[%s7414_s0 + $0xf8] sm:$0xf0] }
 0x176   : > { %2073 = vmatpush.bf16.msrb.mxu0 %v4825_v9  ;;  %v4745_v9 = vor.u32 %v6132_v60, %v4742_v61  ;;  %v5308_v61 = vld [vmem:[%s7414_s0 + $0xa0] sm:$0xf]  ;;  %v5262_v24 = vld [vmem:[%s7414_s0 + $0x48] sm:$0xf0]  ;;  %v5353_v25 = vor.u32 %v6285_v19, %v5350_v20  ;;  %v6257_v49 = vld [vmem:[%s7414_s0 + $0x14] sm:$0xf] }
 0x177   : > { %2086 = vmatpush.bf16.msrb.mxu1 %v4953_v10  ;;  %v6128_v10 = vld [vmem:[%s7406_s6 + $0xc] sm:$0xf]  ;;  %v5364_v20 = vld [vmem:[%s7414_s0 + $0x110] sm:$0xf] }
 0x178   : > { %2099 = vmatpush.bf16.msrb.mxu2 %v5081_v11  ;;  %v4873_v11 = vor.u32 %v6164_v62, %v4870_v0  ;;  %v5229_v62 = vor.u32 %v6256_v55, %v5228_v54 }
 0x179   : > { %2112 = vmatpush.bf16.msrb.mxu3 %v5209_v15  ;;  %v4854_v15 = vld [vmem:[%s7406_s6 + $0x118] sm:$0xf0]  ;;  %s4707_s6 = sshll.u32 %s8561_s26, 2 }
 0x17a   : > { %2074 = vmatpush.bf16.msrb.mxu0 %v4809_v21  ;;  %v5284_v21 = vld [vmem:[%s7414_s0 + $0x70] sm:$0xf]  ;;  %v4857_v26 = vor.u32 %v6160_v14, %v4854_v15  ;;  %v6265_v14 = vld [vmem:[%s7414_s0 + $0x54] sm:$0xf]  ;;  %s1092_s10 = scalar_lea.vmem %s8548_s22, %s4707_s6  ;;  %s4708_s6 = sshll.u32 %s8561_s26, 1 }
 0x17b   : > { %2087 = vmatpush.bf16.msrb.mxu1 %v4937_v22  ;;  %v6270_v22 = vld [vmem:[%s7414_s0 + $0x74] sm:$0xf0]  ;;  %s8551_s22 = sld [smem:[#allocation35_spill]] }
 0x17c   : > { %2100 = vmatpush.bf16.msrb.mxu2 %v5065_v23  ;;  %v4729_v23 = vor.u32 %v6128_v10, %v4726_v13  ;;  %v5285_v29 = vor.u32 %v6270_v22, %v5284_v21  ;;  %v5412_v10 = vld [vmem:[%s7414_s0 + $0x170] sm:$0xf]  ;;  %v5281_v13 = vor.u32 %v6267_v3, %v5278_v6  ;;  %v6294_v3 = vld [vmem:[%s7414_s0 + $0x134] sm:$0xf0] }
 0x17d   : > { %2113 = vmatpush.bf16.msrb.mxu3 %v5193_v27  ;;  %v4985_v27 = vor.u32 %v6192_v17, %v4982_v18  ;;  %v5292_v17 = vld [vmem:[%s7414_s0 + $0x80] sm:$0xf]  ;;  %v6272_v18 = vld [vmem:[%s7414_s0 + $0x84] sm:$0xf0] }
 0x17e   : > { %2075 = vmatpush.bf16.msrb.mxu0 %v4793_v33  ;;  %v5340_v33 = vld [vmem:[%s7414_s0 + $0xe0] sm:$0xf]  ;;  %v5293_v22 = vor.u32 %v6272_v18, %v5292_v17 }
 0x17f   : > { %2088 = vmatpush.bf16.msrb.mxu1 %v4921_v34  ;;  %v6284_v34 = vld [vmem:[%s7414_s0 + $0xe4] sm:$0xf0] }
 0x180   : > { %2101 = vmatpush.bf16.msrb.mxu2 %v5049_v35  ;;  %v5277_v35 = vor.u32 %v6268_v31, %v5276_v30  ;;  %v5341_v38 = vor.u32 %v6284_v34, %v5340_v33  ;;  %v5254_v30 = vld [vmem:[%s7414_s0 + $0x38] sm:$0xf0]  ;;  %v5404_v31 = vld [vmem:[%s7414_s0 + $0x160] sm:$0xf]  ;;  %v6283_v33 = vld [vmem:[%s7414_s0 + $0xe4] sm:$0xf] }
 0x181   : > { %2114 = vmatpush.bf16.msrb.mxu3 %v5177_v39  ;;  %v5269_v39 = vor.u32 %v6266_v37, %v5268_v36 }
 0x182   : > { %2076 = vmatpush.bf16.msrb.mxu0 %v4777_v45  ;;  %v6282_v45 = vld [vmem:[%s7414_s0 + $0xd4] sm:$0xf0] }
 0x183   : > { %2089 = vmatpush.bf16.msrb.mxu1 %v4905_v46 }
 0x184   : > { %2102 = vmatpush.bf16.msrb.mxu2 %v5033_v47 }
 0x185   : > { %2115 = vmatpush.bf16.msrb.mxu3 %v5161_v51  ;;  %v6280_v51 = vld [vmem:[%s7414_s0 + $0xc4] sm:$0xf0] }
 0x186   : > { %2077 = vmatpush.bf16.msrb.mxu0 %v4761_v57  ;;  %v5325_v52 = vor.u32 %v6280_v51, %v5324_v50  ;;  %v6269_v57 = vld [vmem:[%s7414_s0 + $0x74] sm:$0xf]  ;;  %v5238_v50 = vld [vmem:[%s7414_s0 + $0x18] sm:$0xf0]  ;;  %v5388_v51 = vld [vmem:[%s7414_s0 + $0x140] sm:$0xf] }
 0x187   : > { %2090 = vmatpush.bf16.msrb.mxu1 %v4889_v58  ;;  %v5286_v58 = vld [vmem:[%s7414_s0 + $0x78] sm:$0xf0] }
 0x188   : > { %2103 = vmatpush.bf16.msrb.mxu2 %v5017_v59  ;;  %v6278_v59 = vld [vmem:[%s7414_s0 + $0xb4] sm:$0xf0]  ;;  %v5289_v0 = vor.u32 %v6269_v57, %v5286_v58 }
 0x189   : > { %2116 = vmatpush.bf16.msrb.mxu3 %v5145_v63  ;;  %v5317_v60 = vor.u32 %v6278_v59, %v5316_v56  ;;  %v6276_v63 = vld [vmem:[%s7414_s0 + $0xa4] sm:$0xf0]  ;;  %v5326_v56 = vld [vmem:[%s7414_s0 + $0xc8] sm:$0xf0]  ;;  %v5241_v59 = vor.u32 %v6257_v49, %v5238_v50  ;;  %v6297_v49 = vld [vmem:[%s7414_s0 + $0x154] sm:$0xf] }
 0x18a   : > { %2078 = vmatpush.bf16.msrb.mxu0 %v4745_v9  ;;  %v5309_v4 = vor.u32 %v6276_v63, %v5308_v61  ;;  %v6274_v9 = vld [vmem:[%s7414_s0 + $0x94] sm:$0xf0]  ;;  %v5230_v61 = vld [vmem:[%s7414_s0 + $0x8] sm:$0xf0] }
 0x18b   : > { %2091 = vmatpush.bf16.msrb.mxu1 %v4873_v11  ;;  %v6302_v11 = vld [vmem:[%s7414_s0 + $0x174] sm:$0xf0]  ;;  %v5301_v15 = vor.u32 %v6274_v9, %v5300_v7  ;;  %v5318_v9 = vld [vmem:[%s7414_s0 + $0xb8] sm:$0xf0] }
 0x18c   : > { %2104 = vmatpush.bf16.msrb.mxu2 %v5001_v12  ;;  %v5413_v12 = vor.u32 %v6302_v11, %v5412_v10  ;;  %v5372_v10 = vld [vmem:[%s7414_s0 + $0x120] sm:$0xf] }
 0x18d   : > { %2117 = vmatpush.bf16.msrb.mxu3 %v5129_v16  ;;  %v5270_v16 = vld [vmem:[%s7414_s0 + $0x58] sm:$0xf0] }
 0x18e   : > { %2079 = vmatpush.bf16.msrb.mxu0 %v4729_v23  ;;  %v5273_v21 = vor.u32 %v6265_v14, %v5270_v16  ;;  %v6263_v23 = vld [vmem:[%s7414_s0 + $0x44] sm:$0xf]  ;;  %v5310_v14 = vld [vmem:[%s7414_s0 + $0xa8] sm:$0xf0] }
 0x18f   : > { %2092 = vmatpush.bf16.msrb.mxu1 %v4857_v26  ;;  %v7789_v26 = vld [vmem:[%s1092_s10] sm:$0xf]  ;;  %s1096_s10 = scalar_lea.vmem %s8551_s22, %s4708_s6  ;;  %s6126_s22 = sshll.u32 %s8561_s26, 6 }
 0x190   : > { %2105 = vmatpush.bf16.msrb.mxu2 %v4985_v27  ;;  %v5265_v27 = vor.u32 %v6263_v23, %v5262_v24  ;;  %v6273_v24 = vld [vmem:[%s7414_s0 + $0x94] sm:$0xf] }
 0x191   : > { %2118 = vmatpush.bf16.msrb.mxu3 %v5113_v28  ;;  %2080 = vmatmul.bf16.vlgmr.msrb.gmra.mxu0 %v7543_v2  ;;  %v5261_v2 = vor.u32 %v6264_v41, %v5260_v40  ;;  %v1268_v28 = vperm.slane %v7789_v26, 0  ;;  %v6259_v41 = vld [vmem:[%s7414_s0 + $0x24] sm:$0xf] }
 0x192   : > { %2522 = vmatpush.bf16.msra.mxu0 %v5285_v29  ;;  %2093 = vmatmul.bf16.vlgmr.msrb.gmra.mxu1 %v7549_v8  ;;  %v5253_v8 = vor.u32 %v6262_v43, %v5252_v42  ;;  %v6261_v29 = vld [vmem:[%s7414_s0 + $0x34] sm:$0xf]  ;;  %v5396_v42 = vld [vmem:[%s7414_s0 + $0x150] sm:$0xf]  ;;  %v6298_v43 = vld [vmem:[%s7414_s0 + $0x154] sm:$0xf0] }
 0x193   : > { %2535 = vmatpush.bf16.msra.mxu1 %v5349_v32  ;;  %2106 = vmatmul.bf16.vlgmr.msrb.gmra.mxu2 %v7541_v1  ;;  %v5332_v1 = vld [vmem:[%s7414_s0 + $0xd0] sm:$0xf]  ;;  %v6300_v32 = vld [vmem:[%s7414_s0 + $0x164] sm:$0xf0]  ;;  %v5257_v37 = vor.u32 %v6261_v29, %v5254_v30 }
 0x194   : > { %2119 = vmatmul.bf16.vlgmr.msrb.gmra.mxu3 %v7545_v5  ;;  %v6260_v5 = vld [vmem:[%s7414_s0 + $0x24] sm:$0xf0]  ;;  %v5333_v46 = vor.u32 %v6282_v45, %v5332_v1  ;;  %2548 = vmatpush.bf16.msra.mxu2 %v5413_v12  ;;  %v5405_v34 = vor.u32 %v6300_v32, %v5404_v31  ;;  %v5356_v31 = vld [vmem:[%s7414_s0 + $0x100] sm:$0xf] }
 0x195   : > { %v5245_v47 = vor.u32 %v6260_v5, %v5244_v44  ;;  %v5397_v44 = vor.u32 %v6298_v43, %v5396_v42  ;;  %v5334_v5 = vld [vmem:[%s7414_s0 + $0xd8] sm:$0xf0]  ;;  %v6292_v12 = vld [vmem:[%s7414_s0 + $0x124] sm:$0xf0]  ;;  %v6299_v43 = vld [vmem:[%s7414_s0 + $0x164] sm:$0xf] }
 0x196   : > { %2523 = vmatpush.bf16.msra.mxu0 %v5277_v35  ;;  %v5342_v35 = vld [vmem:[%s7414_s0 + $0xe8] sm:$0xf0]  ;;  %v5373_v18 = vor.u32 %v6292_v12, %v5372_v10  ;;  %v6288_v32 = vld [vmem:[%s7414_s0 + $0x104] sm:$0xf0]  ;;  %v5382_v12 = vld [vmem:[%s7414_s0 + $0x138] sm:$0xf0] }
 0x197   : > { %2536 = vmatpush.bf16.msra.mxu1 %v5341_v38  ;;  %v5345_v38 = vor.u32 %v6283_v33, %v5342_v35  ;;  %v6271_v33 = vld [vmem:[%s7414_s0 + $0x84] sm:$0xf]  ;;  %v6301_v35 = vld [vmem:[%s7414_s0 + $0x174] sm:$0xf]  ;;  %v6316_v42 = vld [vmem:[%s7414_s0 + $0x1e4] sm:$0xf0] }
 0x198   : > { %2549 = vmatpush.bf16.msra.mxu2 %v5405_v34  ;;  %v5294_v34 = vld [vmem:[%s7414_s0 + $0x88] sm:$0xf0] }
 0x19a   : > { %2524 = vmatpush.bf16.msra.mxu0 %v5269_v39 }
 0x19b   : > { %2537 = vmatpush.bf16.msra.mxu1 %v5333_v46 }
 0x19c   : > { %2550 = vmatpush.bf16.msra.mxu2 %v5397_v44 }
 0x19e   : > { %2525 = vmatpush.bf16.msra.mxu0 %v5261_v2  ;;  %v5246_v2 = vld [vmem:[%s7414_s0 + $0x28] sm:$0xf0] }
 0x19f   : > { %2538 = vmatpush.bf16.msra.mxu1 %v5325_v52  ;;  %v5249_v46 = vor.u32 %v6259_v41, %v5246_v2  ;;  %v6296_v52 = vld [vmem:[%s7414_s0 + $0x144] sm:$0xf0]  ;;  %v5468_v2 = vld [vmem:[%s7414_s0 + $0x1e0] sm:$0xf] }
 0x1a0   : > { %v5389_v55 = vor.u32 %v6296_v52, %v5388_v51  ;;  %v5469_v44 = vor.u32 %v6316_v42, %v5468_v2  ;;  %v5398_v52 = vld [vmem:[%s7414_s0 + $0x158] sm:$0xf0] }
 0x1a2   : > { %2526 = vmatpush.bf16.msra.mxu0 %v5253_v8  ;;  %v6281_v8 = vld [vmem:[%s7414_s0 + $0xd4] sm:$0xf]  ;;  %2551 = vmatpush.bf16.msra.mxu2 %v5389_v55  ;;  %v5401_v55 = vor.u32 %v6297_v49, %v5398_v52 }
 0x1a3   : > { %2539 = vmatpush.bf16.msra.mxu1 %v5317_v60  ;;  %v6255_v60 = vld [vmem:[%s7414_s0 + $0x4] sm:$0xf] }
 0x1a4   : > { %v5233_v17 = vor.u32 %v6255_v60, %v5230_v61  ;;  %v6295_v60 = vld [vmem:[%s7414_s0 + $0x144] sm:$0xf] }
 0x1a6   : > { %2527 = vmatpush.bf16.msra.mxu0 %v5245_v47  ;;  %v5337_v47 = vor.u32 %v6281_v8, %v5334_v5  ;;  %v5406_v5 = vld [vmem:[%s7414_s0 + $0x168] sm:$0xf0] }
 0x1a7   : > { %2540 = vmatpush.bf16.msra.mxu1 %v5309_v4  ;;  %v6277_v4 = vld [vmem:[%s7414_s0 + $0xb4] sm:$0xf] }
 0x1a8   : > { %v5321_v11 = vor.u32 %v6277_v4, %v5318_v9  ;;  %v6293_v9 = vld [vmem:[%s7414_s0 + $0x134] sm:$0xf] }
 0x1aa   : > { %2528 = vmatpush.bf16.msra.mxu0 %v5237_v53  ;;  %v6279_v53 = vld [vmem:[%s7414_s0 + $0xc4] sm:$0xf] }
 0x1ab   : > { %2541 = vmatpush.bf16.msra.mxu1 %v5301_v15 }
 0x1ae   : > { %2529 = vmatpush.bf16.msra.mxu0 %v5229_v62  ;;  %v5329_v62 = vor.u32 %v6279_v53, %v5326_v56 }
 0x1af   : > { %2542 = vmatpush.bf16.msra.mxu1 %v5293_v22  ;;  %v5476_v22 = vld [vmem:[%s7414_s0 + $0x1f0] sm:$0xf] }
 0x1b1   : > { %v1925_v36 = vpop.f32.mrf.mxu0 }
 0x1b2   : > { %2574 = vmatpush.bf16.msrb.mxu0 %v5289_v0  ;;  %v1926_v39 = vadd.f32 %v1925_v36, %v1268_v28  ;;  %v1938_v40 = vpop.f32.mrf.mxu1  ;;  %v5380_v0 = vld [vmem:[%s7414_s0 + $0x130] sm:$0xf]  ;;  %v5414_v36 = vld [vmem:[%s7414_s0 + $0x178] sm:$0xf0] }
 0x1b3   : > { %2587 = vmatpush.bf16.msrb.mxu1 %v5353_v25  ;;  %v5381_v7 = vor.u32 %v6294_v3, %v5380_v0  ;;  %v5302_v25 = vld [vmem:[%s7414_s0 + $0x98] sm:$0xf0] }
 0x1b4   : > { %v1939_v1 = vadd.f32 %v1938_v40, %v1926_v39  ;;  %v5305_v30 = vor.u32 %v6273_v24, %v5302_v25  ;;  %v5417_v39 = vor.u32 %v6301_v35, %v5414_v36  ;;  %v1269_v40 = vperm.slane %v7789_v26, 1  ;;  %v5366_v24 = vld [vmem:[%s7414_s0 + $0x118] sm:$0xf0] }
 0x1b5   : > { %2552 = vmatpush.bf16.msra.mxu2 %v5381_v7  ;;  %v6310_v7 = vld [vmem:[%s7414_s0 + $0x1b4] sm:$0xf0]  ;;  %v5478_v35 = vld [vmem:[%s7414_s0 + $0x1f8] sm:$0xf0] }
 0x1b6   : > { %2575 = vmatpush.bf16.msrb.mxu0 %v5281_v13  ;;  %v1951_v45 = vpop.f32.mrf.mxu2  ;;  %v6275_v13 = vld [vmem:[%s7414_s0 + $0xa4] sm:$0xf] }
 0x1b7   : > { %2588 = vmatpush.bf16.msrb.mxu1 %v5345_v38  ;;  %v1952_v48 = vadd.f32 %v1951_v45, %v1939_v1  ;;  %v5313_v19 = vor.u32 %v6275_v13, %v5310_v14  ;;  %v5297_v38 = vor.u32 %v6271_v33, %v5294_v34  ;;  %v5409_v45 = vor.u32 %v6299_v43, %v5406_v5  ;;  %v5436_v13 = vld [vmem:[%s7414_s0 + $0x1a0] sm:$0xf]  ;;  %v6308_v14 = vld [vmem:[%s7414_s0 + $0x1a4] sm:$0xf0]  ;;  %v6317_v34 = vld [vmem:[%s7414_s0 + $0x1f4] sm:$0xf] }
 0x1b8   : > { %v5481_v36 = vor.u32 %v6317_v34, %v5478_v35  ;;  %v6323_v34 = vld [vmem:[%s7891_s27 + $0x20] sm:$0xff]  ;;  %v6334_v35 = vld [vmem:[%s7891_s27 + $0x78] sm:$0xff] }
 0x1b9   : > { %v1964_v54 = vpop.f32.mrf.mxu3  ;;  %v1927_v58 = vpop.f32.mrf.mxu0  ;;  %2553 = vmatpush.bf16.msra.mxu2 %v5373_v18  ;;  %v5374_v18 = vld [vmem:[%s7414_s0 + $0x128] sm:$0xf0] }
 0x1ba   : > { %2576 = vmatpush.bf16.msrb.mxu0 %v5273_v21  ;;  %v1965_v57 = vadd.f32 %v1964_v54, %v1952_v48  ;;  %v1940_v63 = vpop.f32.mrf.mxu1  ;;  %v6290_v21 = vld [vmem:[%s7414_s0 + $0x114] sm:$0xf0]  ;;  %v5452_v58 = vld [vmem:[%s7414_s0 + $0x1c0] sm:$0xf] }
 0x1bb   : > { %2589 = vmatpush.bf16.msrb.mxu1 %v5337_v47  ;;  %v5365_v29 = vor.u32 %v6290_v21, %v5364_v20  ;;  %v5460_v47 = vld [vmem:[%s7414_s0 + $0x1d0] sm:$0xf]  ;;  %v6314_v48 = vld [vmem:[%s7414_s0 + $0x1d4] sm:$0xf0]  ;;  %v5390_v63 = vld [vmem:[%s7414_s0 + $0x148] sm:$0xf0] }
 0x1bc   : > { %v2124_v6 = vmax.f32 %v1965_v57, 0.0  ;;  %v5461_v51 = vor.u32 %v6314_v48, %v5460_v47  ;;  %v5393_v3 = vor.u32 %v6295_v60, %v5390_v63  ;;  %v5428_v21 = vld [vmem:[%s7414_s0 + $0x190] sm:$0xf]  ;;  %v6311_v47 = vld [vmem:[%s7414_s0 + $0x1c4] sm:$0xf] }
 0x1bd   : > { %2554 = vmatpush.bf16.msra.mxu2 %v5365_v29  ;;  %v6304_v29 = vld [vmem:[%s7414_s0 + $0x184] sm:$0xf0]  ;;  %v5454_v48 = vld [vmem:[%s7414_s0 + $0x1c8] sm:$0xf0]  ;;  %v6305_v63 = vld [vmem:[%s7414_s0 + $0x194] sm:$0xf] }
 0x1be   : > { %2577 = vmatpush.bf16.msrb.mxu0 %v5265_v27  ;;  %v2128_v15 = vpack.c.bf16 %v2124_v6, %v2124_v6  ;;  %v1953_v16 = vpop.f32.mrf.mxu2  ;;  %v6318_v27 = vld [vmem:[%s7414_s0 + $0x1f4] sm:$0xf0]  ;;  %v5444_v6 = vld [vmem:[%s7414_s0 + $0x1b0] sm:$0xf] }
 0x1bf   : > { %2590 = vmatpush.bf16.msrb.mxu1 %v5329_v62  ;;  %v5477_v28 = vor.u32 %v6318_v27, %v5476_v22  ;;  %v5385_v16 = vor.u32 %v6293_v9, %v5382_v12  ;;  %v6306_v22 = vld [vmem:[%s7414_s0 + $0x194] sm:$0xf0]  ;;  %v1271_v9 = vperm.slane %v7789_v26, 3 }
 0x1c0   : > { %2530 = vmatmul.bf16.vlgmr.msra.gmra.mxu0 %v2128_v15  ;;  %v5429_v25 = vor.u32 %v6306_v22, %v5428_v21 }
 0x1c1   : > { %v1966_v23 = vpop.f32.mrf.mxu3  ;;  %2561 = vmatpush.bf16.msra.mxu3 %v5477_v28  ;;  %v5420_v28 = vld [vmem:[%s7414_s0 + $0x180] sm:$0xf] }
 0x1c2   : > { %2578 = vmatpush.bf16.msrb.mxu0 %v5257_v37  ;;  %v5357_v37 = vor.u32 %v6288_v32, %v5356_v31  ;;  %v6289_v23 = vld [vmem:[%s7414_s0 + $0x114] sm:$0xf]  ;;  %v5358_v31 = vld [vmem:[%s7414_s0 + $0x108] sm:$0xf0]  ;;  %v5421_v32 = vor.u32 %v6304_v29, %v5420_v28 }
 0x1c3   : > { %2591 = vmatpush.bf16.msrb.mxu1 %v5321_v11  ;;  %v5445_v11 = vor.u32 %v6310_v7, %v5444_v6  ;;  %v5369_v27 = vor.u32 %v6289_v23, %v5366_v24  ;;  %v5422_v6 = vld [vmem:[%s7414_s0 + $0x188] sm:$0xf0]  ;;  %v6326_v29 = vld [vmem:[%s7891_s27 + $0x38] sm:$0xff] }
 0x1c4   : > { %2555 = vmatpush.bf16.msra.mxu2 %v5357_v37  ;;  %v1270_v37 = vperm.slane %v7789_v26, 2 }
 0x1c5   : > { %2562 = vmatpush.bf16.msra.mxu3 %v5469_v44 }
 0x1c6   : > { %2579 = vmatpush.bf16.msrb.mxu0 %v5249_v46 }
 0x1c7   : > { %2592 = vmatpush.bf16.msrb.mxu1 %v5313_v19  ;;  %v5437_v19 = vor.u32 %v6308_v14, %v5436_v13 }
 0x1c8   : > { %2600 = vmatpush.bf16.msrb.mxu2 %v5417_v39  ;;  %v5470_v39 = vld [vmem:[%s7414_s0 + $0x1e8] sm:$0xf0] }
 0x1c9   : > { %2563 = vmatpush.bf16.msra.mxu3 %v5461_v51  ;;  %v5457_v51 = vor.u32 %v6311_v47, %v5454_v48  ;;  %v6327_v47 = vld [vmem:[%s7891_s27 + $0x40] sm:$0xff] }
 0x1ca   : > { %2580 = vmatpush.bf16.msrb.mxu0 %v5241_v59  ;;  %v6312_v59 = vld [vmem:[%s7414_s0 + $0x1c4] sm:$0xf0] }
 0x1cb   : > { %2593 = vmatpush.bf16.msrb.mxu1 %v5305_v30  ;;  %v5453_v62 = vor.u32 %v6312_v59, %v5452_v58  ;;  %v6287_v30 = vld [vmem:[%s7414_s0 + $0x104] sm:$0xf]  ;;  %v5438_v59 = vld [vmem:[%s7414_s0 + $0x1a8] sm:$0xf0] }
 0x1cc   : > { %2601 = vmatpush.bf16.msrb.mxu2 %v5409_v45  ;;  %v5361_v33 = vor.u32 %v6287_v30, %v5358_v31  ;;  %v6307_v58 = vld [vmem:[%s7414_s0 + $0x1a4] sm:$0xf]  ;;  %v6325_v31 = vld [vmem:[%s7891_s27 + $0x30] sm:$0xff] }
 0x1cd   : > { %2564 = vmatpush.bf16.msra.mxu3 %v5453_v62  ;;  %v5441_v62 = vor.u32 %v6307_v58, %v5438_v59 }
 0x1ce   : > { %2581 = vmatpush.bf16.msrb.mxu0 %v5233_v17  ;;  %v1977_v41 = vpop.f32.mrf.mxu0  ;;  %v6291_v17 = vld [vmem:[%s7414_s0 + $0x124] sm:$0xf] }
 0x1cf   : > { %2594 = vmatpush.bf16.msrb.mxu1 %v5297_v38  ;;  %v1978_v8 = vadd.f32 %v1977_v41, %v1269_v40  ;;  %v1990_v1 = vpop.f32.mrf.mxu1  ;;  %v5377_v20 = vor.u32 %v6291_v17, %v5374_v18  ;;  %v6315_v38 = vld [vmem:[%s7414_s0 + $0x1e4] sm:$0xf] }
 0x1d0   : > { %2602 = vmatpush.bf16.msrb.mxu2 %v5401_v55  ;;  %v5473_v41 = vor.u32 %v6315_v38, %v5470_v39  ;;  %v5446_v55 = vld [vmem:[%s7414_s0 + $0x1b8] sm:$0xf0]  ;;  %v6321_v38 = vld [vmem:[%s7891_s27 + $0x10] sm:$0xff] }
 0x1d1   : > { %v1991_v46 = vadd.f32 %v1990_v1, %v1978_v8  ;;  %2582 = vmatmul.bf16.vlgmr.msrb.gmra.mxu0 %v2128_v15  ;;  %2565 = vmatpush.bf16.msra.mxu3 %v5445_v11  ;;  %v6313_v8 = vld [vmem:[%s7414_s0 + $0x1d4] sm:$0xf]  ;;  %v5462_v1 = vld [vmem:[%s7414_s0 + $0x1d8] sm:$0xf0]  ;;  %v6333_v39 = vld [vmem:[%s7891_s27 + $0x70] sm:$0xff] }
 0x1d2   : > { %v5465_v44 = vor.u32 %v6313_v8, %v5462_v1  ;;  %2762 = vmatpush.bf16.msra.mxu0 %v6326_v29  ;;  %v6330_v8 = vld [vmem:[%s7891_s27 + $0x58] sm:$0xff]  ;;  %v6329_v1 = vld [vmem:[%s7891_s27 + $0x50] sm:$0xff] }
 0x1d4   : > { %2603 = vmatpush.bf16.msrb.mxu2 %v5393_v3 }
 0x1d5   : > { %2566 = vmatpush.bf16.msra.mxu3 %v5437_v19 }
 0x1d6   : > { %v2003_v50 = vpop.f32.mrf.mxu2  ;;  %v1979_v57 = vpop.f32.mrf.mxu0  ;;  %2763 = vmatpush.bf16.msra.mxu0 %v6325_v31  ;;  %v6389_v31 = vld [vmem:[%s7422_s28 + $0x1ac] sm:$0xf0] }
 0x1d7   : > { %v2004_v53 = vadd.f32 %v2003_v50, %v1991_v46  ;;  %v2016_v54 = vpop.f32.mrf.mxu3  ;;  %v1992_v61 = vpop.f32.mrf.mxu1 }
 0x1d8   : > { %2604 = vmatpush.bf16.msrb.mxu2 %v5385_v16 }
 0x1d9   : > { %v2017_v56 = vadd.f32 %v2016_v54, %v2004_v53  ;;  %2567 = vmatpush.bf16.msra.mxu3 %v5429_v25  ;;  %v6309_v54 = vld [vmem:[%s7414_s0 + $0x1b4] sm:$0xf] }
 0x1da   : > { %v5449_v57 = vor.u32 %v6309_v54, %v5446_v55  ;;  %v5886_v54 = vld [vmem:[%s7422_s28 + $0x2d0] sm:$0xf0]  ;;  %v5892_v55 = vld [vmem:[%s7422_s28 + $0x2a8] sm:$0xf] }
 0x1db   : > { %v2125_v0 = vmax.f32 %v2017_v56, 0.0 }
 0x1dc   : > { %2605 = vmatpush.bf16.msrb.mxu2 %v5377_v20 }
 0x1dd   : > { %v2129_v4 = vpack.c.bf16 %v2125_v0, %v2125_v0  ;;  %2568 = vmatpush.bf16.msra.mxu3 %v5421_v32  ;;  %v5430_v0 = vld [vmem:[%s7414_s0 + $0x198] sm:$0xf0]  ;;  %v6324_v32 = vld [vmem:[%s7891_s27 + $0x28] sm:$0xff] }
 0x1de   : > { %v2005_v10 = vpop.f32.mrf.mxu2  ;;  %v5433_v3 = vor.u32 %v6305_v63, %v5430_v0  ;;  %2764 = vmatpush.bf16.msra.mxu0 %v6324_v32  ;;  %v6413_v0 = vld [vmem:[%s7422_s28 + $0x26c] sm:$0xf0]  ;;  %v6383_v32 = vld [vmem:[%s7422_s28 + $0x184] sm:$0xf] }
 0x1df   : > { %2543 = vmatmul.bf16.vlgmr.msra.gmra.mxu1 %v2129_v4  ;;  %v2018_v15 = vpop.f32.mrf.mxu3 }
 0x1e0   : > { %2606 = vmatpush.bf16.msrb.mxu2 %v5369_v27  ;;  %2775 = vmatpush.bf16.msra.mxu1 %v6334_v35 }
 0x1e1   : > { %2613 = vmatpush.bf16.msrb.mxu3 %v5481_v36  ;;  %v6322_v36 = vld [vmem:[%s7891_s27 + $0x18] sm:$0xff] }
 0x1e2   : > { %2765 = vmatpush.bf16.msra.mxu0 %v6323_v34 }
 0x1e4   : > { %2607 = vmatpush.bf16.msrb.mxu2 %v5361_v33  ;;  %2776 = vmatpush.bf16.msra.mxu1 %v6333_v39  ;;  %v6384_v39 = vld [vmem:[%s7422_s28 + $0x18c] sm:$0xf] }
 0x1e5   : > { %2614 = vmatpush.bf16.msrb.mxu3 %v5473_v41  ;;  %v6332_v41 = vld [vmem:[%s7891_s27 + $0x68] sm:$0xff] }
 0x1e6   : > { %2766 = vmatpush.bf16.msra.mxu0 %v6322_v36  ;;  %v5742_v36 = vld [vmem:[%s7422_s28 + $0x1b0] sm:$0xf0] }
 0x1e8   : > { %2777 = vmatpush.bf16.msra.mxu1 %v6332_v41 }
 0x1e9   : > { %2615 = vmatpush.bf16.msrb.mxu3 %v5465_v44 }
 0x1ea   : > { %2767 = vmatpush.bf16.msra.mxu0 %v6321_v38  ;;  %v6390_v38 = vld [vmem:[%s7422_s28 + $0x1b4] sm:$0xf0] }
 0x1ed   : > { %2616 = vmatpush.bf16.msrb.mxu3 %v5457_v51  ;;  %v6419_v51 = vld [vmem:[%s7422_s28 + $0x2a4] sm:$0xf] }
 0x1ee   : > { %v2029_v40 = vpop.f32.mrf.mxu0  ;;  %v5889_v58 = vor.u32 %v6419_v51, %v5886_v54  ;;  %v6372_v51 = vld [vmem:[%s7422_s28 + $0x12c] sm:$0xf] }
 0x1ef   : > { %2595 = vmatmul.bf16.vlgmr.msrb.gmra.mxu1 %v2129_v4  ;;  %v2030_v2 = vadd.f32 %v2029_v40, %v1270_v37  ;;  %v2042_v42 = vpop.f32.mrf.mxu1  ;;  %v6303_v4 = vld [vmem:[%s7414_s0 + $0x184] sm:$0xf] }
 0x1f0   : > { %v5425_v7 = vor.u32 %v6303_v4, %v5422_v6  ;;  %v6320_v40 = vld [vmem:[%s7891_s27 + $0x8] sm:$0xff]  ;;  %v5838_v4 = vld [vmem:[%s7422_s28 + $0x270] sm:$0xf0] }
 0x1f1   : > { %v2043_v43 = vadd.f32 %v2042_v42, %v2030_v2  ;;  %2617 = vmatpush.bf16.msrb.mxu3 %v5449_v57  ;;  %2768 = vmatpush.bf16.msra.mxu0 %v6320_v40  ;;  %v6319_v42 = vld [vmem:[%s7891_s27] sm:$0xff] }
 0x1f2   : > { %v5750_v40 = vld [vmem:[%s7422_s28 + $0x1b8] sm:$0xf0] }
 0x1f5   : > { %2618 = vmatpush.bf16.msrb.mxu3 %v5441_v62  ;;  %2769 = vmatpush.bf16.msra.mxu0 %v6319_v42  ;;  %v5836_v62 = vld [vmem:[%s7422_s28 + $0x240] sm:$0xf]  ;;  %v5745_v42 = vor.u32 %v6383_v32, %v5742_v36  ;;  %v5558_v32 = vld [vmem:[%s7422_s28 + $0x38] sm:$0xf0]  ;;  %v6421_v36 = vld [vmem:[%s7422_s28 + $0x2b4] sm:$0xf] }
 0x1f6   : > { %v2055_v5 = vpop.f32.mrf.mxu2  ;;  %v2031_v50 = vpop.f32.mrf.mxu0  ;;  %v5837_v6 = vor.u32 %v6413_v0, %v5836_v62  ;;  %v5652_v62 = vld [vmem:[%s7422_s28 + $0xc8] sm:$0xf]  ;;  %v6360_v0 = vld [vmem:[%s7422_s28 + $0xcc] sm:$0xf] }
 0x1f7   : > { %v2056_v45 = vadd.f32 %v2055_v5, %v2043_v43  ;;  %v2068_v46 = vpop.f32.mrf.mxu3  ;;  %v2044_v52 = vpop.f32.mrf.mxu1  ;;  %v6331_v43 = vld [vmem:[%s7891_s27 + $0x60] sm:$0xff]  ;;  %v6328_v5 = vld [vmem:[%s7891_s27 + $0x48] sm:$0xff]  ;;  %v6425_v50 = vld [vmem:[%s7422_s28 + $0x2cc] sm:$0xf0] }
 0x1f8   : > { %2778 = vmatpush.bf16.msra.mxu1 %v6331_v43 }
 0x1f9   : > { %v2069_v49 = vadd.f32 %v2068_v46, %v2056_v45  ;;  %2619 = vmatpush.bf16.msrb.mxu3 %v5433_v3  ;;  %v7916_v45 = vld [vmem:[%s1096_s10] sm:$0x3]  ;;  %v6407_v3 = vld [vmem:[%s7422_s28 + $0x244] sm:$0xf] }
 0x1fa   : > { %v2198_v48 = vperm.slane %v7916_v45, 0 }
 0x1fb   : > { %v2126_v53 = vmax.f32 %v2069_v49, 0.0  ;;  %v5884_v49 = vld [vmem:[%s7422_s28 + $0x2a0] sm:$0xf] }
 0x1fc   : > { %2779 = vmatpush.bf16.msra.mxu1 %v6330_v8  ;;  %v5692_v8 = vld [vmem:[%s7422_s28 + $0x120] sm:$0xf] }
 0x1fd   : > { %v2130_v56 = vpack.c.bf16 %v2126_v53, %v2126_v53  ;;  %2620 = vmatpush.bf16.msrb.mxu3 %v5425_v7  ;;  %v5885_v53 = vor.u32 %v6425_v50, %v5884_v49  ;;  %v5841_v7 = vor.u32 %v6407_v3, %v5838_v4  ;;  %v5700_v49 = vld [vmem:[%s7422_s28 + $0x128] sm:$0xf]  ;;  %v6378_v50 = vld [vmem:[%s7422_s28 + $0x154] sm:$0xf0]  ;;  %v5654_v3 = vld [vmem:[%s7422_s28 + $0xf8] sm:$0xf0] }
 0x1fe   : > { %v2057_v60 = vpop.f32.mrf.mxu2 }
 0x1ff   : > { %2556 = vmatmul.bf16.vlgmr.msra.gmra.mxu2 %v2130_v56  ;;  %v2070_v61 = vpop.f32.mrf.mxu3  ;;  %v6420_v60 = vld [vmem:[%s7422_s28 + $0x2ac] sm:$0xf] }
 0x200   : > { %2780 = vmatpush.bf16.msra.mxu1 %v6329_v1  ;;  %v5894_v61 = vld [vmem:[%s7422_s28 + $0x2d8] sm:$0xf0]  ;;  %3394 = vmatpush.bf16.msra.mxu2 %v5885_v53  ;;  %v6377_v1 = vld [vmem:[%s7422_s28 + $0x14c] sm:$0xf0]  ;;  %v2199_v53 = vperm.slane %v7916_v45, 1 }
 0x201   : > { %v5897_v63 = vor.u32 %v6420_v60, %v5894_v61  ;;  %v5693_v54 = vor.u32 %v6377_v1, %v5692_v8  ;;  %v6359_v60 = vld [vmem:[%s7422_s28 + $0xc4] sm:$0xf]  ;;  %v5646_v45 = vld [vmem:[%s7422_s28 + $0xf0] sm:$0xf0]  ;;  %v5910_v8 = vld [vmem:[%s7422_s28 + $0x2e8] sm:$0xf0] }
 0x204   : > { %2781 = vmatpush.bf16.msra.mxu1 %v6328_v5  ;;  %3395 = vmatpush.bf16.msra.mxu2 %v5837_v6 }
 0x208   : > { %2782 = vmatpush.bf16.msra.mxu1 %v6327_v47  ;;  %v5753_v47 = vor.u32 %v6384_v39, %v5750_v40  ;;  %v5908_v40 = vld [vmem:[%s7422_s28 + $0x2b8] sm:$0xf] }
 0x20c   : > { %3433 = vmatpush.bf16.msrb.mxu1 %v5897_v63  ;;  %v6366_v63 = vld [vmem:[%s7422_s28 + $0xf4] sm:$0xf0] }
 0x20e   : > { %v2081_v10 = vpop.f32.mrf.mxu0 }
 0x20f   : > { %v2082_v11 = vadd.f32 %v2081_v10, %v1271_v9  ;;  %v2094_v12 = vpop.f32.mrf.mxu1  ;;  %2608 = vmatmul.bf16.vlgmr.msrb.gmra.mxu2 %v2130_v56  ;;  %v6426_v56 = vld [vmem:[%s7422_s28 + $0x2d4] sm:$0xf0]  ;;  %v5844_v9 = vld [vmem:[%s7422_s28 + $0x248] sm:$0xf] }
 0x210   : > { %v5893_v59 = vor.u32 %v6426_v56, %v5892_v55  ;;  %v6414_v10 = vld [vmem:[%s7422_s28 + $0x274] sm:$0xf0] }
 0x211   : > { %v2095_v13 = vadd.f32 %v2094_v12, %v2082_v11  ;;  %v6408_v11 = vld [vmem:[%s7422_s28 + $0x24c] sm:$0xf] }
 0x212   : > { %3420 = vmatpush.bf16.msrb.mxu0 %v5893_v59  ;;  %v6365_v59 = vld [vmem:[%s7422_s28 + $0xec] sm:$0xf0] }
 0x216   : > { %v2107_v14 = vpop.f32.mrf.mxu2  ;;  %v2083_v17 = vpop.f32.mrf.mxu0 }
 0x217   : > { %v2108_v15 = vadd.f32 %v2107_v14, %v2095_v13  ;;  %v2120_v16 = vpop.f32.mrf.mxu3  ;;  %v2096_v18 = vpop.f32.mrf.mxu1  ;;  %v5845_v13 = vor.u32 %v6414_v10, %v5844_v9  ;;  %v5846_v14 = vld [vmem:[%s7422_s28 + $0x278] sm:$0xf0]  ;;  %v5653_v9 = vor.u32 %v6366_v63, %v5652_v62  ;;  %v5596_v10 = vld [vmem:[%s7422_s28 + $0x60] sm:$0xf]  ;;  %v5804_v62 = vld [vmem:[%s7422_s28 + $0x1f0] sm:$0xf] }
 0x218   : > { %v5849_v17 = vor.u32 %v6408_v11, %v5846_v14  ;;  %v6395_v18 = vld [vmem:[%s7422_s28 + $0x1e4] sm:$0xf]  ;;  %v6353_v11 = vld [vmem:[%s7422_s28 + $0x8c] sm:$0xf0]  ;;  %v5657_v14 = vor.u32 %v6360_v0, %v5654_v3  ;;  %v6403_v63 = vld [vmem:[%s7422_s28 + $0x21c] sm:$0xf0] }
 0x219   : > { %v2121_v19 = vadd.f32 %v2120_v16, %v2108_v15  ;;  %v5788_v15 = vld [vmem:[%s7422_s28 + $0x1e0] sm:$0xf]  ;;  %v6401_v16 = vld [vmem:[%s7422_s28 + $0x20c] sm:$0xf0]  ;;  %3421 = vmatpush.bf16.msrb.mxu0 %v5845_v13  ;;  %v6397_v0 = vld [vmem:[%s7422_s28 + $0x1f4] sm:$0xf]  ;;  %v5805_v3 = vor.u32 %v6403_v63, %v5804_v62 }
 0x21a   : > { %3434 = vmatpush.bf16.msrb.mxu1 %v5849_v17  ;;  %v6348_v17 = vld [vmem:[%s7422_s28 + $0x6c] sm:$0xf]  ;;  %v5566_v62 = vld [vmem:[%s7422_s28 + $0x40] sm:$0xf0]  ;;  %v5572_v63 = vld [vmem:[%s7422_s28 + $0x18] sm:$0xf] }
 0x21b   : > { %v2127_v20 = vmax.f32 %v2121_v19, 0.0  ;;  %v5790_v19 = vld [vmem:[%s7422_s28 + $0x210] sm:$0xf0] }
 0x21d   : > { %v2131_v21 = vpack.c.bf16 %v2127_v20, %v2127_v20  ;;  %v5796_v20 = vld [vmem:[%s7422_s28 + $0x1e8] sm:$0xf] }
 0x21e   : > { %v2109_v22 = vpop.f32.mrf.mxu2 }
 0x21f   : > { %v2122_v23 = vpop.f32.mrf.mxu3  ;;  %2569 = vmatmul.bf16.vlgmr.msra.gmra.mxu3 %v2131_v21  ;;  %v5789_v22 = vor.u32 %v6401_v16, %v5788_v15  ;;  %v5598_v15 = vld [vmem:[%s7422_s28 + $0x90] sm:$0xf0]  ;;  %v6354_v16 = vld [vmem:[%s7422_s28 + $0x94] sm:$0xf0] }
 0x220   : > { %3407 = vmatpush.bf16.msra.mxu3 %v5889_v58  ;;  %v6402_v23 = vld [vmem:[%s7422_s28 + $0x214] sm:$0xf0]  ;;  %v5644_v58 = vld [vmem:[%s7422_s28 + $0xc0] sm:$0xf] }
 0x221   : > { %v5797_v29 = vor.u32 %v6402_v23, %v5796_v20  ;;  %3396 = vmatpush.bf16.msra.mxu2 %v5789_v22  ;;  %v5645_v6 = vor.u32 %v6365_v59, %v5644_v58  ;;  %v5597_v20 = vor.u32 %v6353_v11, %v5596_v10  ;;  %v6341_v22 = vld [vmem:[%s7422_s28 + $0x2c] sm:$0xf0]  ;;  %v5862_v58 = vld [vmem:[%s7422_s28 + $0x288] sm:$0xf0]  ;;  %v6398_v11 = vld [vmem:[%s7422_s28 + $0x1fc] sm:$0xf] }
 0x223   : > { %3422 = vmatpush.bf16.msrb.mxu0 %v5797_v29 }
 0x224   : > { %3408 = vmatpush.bf16.msra.mxu3 %v5841_v7  ;;  %v5649_v7 = vor.u32 %v6359_v60, %v5646_v45 }
 0x22f   : > { %2621 = vmatmul.bf16.vlgmr.msrb.gmra.mxu3 %v2131_v21 }
 0x23d   : > { %v2531_v26 = vpop.f32.mrf.mxu0 }
 0x23e   : > { %v2532_v52 = vadd.f32 %v2531_v26, %v2198_v48  ;;  %v6396_v26 = vld [vmem:[%s7422_s28 + $0x1ec] sm:$0xf]  ;;  %v5694_v48 = vld [vmem:[%s7422_s28 + $0x150] sm:$0xf0] }
 0x245   : > { %v2533_v24 = vpop.f32.mrf.mxu0 }
 0x246   : > { %v5798_v24 = vld [vmem:[%s7422_s28 + $0x218] sm:$0xf0] }
 0x247   : > { %v5801_v35 = vor.u32 %v6396_v26, %v5798_v24 }
 0x249   : > { %3435 = vmatpush.bf16.msrb.mxu1 %v5801_v35  ;;  %v6427_v35 = vld [vmem:[%s7422_s28 + $0x2dc] sm:$0xf0] }
 0x24d   : > { %3436 = vmatpush.bf16.msrb.mxu1 %v5753_v47 }
 0x24e   : > { %v7883_v25 = vpop.f32.mrf.mxu0 }
 0x24f   : > { %v2584_v4 = vadd.f32 %v7883_v25, %v2199_v53  ;;  %v5604_v25 = vld [vmem:[%s7422_s28 + $0x68] sm:$0xf]  ;;  %v5854_v53 = vld [vmem:[%s7422_s28 + $0x280] sm:$0xf0] }
 0x250   : > { %v5605_v24 = vor.u32 %v6354_v16, %v5604_v25  ;;  %v6385_v25 = vld [vmem:[%s7422_s28 + $0x194] sm:$0xf]  ;;  %v5758_v16 = vld [vmem:[%s7422_s28 + $0x1c0] sm:$0xf0] }
 0x256   : > { %v2585_v27 = vpop.f32.mrf.mxu0 }
 0x25c   : > { %v7886_v28 = vpop.f32.mrf.mxu1 }
 0x25d   : > { %v2545_v12 = vadd.f32 %v7886_v28, %v2532_v52  ;;  %v5793_v28 = vor.u32 %v6395_v18, %v5790_v19  ;;  %v5702_v52 = vld [vmem:[%s7422_s28 + $0x158] sm:$0xf0] }
 0x25e   : > { %v5705_v61 = vor.u32 %v6372_v51, %v5702_v52  ;;  %v5606_v18 = vld [vmem:[%s7422_s28 + $0x98] sm:$0xf0]  ;;  %v6409_v51 = vld [vmem:[%s7422_s28 + $0x254] sm:$0xf] }
 0x25f   : > { %3409 = vmatpush.bf16.msra.mxu3 %v5793_v28  ;;  %v6342_v28 = vld [vmem:[%s7422_s28 + $0x34] sm:$0xf0]  ;;  %v5857_v60 = vor.u32 %v6409_v51, %v5854_v53  ;;  %v5614_v51 = vld [vmem:[%s7422_s28 + $0xa0] sm:$0xf0]  ;;  %v6356_v53 = vld [vmem:[%s7422_s28 + $0xa4] sm:$0xf0] }
 0x260   : > { %3437 = vmatpush.bf16.msrb.mxu1 %v5705_v61 }
 0x263   : > { %3410 = vmatpush.bf16.msra.mxu3 %v5745_v42 }
 0x264   : > { %v2546_v30 = vpop.f32.mrf.mxu1  ;;  %3438 = vmatpush.bf16.msrb.mxu1 %v5657_v14 }
 0x265   : > { %v5740_v30 = vld [vmem:[%s7422_s28 + $0x180] sm:$0xf] }
 0x26c   : > { %v7896_v33 = vpop.f32.mrf.mxu1 }
 0x26d   : > { %v2597_v13 = vadd.f32 %v7896_v33, %v2584_v4  ;;  %v6335_v33 = vld [vmem:[%s7422_s28 + $0x4] sm:$0xf] }
 0x26e   : > { %v5806_v4 = vld [vmem:[%s7422_s28 + $0x220] sm:$0xf0] }
 0x274   : > { %v2598_v37 = vpop.f32.mrf.mxu1 }
 0x275   : > { %v5748_v37 = vld [vmem:[%s7422_s28 + $0x188] sm:$0xf] }
 0x276   : > { %v5749_v43 = vor.u32 %v6390_v38, %v5748_v37  ;;  %v5902_v37 = vld [vmem:[%s7422_s28 + $0x2e0] sm:$0xf0] }
 0x277   : > { %v5905_v47 = vor.u32 %v6421_v36, %v5902_v37  ;;  %v5660_v36 = vld [vmem:[%s7422_s28 + $0xd0] sm:$0xf] }
 0x278   : > { %3423 = vmatpush.bf16.msrb.mxu0 %v5749_v43  ;;  %v6422_v43 = vld [vmem:[%s7422_s28 + $0x2bc] sm:$0xf] }
 0x279   : > { %v5913_v52 = vor.u32 %v6422_v43, %v5910_v8  ;;  %v6368_v43 = vld [vmem:[%s7422_s28 + $0x104] sm:$0xf0]  ;;  %v6362_v8 = vld [vmem:[%s7422_s28 + $0xdc] sm:$0xf] }
 0x282   : > { %v2557_v2 = vpop.f32.mrf.mxu2 }
 0x283   : > { %v2558_v21 = vadd.f32 %v2557_v2, %v2545_v12  ;;  %v5741_v2 = vor.u32 %v6389_v31, %v5740_v30  ;;  %v6347_v12 = vld [vmem:[%s7422_s28 + $0x64] sm:$0xf]  ;;  %v5609_v30 = vor.u32 %v6348_v17, %v5606_v18  ;;  %v6336_v31 = vld [vmem:[%s7422_s28 + $0xc] sm:$0xf]  ;;  %v5761_v18 = vor.u32 %v6385_v25, %v5758_v16  ;;  %v5916_v25 = vld [vmem:[%s7422_s28 + $0x2c0] sm:$0xf] }
 0x284   : > { %v5601_v26 = vor.u32 %v6347_v12, %v5598_v15  ;;  %v5814_v12 = vld [vmem:[%s7422_s28 + $0x228] sm:$0xf0]  ;;  %v6391_v15 = vld [vmem:[%s7422_s28 + $0x1bc] sm:$0xf0]  ;;  %v6429_v16 = vld [vmem:[%s7422_s28 + $0x2ec] sm:$0xf0] }
 0x285   : > { %3397 = vmatpush.bf16.msra.mxu2 %v5741_v2  ;;  %3439 = vmatpush.bf16.msrb.mxu1 %v5609_v30  ;;  %v5817_v14 = vor.u32 %v6398_v11, %v5814_v12  ;;  %v6380_v30 = vld [vmem:[%s7422_s28 + $0x164] sm:$0xf0]  ;;  %v6584_v12 = vld [vmem:[%s1104_s24] ss:$0 sm:$0xff] }
 0x289   : > { %3398 = vmatpush.bf16.msra.mxu2 %v5693_v54  ;;  %v5860_v54 = vld [vmem:[%s7422_s28 + $0x258] sm:$0xf] }
 0x28a   : > { %v2559_v44 = vpop.f32.mrf.mxu2 }
 0x28b   : > { %v6371_v44 = vld [vmem:[%s7422_s28 + $0x124] sm:$0xf] }
 0x28c   : > { %v5697_v56 = vor.u32 %v6371_v44, %v5694_v48  ;;  %v5561_v44 = vor.u32 %v6336_v31, %v5558_v32 }
 0x28d   : > { %3399 = vmatpush.bf16.msra.mxu2 %v5645_v6  ;;  %v5812_v6 = vld [vmem:[%s7422_s28 + $0x1f8] sm:$0xf] }
 0x28e   : > { %3411 = vmatpush.bf16.msra.mxu3 %v5697_v56  ;;  %3440 = vmatpush.bf16.msrb.mxu1 %v5561_v44  ;;  %v5670_v44 = vld [vmem:[%s7422_s28 + $0x108] sm:$0xf0] }
 0x291   : > { %3400 = vmatpush.bf16.msra.mxu2 %v5597_v20  ;;  %v6392_v20 = vld [vmem:[%s7422_s28 + $0x1c4] sm:$0xf0] }
 0x292   : > { %v7918_v46 = vpop.f32.mrf.mxu2  ;;  %3412 = vmatpush.bf16.msra.mxu3 %v5649_v7  ;;  %v6404_v7 = vld [vmem:[%s7422_s28 + $0x224] sm:$0xf0] }
 0x293   : > { %v2610_v19 = vadd.f32 %v7918_v46, %v2597_v13  ;;  %v5556_v46 = vld [vmem:[%s7422_s28 + $0x8] sm:$0xf]  ;;  %v5813_v10 = vor.u32 %v6404_v7, %v5812_v6  ;;  %v5756_v13 = vld [vmem:[%s7422_s28 + $0x190] sm:$0xf]  ;;  %v6338_v6 = vld [vmem:[%s7422_s28 + $0x1c] sm:$0xf] }
 0x294   : > { %v5557_v42 = vor.u32 %v6342_v28, %v5556_v46  ;;  %v5757_v17 = vor.u32 %v6391_v15, %v5756_v13  ;;  %v5710_v28 = vld [vmem:[%s7422_s28 + $0x160] sm:$0xf0]  ;;  %v5574_v7 = vld [vmem:[%s7422_s28 + $0x48] sm:$0xf0] }
 0x296   : > { %3413 = vmatpush.bf16.msra.mxu3 %v5601_v26  ;;  %v5708_v26 = vld [vmem:[%s7422_s28 + $0x130] sm:$0xf] }
 0x29a   : > { %v2611_v57 = vpop.f32.mrf.mxu2 }
 0x29b   : > { %v5701_v57 = vor.u32 %v6378_v50, %v5700_v49  ;;  %v5852_v49 = vld [vmem:[%s7422_s28 + $0x250] sm:$0xf]  ;;  %v6415_v50 = vld [vmem:[%s7422_s28 + $0x27c] sm:$0xf0] }
 0x29c   : > { %v5853_v59 = vor.u32 %v6415_v50, %v5852_v49  ;;  %v6349_v49 = vld [vmem:[%s7422_s28 + $0x74] sm:$0xf] }
 0x29d   : > { %3424 = vmatpush.bf16.msrb.mxu0 %v5701_v57  ;;  %v6410_v57 = vld [vmem:[%s7422_s28 + $0x25c] sm:$0xf] }
 0x29e   : > { %v5865_v45 = vor.u32 %v6410_v57, %v5862_v58  ;;  %v5622_v57 = vld [vmem:[%s7422_s28 + $0xa8] sm:$0xf0] }
 0x2a1   : > { %3425 = vmatpush.bf16.msrb.mxu0 %v5653_v9  ;;  %v5809_v9 = vor.u32 %v6397_v0, %v5806_v4  ;;  %v6344_v0 = vld [vmem:[%s7422_s28 + $0x44] sm:$0xf0] }
 0x2a2   : > { %v2570_v27 = vpop.f32.mrf.mxu3  ;;  %v5573_v4 = vor.u32 %v6344_v0, %v5572_v63 }
 0x2a3   : > { %v2571_v34 = vadd.f32 %v2570_v27, %v2558_v21  ;;  %v5548_v21 = vld [vmem:[%s7422_s28] sm:$0xf]  ;;  %v5550_v27 = vld [vmem:[%s7422_s28 + $0x30] sm:$0xf0] }
 0x2a4   : > { %v5549_v39 = vor.u32 %v6341_v22, %v5548_v21  ;;  %v5553_v2 = vor.u32 %v6335_v33, %v5550_v27  ;;  %v6386_v21 = vld [vmem:[%s7422_s28 + $0x19c] sm:$0xf]  ;;  %v5766_v33 = vld [vmem:[%s7422_s28 + $0x1c8] sm:$0xf0]  ;;  %v6373_v27 = vld [vmem:[%s7422_s28 + $0x134] sm:$0xf] }
 0x2a5   : > { %v2626_v41 = vmax.f32 %v2571_v34, 0.0  ;;  %v5900_v34 = vld [vmem:[%s7422_s28 + $0x2b0] sm:$0xf]  ;;  %3426 = vmatpush.bf16.msrb.mxu0 %v5605_v24  ;;  %v6379_v24 = vld [vmem:[%s7422_s28 + $0x15c] sm:$0xf0]  ;;  %v5713_v31 = vor.u32 %v6373_v27, %v5710_v28 }
 0x2a6   : > { %3401 = vmatpush.bf16.msra.mxu2 %v5549_v39  ;;  %3414 = vmatpush.bf16.msra.mxu3 %v5553_v2  ;;  %v5709_v46 = vor.u32 %v6379_v24, %v5708_v26  ;;  %v6361_v39 = vld [vmem:[%s7422_s28 + $0xd4] sm:$0xf]  ;;  %v5917_v26 = vor.u32 %v6429_v16, %v5916_v25  ;;  %v5868_v27 = vld [vmem:[%s7422_s28 + $0x260] sm:$0xf]  ;;  %v6363_v16 = vld [vmem:[%s7422_s28 + $0xe4] sm:$0xf] }
 0x2a7   : > { %v2628_v5 = vpack.c.bf16 %v2626_v41, %v2626_v41  ;;  %v6428_v41 = vld [vmem:[%s7422_s28 + $0x2e4] sm:$0xf0] }
 0x2a8   : > { %v5909_v48 = vor.u32 %v6428_v41, %v5908_v40  ;;  %v5662_v40 = vld [vmem:[%s7422_s28 + $0x100] sm:$0xf0] }
 0x2a9   : > { %2770 = vmatmul.bf16.vlgmr.msra.gmra.mxu0 %v2628_v5  ;;  %v5901_v5 = vor.u32 %v6427_v35, %v5900_v34  ;;  %v6374_v34 = vld [vmem:[%s7422_s28 + $0x13c] sm:$0xf]  ;;  %v5718_v35 = vld [vmem:[%s7422_s28 + $0x168] sm:$0xf0]  ;;  %v5665_v2 = vor.u32 %v6361_v39, %v5662_v40  ;;  %v5820_v40 = vld [vmem:[%s7422_s28 + $0x200] sm:$0xf] }
 0x2aa   : > { %v2572_v55 = vpop.f32.mrf.mxu3  ;;  %3427 = vmatpush.bf16.msrb.mxu0 %v5557_v42  ;;  %3459 = vmatpush.bf16.msrb.mxu3 %v5905_v47  ;;  %v5721_v37 = vor.u32 %v6374_v34, %v5718_v35  ;;  %v5668_v42 = vld [vmem:[%s7422_s28 + $0xd8] sm:$0xf]  ;;  %v5612_v47 = vld [vmem:[%s7422_s28 + $0x70] sm:$0xf]  ;;  %v6412_v35 = vld [vmem:[%s7422_s28 + $0x26c] sm:$0xf] }
 0x2ab   : > { %v6416_v55 = vld [vmem:[%s7422_s28 + $0x284] sm:$0xf0]  ;;  %3446 = vmatpush.bf16.msrb.mxu2 %v5901_v5  ;;  %v5673_v5 = vor.u32 %v6362_v8, %v5670_v44  ;;  %v6418_v34 = vld [vmem:[%s7422_s28 + $0x294] sm:$0xf0]  ;;  %v5822_v8 = vld [vmem:[%s7422_s28 + $0x230] sm:$0xf0] }
 0x2ac   : > { %v5861_v61 = vor.u32 %v6416_v55, %v5860_v54  ;;  %v5617_v54 = vor.u32 %v6349_v49, %v5614_v51  ;;  %v6406_v44 = vld [vmem:[%s7422_s28 + $0x234] sm:$0xf0]  ;;  %v6393_v51 = vld [vmem:[%s7422_s28 + $0x1cc] sm:$0xf0] }
 0x2ae   : > { %3472 = vmatpush.bf16.msra.mxu0 %v5909_v48  ;;  %3460 = vmatpush.bf16.msrb.mxu3 %v5857_v60  ;;  %v6355_v48 = vld [vmem:[%s7422_s28 + $0x9c] sm:$0xf0] }
 0x2af   : > { %3447 = vmatpush.bf16.msrb.mxu2 %v5853_v59  ;;  %v5613_v50 = vor.u32 %v6355_v48, %v5612_v47  ;;  %v5564_v59 = vld [vmem:[%s7422_s28 + $0x10] sm:$0xf]  ;;  %v6343_v60 = vld [vmem:[%s7422_s28 + $0x3c] sm:$0xf0]  ;;  %v5830_v47 = vld [vmem:[%s7422_s28 + $0x238] sm:$0xf0] }
 0x2b2   : > { %v2622_v23 = vpop.f32.mrf.mxu3  ;;  %3473 = vmatpush.bf16.msra.mxu0 %v5861_v61  ;;  %3461 = vmatpush.bf16.msrb.mxu3 %v5809_v9  ;;  %v6337_v61 = vld [vmem:[%s7422_s28 + $0x14] sm:$0xf]  ;;  %v5577_v9 = vor.u32 %v6338_v6, %v5574_v7  ;;  %v5732_v6 = vld [vmem:[%s7422_s28 + $0x148] sm:$0xf]  ;;  %v6382_v7 = vld [vmem:[%s7422_s28 + $0x174] sm:$0xf0] }
 0x2b3   : > { %v2623_v29 = vadd.f32 %v2622_v23, %v2610_v19  ;;  %3448 = vmatpush.bf16.msrb.mxu2 %v5805_v3  ;;  %v5764_v19 = vld [vmem:[%s7422_s28 + $0x198] sm:$0xf]  ;;  %v5769_v23 = vor.u32 %v6386_v21, %v5766_v33  ;;  %v5569_v3 = vor.u32 %v6337_v61, %v5566_v62  ;;  %v5926_v33 = vld [vmem:[%s7422_s28 + $0x2f8] sm:$0xf0]  ;;  %v6381_v62 = vld [vmem:[%s7422_s28 + $0x16c] sm:$0xf0] }
 0x2b4   : > { %v5765_v22 = vor.u32 %v6392_v20, %v5764_v19  ;;  %v5924_v19 = vld [vmem:[%s7422_s28 + $0x2c8] sm:$0xf]  ;;  %v6430_v20 = vld [vmem:[%s7422_s28 + $0x2f4] sm:$0xf0] }
 0x2b5   : > { %v2627_v38 = vmax.f32 %v2623_v29, 0.0  ;;  %v5716_v29 = vld [vmem:[%s7422_s28 + $0x138] sm:$0xf]  ;;  %v5925_v28 = vor.u32 %v6430_v20, %v5924_v19  ;;  %v6364_v20 = vld [vmem:[%s7422_s28 + $0xec] sm:$0xf] }
 0x2b6   : > { %3474 = vmatpush.bf16.msra.mxu0 %v5813_v10  ;;  %3462 = vmatpush.bf16.msrb.mxu3 %v5761_v18  ;;  %v5717_v32 = vor.u32 %v6380_v30, %v5716_v29  ;;  %v5918_v18 = vld [vmem:[%s7422_s28 + $0x2f0] sm:$0xf0]  ;;  %v6411_v30 = vld [vmem:[%s7422_s28 + $0x264] sm:$0xf]  ;;  %v6370_v19 = vld [vmem:[%s7422_s28 + $0x114] sm:$0xf0] }
 0x2b7   : > { %v2629_v1 = vpack.c.bf16 %v2627_v38, %v2627_v38  ;;  %3449 = vmatpush.bf16.msrb.mxu2 %v5757_v17  ;;  %v6367_v38 = vld [vmem:[%s7422_s28 + $0xfc] sm:$0xf0]  ;;  %v6423_v17 = vld [vmem:[%s7422_s28 + $0x2c4] sm:$0xf] }
 0x2b8   : > { %v5661_v41 = vor.u32 %v6367_v38, %v5660_v36  ;;  %v5921_v24 = vor.u32 %v6423_v17, %v5918_v18  ;;  %v5878_v36 = vld [vmem:[%s7422_s28 + $0x298] sm:$0xf0]  ;;  %v5678_v17 = vld [vmem:[%s7422_s28 + $0x110] sm:$0xf0]  ;;  %v5684_v18 = vld [vmem:[%s7422_s28 + $0xe8] sm:$0xf] }
 0x2b9   : > { %2783 = vmatmul.bf16.vlgmr.msra.gmra.mxu1 %v2629_v1  ;;  %v5669_v1 = vor.u32 %v6368_v43, %v5668_v42  ;;  %v5881_v42 = vor.u32 %v6412_v35, %v5878_v36  ;;  %v6399_v43 = vld [vmem:[%s7422_s28 + $0x204] sm:$0xf] }
 0x2ba   : > { %v2624_v56 = vpop.f32.mrf.mxu3  ;;  %3485 = vmatpush.bf16.msra.mxu1 %v5913_v52  ;;  %3475 = vmatpush.bf16.msra.mxu0 %v5765_v22  ;;  %v5620_v52 = vld [vmem:[%s7422_s28 + $0x78] sm:$0xf]  ;;  %v6424_v22 = vld [vmem:[%s7422_s28 + $0x2cc] sm:$0xf]  ;;  %v5825_v49 = vor.u32 %v6399_v43, %v5822_v8 }
 0x2bb   : > { %3450 = vmatpush.bf16.msrb.mxu2 %v5709_v46  ;;  %3463 = vmatpush.bf16.msrb.mxu3 %v5713_v31  ;;  %v5621_v55 = vor.u32 %v6356_v53, %v5620_v52  ;;  %v6350_v56 = vld [vmem:[%s7422_s28 + $0x7c] sm:$0xf]  ;;  %v6417_v46 = vld [vmem:[%s7422_s28 + $0x28c] sm:$0xf0]  ;;  %v5929_v29 = vor.u32 %v6424_v22, %v5926_v33  ;;  %v5870_v31 = vld [vmem:[%s7422_s28 + $0x290] sm:$0xf0]  ;;  %v5681_v33 = vor.u32 %v6363_v16, %v5678_v17 }
 0x2bc   : > { %v5625_v58 = vor.u32 %v6350_v56, %v5622_v57  ;;  %v5869_v38 = vor.u32 %v6417_v46, %v5868_v27  ;;  %v5873_v39 = vor.u32 %v6411_v30, %v5870_v31  ;;  %v5780_v56 = vld [vmem:[%s7422_s28 + $0x1a8] sm:$0xf]  ;;  %v6394_v57 = vld [vmem:[%s7422_s28 + $0x1d4] sm:$0xf0]  ;;  %v5685_v27 = vor.u32 %v6370_v19, %v5684_v18  ;;  %v6340_v8 = vld [vmem:[%s7422_s28 + $0x2c] sm:$0xf] }
 0x2bd   : > { %v5781_v63 = vor.u32 %v6394_v57, %v5780_v56  ;;  %v5636_v30 = vld [vmem:[%s7422_s28 + $0x88] sm:$0xf]  ;;  %v6358_v31 = vld [vmem:[%s7422_s28 + $0xb4] sm:$0xf0]  ;;  %v6024_v56 = vld [vmem:[%s7424_s20 + $0xb0] sm:$0xf] }
 0x2be   : > { %3486 = vmatpush.bf16.msra.mxu1 %v5865_v45  ;;  %3476 = vmatpush.bf16.msra.mxu0 %v5717_v32  ;;  %v5565_v45 = vor.u32 %v6343_v60, %v5564_v59  ;;  %v5876_v32 = vld [vmem:[%s7422_s28 + $0x268] sm:$0xf]  ;;  %v5782_v59 = vld [vmem:[%s7422_s28 + $0x1d8] sm:$0xf0]  ;;  %v6346_v43 = vld [vmem:[%s7422_s28 + $0x54] sm:$0xf0] }
 0x2bf   : > { %3451 = vmatpush.bf16.msrb.mxu2 %v5661_v41  ;;  %3464 = vmatpush.bf16.msrb.mxu3 %v5665_v2  ;;  %v6405_v41 = vld [vmem:[%s7422_s28 + $0x22c] sm:$0xf0]  ;;  %v5877_v2 = vor.u32 %v6418_v34, %v5876_v32  ;;  %v6352_v32 = vld [vmem:[%s7422_s28 + $0x8c] sm:$0xf]  ;;  %v5638_v34 = vld [vmem:[%s7422_s28 + $0xb8] sm:$0xf0] }
 0x2c0   : > { %v5821_v48 = vor.u32 %v6405_v41, %v5820_v40  ;;  %v5637_v40 = vor.u32 %v6358_v31, %v5636_v30  ;;  %v5641_v41 = vor.u32 %v6352_v32, %v5638_v34  ;;  %v6454_v57 = vld [vmem:[%s7424_s20 + $0xb8] sm:$0xf0]  ;;  %v5968_v19 = vld [vmem:[%s7424_s20 + $0x48] sm:$0xf]  ;;  %v6437_v32 = vld [vmem:[%s7424_s20 + $0x34] sm:$0xf] }
 0x2c1   : > { %v6442_v30 = vld [vmem:[%s7424_s20 + $0x58] sm:$0xf0]  ;;  %v5958_v34 = vld [vmem:[%s7424_s20 + $0x3c] sm:$0xf0] }
 0x2c2   : > { %3487 = vmatpush.bf16.msra.mxu1 %v5817_v14  ;;  %3477 = vmatpush.bf16.msra.mxu0 %v5669_v1  ;;  %v5828_v1 = vld [vmem:[%s7422_s28 + $0x208] sm:$0xf]  ;;  %v6438_v31 = vld [vmem:[%s7424_s20 + $0x38] sm:$0xf0] }
 0x2c3   : > { %3452 = vmatpush.bf16.msrb.mxu2 %v5613_v50  ;;  %3465 = vmatpush.bf16.msrb.mxu3 %v5617_v54  ;;  %v5772_v50 = vld [vmem:[%s7422_s28 + $0x1a0] sm:$0xf]  ;;  %v5829_v52 = vor.u32 %v6406_v44, %v5828_v1  ;;  %v6387_v54 = vld [vmem:[%s7422_s28 + $0x1a4] sm:$0xf]  ;;  %v5590_v1 = vld [vmem:[%s7422_s28 + $0x58] sm:$0xf0] }
 0x2c4   : > { %v5773_v60 = vor.u32 %v6393_v51, %v5772_v50  ;;  %v6016_v44 = vld [vmem:[%s7424_s20 + $0xa8] sm:$0xf] }
 0x2c6   : > { %3488 = vmatpush.bf16.msra.mxu1 %v5769_v23  ;;  %3478 = vmatpush.bf16.msra.mxu0 %v5621_v55  ;;  %v5774_v55 = vld [vmem:[%s7422_s28 + $0x1d0] sm:$0xf0] }
 0x2c7   : > { %3453 = vmatpush.bf16.msrb.mxu2 %v5565_v45  ;;  %3466 = vmatpush.bf16.msrb.mxu3 %v5569_v3  ;;  %v5777_v61 = vor.u32 %v6387_v54, %v5774_v55  ;;  %v5724_v45 = vld [vmem:[%s7422_s28 + $0x140] sm:$0xf]  ;;  %v6375_v3 = vld [vmem:[%s7422_s28 + $0x144] sm:$0xf]  ;;  %v6004_v55 = vld [vmem:[%s7424_s20 + $0x90] sm:$0xf] }
 0x2ca   : > { %3489 = vmatpush.bf16.msra.mxu1 %v5721_v37  ;;  %3479 = vmatpush.bf16.msra.mxu0 %v5573_v4  ;;  %v5726_v4 = vld [vmem:[%s7422_s28 + $0x170] sm:$0xf0] }
 0x2ce   : > { %3490 = vmatpush.bf16.msra.mxu1 %v5673_v5  ;;  %v6400_v5 = vld [vmem:[%s7422_s28 + $0x20c] sm:$0xf] }
 0x2cf   : > { %v5833_v53 = vor.u32 %v6400_v5, %v5830_v47  ;;  %v6453_v5 = vld [vmem:[%s7424_s20 + $0xb0] sm:$0xf0]  ;;  %v6452_v47 = vld [vmem:[%s7424_s20 + $0xac] sm:$0xf] }
 0x2d2   : > { %3491 = vmatpush.bf16.msra.mxu1 %v5625_v58  ;;  %v6388_v58 = vld [vmem:[%s7422_s28 + $0x1ac] sm:$0xf] }
 0x2d3   : > { %v5785_v0 = vor.u32 %v6388_v58, %v5782_v59  ;;  %v6450_v58 = vld [vmem:[%s7424_s20 + $0x98] sm:$0xf0]  ;;  %v6449_v59 = vld [vmem:[%s7424_s20 + $0x94] sm:$0xf] }
 0x2d6   : > { %3492 = vmatpush.bf16.msra.mxu1 %v5577_v9  ;;  %v6376_v9 = vld [vmem:[%s7422_s28 + $0x14c] sm:$0xf] }
 0x326   : > { %v2771_v10 = vpop.f32.mrf.mxu0 }
 0x327   : > { %v2772_v13 = vadd.f32 %v6584_v12, %v2771_v10  ;;  %v5734_v10 = vld [vmem:[%s7422_s28 + $0x178] sm:$0xf0]  ;;  %v5729_v12 = vor.u32 %v6375_v3, %v5726_v4  ;;  %v6451_v3 = vld [vmem:[%s7424_s20 + $0xa0] sm:$0xf0] }
 0x328   : > { %v5737_v25 = vor.u32 %v6376_v9, %v5734_v10  ;;  %v6447_v4 = vld [vmem:[%s7424_s20 + $0x80] sm:$0xf0] }
 0x32e   : > { %v2773_v11 = vpop.f32.mrf.mxu0 }
 0x32f   : > { %v5725_v11 = vor.u32 %v6381_v62, %v5724_v45  ;;  %v8152_v45 = vor.u32 %v6450_v58, %v6004_v55 }
 0x336   : > { %v2784_v14 = vpop.f32.mrf.mxu1 }
 0x337   : > { %v2785_v15 = vadd.f32 %v2784_v14, %v2772_v13  ;;  %v5676_v13 = vld [vmem:[%s7422_s28 + $0xe0] sm:$0xf]  ;;  %v6369_v14 = vld [vmem:[%s7422_s28 + $0x10c] sm:$0xf0] }
 0x338   : > { %v5677_v22 = vor.u32 %v6369_v14, %v5676_v13  ;;  %v6448_v13 = vld [vmem:[%s7424_s20 + $0x88] sm:$0xf0] }
 0x339   : > { %v2788_v21 = vmax.f32 %v2785_v15, 0.0  ;;  %v5733_v15 = vor.u32 %v6382_v7, %v5732_v6  ;;  %v6446_v6 = vld [vmem:[%s7424_s20 + $0x7c] sm:$0xf]  ;;  %v5994_v7 = vld [vmem:[%s7424_s20 + $0x84] sm:$0xf0] }
 0x33a   : > { %v6444_v14 = vld [vmem:[%s7424_s20 + $0x68] sm:$0xf0] }
 0x33b   : > { %v8068_v23 = vpack.c.bf16 %v2788_v21, %v2788_v21  ;;  %v5686_v21 = vld [vmem:[%s7422_s28 + $0x118] sm:$0xf0] }
 0x33c   : > { %v5689_v46 = vor.u32 %v6364_v20, %v5686_v21  ;;  %v5988_v20 = vld [vmem:[%s7424_s20 + $0x68] sm:$0xf]  ;;  %v6445_v21 = vld [vmem:[%s7424_s20 + $0x70] sm:$0xf0] }
 0x33d   : > { %3402 = vmatmul.bf16.vlgmr.msra.gmra.mxu2 %v8068_v23  ;;  %3415 = vmatmul.bf16.vlgmr.msra.gmra.mxu3 %v8068_v23 }
 0x33e   : > { %3428 = vmatmul.bf16.vlgmr.msrb.gmra.mxu0 %v8068_v23  ;;  %3441 = vmatmul.bf16.vlgmr.msrb.gmra.mxu1 %v8068_v23  ;;  %v2786_v37 = vpop.f32.mrf.mxu1 }
 0x33f   : > { %3498 = vmatpush.bf16.msra.mxu2 %v5917_v26  ;;  %3511 = vmatpush.bf16.msra.mxu3 %v5921_v24  ;;  %v5628_v26 = vld [vmem:[%s7422_s28 + $0x80] sm:$0xf]  ;;  %v6357_v24 = vld [vmem:[%s7422_s28 + $0xac] sm:$0xf0] }
 0x340   : > { %3524 = vmatpush.bf16.msrb.mxu0 %v5925_v28  ;;  %3537 = vmatpush.bf16.msrb.mxu1 %v5929_v29  ;;  %v6351_v28 = vld [vmem:[%s7422_s28 + $0x84] sm:$0xf]  ;;  %v5630_v29 = vld [vmem:[%s7422_s28 + $0xb0] sm:$0xf0]  ;;  %v5629_v35 = vor.u32 %v6357_v24, %v5628_v26  ;;  %v5580_v37 = vld [vmem:[%s7422_s28 + $0x20] sm:$0xf]  ;;  %v8199_v24 = vor.u32 %v6445_v21, %v5988_v20 }
 0x341   : > { %v5633_v36 = vor.u32 %v6351_v28, %v5630_v29  ;;  %v5970_v26 = vld [vmem:[%s7424_s20 + $0x54] sm:$0xf0]  ;;  %v5956_v28 = vld [vmem:[%s7424_s20 + $0x30] sm:$0xf] }
 0x342   : > { %v5976_v29 = vld [vmem:[%s7424_s20 + $0x50] sm:$0xf] }
 0x343   : > { %3499 = vmatpush.bf16.msra.mxu2 %v5869_v38  ;;  %3512 = vmatpush.bf16.msra.mxu3 %v5873_v39  ;;  %v6345_v38 = vld [vmem:[%s7422_s28 + $0x4c] sm:$0xf0]  ;;  %v6339_v39 = vld [vmem:[%s7422_s28 + $0x24] sm:$0xf] }
 0x344   : > { %3525 = vmatpush.bf16.msrb.mxu0 %v5877_v2  ;;  %3538 = vmatpush.bf16.msrb.mxu1 %v5881_v42  ;;  %v5582_v2 = vld [vmem:[%s7422_s28 + $0x50] sm:$0xf0]  ;;  %v5588_v42 = vld [vmem:[%s7422_s28 + $0x28] sm:$0xf]  ;;  %s6481_s28 = smul.u32 12, %s8561_s26 }
 0x345   : > { %v5585_v50 = vor.u32 %v6339_v39, %v5582_v2  ;;  %v5589_v51 = vor.u32 %v6346_v43, %v5588_v42  ;;  %v5964_v39 = vld [vmem:[%s7424_s20 + $0x38] sm:$0xf]  ;;  %v6434_v2 = vld [vmem:[%s7424_s20 + $0x1c] sm:$0xf]  ;;  %v5946_v42 = vld [vmem:[%s7424_s20 + $0x24] sm:$0xf0] }
 0x346   : > { %s1108_s4 = scalar_lea.vmem %s8552_s9, %s6481_s28  ;;  %s8414_s28 = scalar_lea.vmem %s8554_s2, %s6126_s22 }
 0x347   : > { %3500 = vmatpush.bf16.msra.mxu2 %v5821_v48  ;;  %3513 = vmatpush.bf16.msra.mxu3 %v5825_v49  ;;  %v6018_v48 = vld [vmem:[%s7424_s20 + $0xb4] sm:$0xf0]  ;;  %v5581_v49 = vor.u32 %v6345_v38, %v5580_v37  ;;  %v8222_v37 = vor.u32 %v6437_v32, %v5958_v34 }
 0x348   : > { %3526 = vmatpush.bf16.msrb.mxu0 %v5829_v52  ;;  %3539 = vmatpush.bf16.msrb.mxu1 %v5833_v53  ;;  %v5593_v52 = vor.u32 %v6340_v8, %v5590_v1  ;;  %v8138_v53 = vor.u32 %v6453_v5, %v6016_v44  ;;  %v8140_v54 = vor.u32 %v6452_v47, %v6018_v48  ;;  %v5944_v38 = vld [vmem:[%s7424_s20 + $0x18] sm:$0xf]  ;;  %v5932_v44 = vld [vmem:[%s7424_s20] sm:$0xf]  ;;  %v6436_v47 = vld [vmem:[%s7424_s20 + $0x28] sm:$0xf0] }
 0x349   : > { %v8238_v1 = vor.u32 %v6434_v2, %v5946_v42  ;;  %v5952_v5 = vld [vmem:[%s7424_s20 + $0x20] sm:$0xf]  ;;  %v6432_v48 = vld [vmem:[%s7424_s20 + $0x8] sm:$0xf0] }
 0x34b   : > { %3501 = vmatpush.bf16.msra.mxu2 %v5773_v60  ;;  %3514 = vmatpush.bf16.msra.mxu3 %v5777_v61  ;;  %v6006_v60 = vld [vmem:[%s7424_s20 + $0x9c] sm:$0xf0]  ;;  %v8148_v61 = vor.u32 %v6454_v57, %v6024_v56  ;;  %v5940_v56 = vld [vmem:[%s7424_s20 + $0x8] sm:$0xf]  ;;  %v6433_v57 = vld [vmem:[%s7424_s20 + $0x10] sm:$0xf0] }
 0x34c   : > { %3527 = vmatpush.bf16.msrb.mxu0 %v5781_v63  ;;  %3540 = vmatpush.bf16.msrb.mxu1 %v5785_v0  ;;  %v8154_v62 = vor.u32 %v6449_v59, %v6006_v60  ;;  %v5992_v63 = vld [vmem:[%s7424_s20 + $0x78] sm:$0xf]  ;;  %v8262_v58 = vor.u32 %v6433_v57, %v5940_v56  ;;  %v7029_v59 = vmov 0  }
 0x34d   : > { %3454 = vmatmul.bf16.vlgmr.msrb.gmra.mxu2 %v8068_v23  ;;  %3467 = vmatmul.bf16.vlgmr.msrb.gmra.mxu3 %v8068_v23  ;;  %v6012_v0 = vld [vmem:[%s7424_s20 + $0x98] sm:$0xf]  ;;  %v8172_v10 = vor.u32 %v6447_v4, %v5992_v63 }
 0x34e   : > { %3480 = vmatmul.bf16.vlgmr.msra.gmra.mxu0 %v8068_v23  ;;  %3493 = vmatmul.bf16.vlgmr.msra.gmra.mxu1 %v8068_v23  ;;  %v8167_v9 = vor.u32 %v6451_v3, %v6012_v0 }
 0x34f   : > { %3502 = vmatpush.bf16.msra.mxu2 %v5725_v11  ;;  %3515 = vmatpush.bf16.msra.mxu3 %v5729_v12  ;;  %v8174_v11 = vor.u32 %v6446_v6, %v5994_v7  ;;  %v5980_v12 = vld [vmem:[%s7424_s20 + $0x60] sm:$0xf] }
 0x350   : > { %3528 = vmatpush.bf16.msrb.mxu0 %v5733_v15  ;;  %3541 = vmatpush.bf16.msrb.mxu1 %v5737_v25  ;;  %v6443_v15 = vld [vmem:[%s7424_s20 + $0x64] sm:$0xf]  ;;  %v5982_v25 = vld [vmem:[%s7424_s20 + $0x6c] sm:$0xf0]  ;;  %v8188_v17 = vor.u32 %v6444_v14, %v5980_v12 }
 0x351   : > { %v8190_v18 = vor.u32 %v6443_v15, %v5982_v25 }
 0x353   : > { %3503 = vmatpush.bf16.msra.mxu2 %v5677_v22  ;;  %3516 = vmatpush.bf16.msra.mxu3 %v5681_v33  ;;  %v6441_v22 = vld [vmem:[%s7424_s20 + $0x50] sm:$0xf0]  ;;  %v6440_v33 = vld [vmem:[%s7424_s20 + $0x4c] sm:$0xf] }
 0x354   : > { %3529 = vmatpush.bf16.msrb.mxu0 %v5685_v27  ;;  %3542 = vmatpush.bf16.msrb.mxu1 %v5689_v46  ;;  %v8204_v27 = vor.u32 %v6441_v22, %v5968_v19  ;;  %v8206_v46 = vor.u32 %v6440_v33, %v5970_v26 }
 0x357   : > { %3504 = vmatpush.bf16.msra.mxu2 %v5629_v35  ;;  %3517 = vmatpush.bf16.msra.mxu3 %v5633_v36  ;;  %v8215_v35 = vor.u32 %v6442_v30, %v5976_v29  ;;  %v8220_v36 = vor.u32 %v6438_v31, %v5956_v28  ;;  %v3582_v30 = vld [vmem:[%s1112_s15] sm:$0x7] }
 0x358   : > { %3530 = vmatpush.bf16.msrb.mxu0 %v5637_v40  ;;  %3543 = vmatpush.bf16.msrb.mxu1 %v5641_v41  ;;  %v6439_v40 = vld [vmem:[%s7424_s20 + $0x40] sm:$0xf0]  ;;  %v8355_v31 = vld [vmem:[%s1108_s4] sm:$0xff] }
 0x359   : > { %v6435_v41 = vld [vmem:[%s7424_s20 + $0x20] sm:$0xf0]  ;;  %v8231_v43 = vor.u32 %v6439_v40, %v5964_v39  ;;  %v2890_v32 = vperm.slane %v8355_v31, 0  ;;  %v2891_v34 = vperm.slane %v8355_v31, 1 }
 0x35a   : > { %v8236_v8 = vor.u32 %v6435_v41, %v5944_v38 }
 0x35b   : > { %3505 = vmatpush.bf16.msra.mxu2 %v5581_v49  ;;  %3518 = vmatpush.bf16.msra.mxu3 %v5585_v50  ;;  %v6431_v49 = vld [vmem:[%s7424_s20 + $0x4] sm:$0xf]  ;;  %v5934_v50 = vld [vmem:[%s7424_s20 + $0xc] sm:$0xf0] }
 0x35c   : > { %3531 = vmatpush.bf16.msrb.mxu0 %v5589_v51  ;;  %3544 = vmatpush.bf16.msrb.mxu1 %v5593_v52  ;;  %v8247_v51 = vor.u32 %v6436_v47, %v5952_v5  ;;  %v8252_v52 = vor.u32 %v6432_v48, %v5932_v44  ;;  %v8254_v55 = vor.u32 %v6431_v49, %v5934_v50 }
 0x35e   : > { %3506 = vmatmul.bf16.vlgmr.msra.gmra.mxu2 %v8068_v23  ;;  %3519 = vmatmul.bf16.vlgmr.msra.gmra.mxu3 %v8068_v23 }
 0x35f   : > { %3718 = vmatpush.bf16.msrb.mxu2 %v8138_v53  ;;  %3731 = vmatpush.bf16.msrb.mxu3 %v8140_v54 }
 0x360   : > { %3532 = vmatmul.bf16.vlgmr.msrb.gmra.mxu0 %v8068_v23  ;;  %3545 = vmatmul.bf16.vlgmr.msrb.gmra.mxu1 %v8068_v23  ;;  %v6000_v23 = vld [vmem:[%s7424_s20 + $0x80] sm:$0xf] }
 0x361   : > { %3744 = vmatpush.bf16.msra.mxu0 %v8148_v61  ;;  %3805 = vmatpush.bf16.msra.mxu1 %v8138_v53  ;;  %v8183_v16 = vor.u32 %v6448_v13, %v6000_v23  ;;  %v8338_v23 = vld [vmem:[%s1108_s4 + $0x8] sm:$0xf] }
 0x362   : > { %v2900_v15 = vperm.slane %v8338_v23, 2  ;;  %v2901_v25 = vperm.slane %v8338_v23, 3  ;;  %v2899_v21 = vperm.slane %v8338_v23, 1 }
 0x363   : > { %3719 = vmatpush.bf16.msrb.mxu2 %v8152_v45  ;;  %3732 = vmatpush.bf16.msrb.mxu3 %v8154_v62 }
 0x365   : > { %3745 = vmatpush.bf16.msra.mxu0 %v8167_v9  ;;  %3806 = vmatpush.bf16.msra.mxu1 %v8152_v45 }
 0x367   : > { %3720 = vmatpush.bf16.msrb.mxu2 %v8172_v10  ;;  %3733 = vmatpush.bf16.msrb.mxu3 %v8174_v11 }
 0x369   : > { %3746 = vmatpush.bf16.msra.mxu0 %v8183_v16  ;;  %3807 = vmatpush.bf16.msra.mxu1 %v8172_v10 }
 0x36b   : > { %3721 = vmatpush.bf16.msrb.mxu2 %v8188_v17  ;;  %3734 = vmatpush.bf16.msrb.mxu3 %v8190_v18 }
 0x36d   : > { %3747 = vmatpush.bf16.msra.mxu0 %v8199_v24  ;;  %3808 = vmatpush.bf16.msra.mxu1 %v8188_v17 }
 0x36f   : > { %3722 = vmatpush.bf16.msrb.mxu2 %v8204_v27  ;;  %3735 = vmatpush.bf16.msrb.mxu3 %v8206_v46 }
 0x371   : > { %3748 = vmatpush.bf16.msra.mxu0 %v8215_v35  ;;  %3809 = vmatpush.bf16.msra.mxu1 %v8204_v27 }
 0x373   : > { %3723 = vmatpush.bf16.msrb.mxu2 %v8220_v36  ;;  %3736 = vmatpush.bf16.msrb.mxu3 %v8222_v37 }
 0x375   : > { %3749 = vmatpush.bf16.msra.mxu0 %v8231_v43  ;;  %3810 = vmatpush.bf16.msra.mxu1 %v8220_v36 }
 0x377   : > { %3724 = vmatpush.bf16.msrb.mxu2 %v8236_v8  ;;  %3737 = vmatpush.bf16.msrb.mxu3 %v8238_v1 }
 0x379   : > { %3750 = vmatpush.bf16.msra.mxu0 %v8247_v51  ;;  %3811 = vmatpush.bf16.msra.mxu1 %v8236_v8 }
 0x37b   : > { %3725 = vmatpush.bf16.msrb.mxu2 %v8252_v52  ;;  %3738 = vmatpush.bf16.msrb.mxu3 %v8254_v55 }
 0x37d   : > { %3751 = vmatpush.bf16.msra.mxu0 %v8262_v58  ;;  %3812 = vmatpush.bf16.msra.mxu1 %v8252_v52 }
 0x37e   : > { %3726 = vmatmul.bf16.vlgmr.msrb.gmra.mxu2 %v7029_v59  ;;  %3739 = vmatmul.bf16.vlgmr.msrb.gmra.mxu3 %v7029_v59 }
 0x37f   : > { %3818 = vmatpush.bf16.msra.mxu2 %v8140_v54  ;;  %3831 = vmatpush.bf16.msra.mxu3 %v8148_v61 }
 0x380   : > { %3752 = vmatmul.bf16.vlgmr.msra.gmra.mxu0 %v7029_v59 }
 0x381   : > { %3892 = vmatpush.bf16.msrb.mxu0 %v8138_v53  ;;  %3905 = vmatpush.bf16.msrb.mxu1 %v8140_v54 }
 0x383   : > { %3819 = vmatpush.bf16.msra.mxu2 %v8154_v62  ;;  %3832 = vmatpush.bf16.msra.mxu3 %v8167_v9 }
 0x385   : > { %3893 = vmatpush.bf16.msrb.mxu0 %v8152_v45  ;;  %3906 = vmatpush.bf16.msrb.mxu1 %v8154_v62 }
 0x387   : > { %3820 = vmatpush.bf16.msra.mxu2 %v8174_v11  ;;  %3833 = vmatpush.bf16.msra.mxu3 %v8183_v16 }
 0x389   : > { %3894 = vmatpush.bf16.msrb.mxu0 %v8172_v10  ;;  %3907 = vmatpush.bf16.msrb.mxu1 %v8174_v11 }
 0x38b   : > { %3821 = vmatpush.bf16.msra.mxu2 %v8190_v18  ;;  %3834 = vmatpush.bf16.msra.mxu3 %v8199_v24 }
 0x38d   : > { %3895 = vmatpush.bf16.msrb.mxu0 %v8188_v17  ;;  %3908 = vmatpush.bf16.msrb.mxu1 %v8190_v18 }
 0x38f   : > { %3822 = vmatpush.bf16.msra.mxu2 %v8206_v46  ;;  %3835 = vmatpush.bf16.msra.mxu3 %v8215_v35 }
 0x391   : > { %3896 = vmatpush.bf16.msrb.mxu0 %v8204_v27  ;;  %3909 = vmatpush.bf16.msrb.mxu1 %v8206_v46 }
 0x393   : > { %3823 = vmatpush.bf16.msra.mxu2 %v8222_v37  ;;  %3836 = vmatpush.bf16.msra.mxu3 %v8231_v43 }
 0x395   : > { %3897 = vmatpush.bf16.msrb.mxu0 %v8220_v36  ;;  %3910 = vmatpush.bf16.msrb.mxu1 %v8222_v37 }
 0x397   : > { %3824 = vmatpush.bf16.msra.mxu2 %v8238_v1  ;;  %3837 = vmatpush.bf16.msra.mxu3 %v8247_v51 }
 0x399   : > { %3898 = vmatpush.bf16.msrb.mxu0 %v8236_v8  ;;  %3911 = vmatpush.bf16.msrb.mxu1 %v8238_v1 }
 0x39b   : > { %3825 = vmatpush.bf16.msra.mxu2 %v8254_v55  ;;  %3838 = vmatpush.bf16.msra.mxu3 %v8262_v58 }
 0x39d   : > { %3899 = vmatpush.bf16.msrb.mxu0 %v8252_v52  ;;  %3912 = vmatpush.bf16.msrb.mxu1 %v8254_v55 }
 0x39f   : > { %3918 = vmatpush.bf16.msrb.mxu2 %v8148_v61  ;;  %3979 = vmatpush.bf16.msrb.mxu3 %v8138_v53 }
 0x3a1   : > { %3992 = vmatpush.bf16.msra.mxu0 %v8140_v54 }
 0x3a3   : > { %3919 = vmatpush.bf16.msrb.mxu2 %v8167_v9  ;;  %3980 = vmatpush.bf16.msrb.mxu3 %v8152_v45 }
 0x3a5   : > { %3993 = vmatpush.bf16.msra.mxu0 %v8154_v62 }
 0x3a7   : > { %3920 = vmatpush.bf16.msrb.mxu2 %v8183_v16  ;;  %3981 = vmatpush.bf16.msrb.mxu3 %v8172_v10 }
 0x3a9   : > { %3994 = vmatpush.bf16.msra.mxu0 %v8174_v11 }
 0x3ab   : > { %3921 = vmatpush.bf16.msrb.mxu2 %v8199_v24  ;;  %3982 = vmatpush.bf16.msrb.mxu3 %v8188_v17 }
 0x3ad   : > { %3995 = vmatpush.bf16.msra.mxu0 %v8190_v18 }
 0x3af   : > { %3922 = vmatpush.bf16.msrb.mxu2 %v8215_v35  ;;  %3983 = vmatpush.bf16.msrb.mxu3 %v8204_v27 }
 0x3b1   : > { %3996 = vmatpush.bf16.msra.mxu0 %v8206_v46 }
 0x3b3   : > { %3923 = vmatpush.bf16.msrb.mxu2 %v8231_v43  ;;  %3984 = vmatpush.bf16.msrb.mxu3 %v8220_v36  ;;  %v8359_v36 = vperm.slane %v3582_v30, 0 }
 0x3b5   : > { %3997 = vmatpush.bf16.msra.mxu0 %v8222_v37  ;;  %v8361_v37 = vperm.slane %v3582_v30, 1 }
 0x3b7   : > { %3924 = vmatpush.bf16.msrb.mxu2 %v8247_v51  ;;  %3985 = vmatpush.bf16.msrb.mxu3 %v8236_v8 }
 0x3b9   : > { %3998 = vmatpush.bf16.msra.mxu0 %v8238_v1 }
 0x3bb   : > { %3925 = vmatpush.bf16.msrb.mxu2 %v8262_v58  ;;  %3986 = vmatpush.bf16.msrb.mxu3 %v8252_v52  ;;  %v8322_v53 = vpop.f32.mrf.mxu0  ;;  %v8324_v54 = vpop.f32.mrf.mxu1 }
 0x3bd   : > { %3999 = vmatpush.bf16.msra.mxu0 %v8254_v55 }
 0x3c0   : > { %v3403_v60 = vpop.f32.mrf.mxu2  ;;  %v3416_v45 = vpop.f32.mrf.mxu3 }
 0x3c1   : > { %v3404_v41 = vadd.f32 %v3403_v60, %v2890_v32  ;;  %v3417_v2 = vadd.f32 %v3416_v45, %v2891_v34 }
 0x3c3   : > { %v3431_v62 = vpop.f32.mrf.mxu0  ;;  %v3444_v63 = vpop.f32.mrf.mxu1 }
 0x3c4   : > { %v8365_v63 = vperm.slane %v3582_v30, 2 }
 0x3c8   : > { %v3405_v0 = vpop.f32.mrf.mxu2  ;;  %v3418_v3 = vpop.f32.mrf.mxu3 }
 0x3cb   : > { %v8326_v4 = vpop.f32.mrf.mxu0  ;;  %v8328_v6 = vpop.f32.mrf.mxu1 }
 0x3d0   : > { %v8330_v7 = vpop.f32.mrf.mxu2  ;;  %v8332_v10 = vpop.f32.mrf.mxu3 }
 0x3d3   : > { %v3483_v11 = vpop.f32.mrf.mxu0  ;;  %v3496_v12 = vpop.f32.mrf.mxu1 }
 0x3d8   : > { %v3457_v13 = vpop.f32.mrf.mxu2  ;;  %v3470_v14 = vpop.f32.mrf.mxu3 }
 0x3dd   : > { %v3533_v17 = vpop.f32.mrf.mxu0  ;;  %v3546_v18 = vpop.f32.mrf.mxu1 }
 0x3de   : > { %v8342_v19 = vadd.f32 %v3533_v17, %v2900_v15  ;;  %v8344_v20 = vadd.f32 %v3546_v18, %v2901_v25  ;;  %v2892_v15 = vperm.slane %v8355_v31, 2 }
 0x3e1   : > { %v8347_v22 = vpop.f32.mrf.mxu2  ;;  %v3520_v33 = vpop.f32.mrf.mxu3 }
 0x3e2   : > { %v8349_v26 = vadd.f32 %v3520_v33, %v2899_v21 }
 0x3e5   : > { %v3535_v27 = vpop.f32.mrf.mxu0  ;;  %v3548_v46 = vpop.f32.mrf.mxu1 }
 0x3e6   : > { %v3430_v46 = vadd.f32 %v8322_v53, %v2892_v15 }
 0x3e9   : > { %v3509_v28 = vpop.f32.mrf.mxu2  ;;  %v3522_v29 = vpop.f32.mrf.mxu3 }
 0x3fd   : > { %v3753_v38 = vpop.f32.mrf.mxu0 }
 0x3fe   : > { %v3754_v25 = vadd.f32 %v3753_v38, %v8365_v63 }
 0x401   : > { %v3727_v39 = vpop.f32.mrf.mxu2  ;;  %v3740_v40 = vpop.f32.mrf.mxu3 }
 0x402   : > { %v3728_v42 = vadd.f32 %v3727_v39, %v8359_v36  ;;  %v3741_v8 = vadd.f32 %v3740_v40, %v8361_v37 }
 0x404   : > { %v3757_v1 = vadd.f32 %v3728_v42, %v3404_v41  ;;  %v3777_v44 = vadd.f32 %v3741_v8, %v3417_v2 }
 0x405   : > { %v3755_v48 = vpop.f32.mrf.mxu0 }
 0x406   : > { %v6026_v5 = vmul.f32 -1.442695, %v3757_v1  ;;  %v6027_v47 = vmul.f32 -1.442695, %v3777_v44  ;;  %v2893_v1 = vperm.slane %v8355_v31, 3 }
 0x408   : > { %6589 = vpow2.f32 %v6026_v5  ;;  %v3443_v5 = vadd.f32 %v8324_v54, %v2893_v1  ;;  %v2897_v1 = vperm.slane %v8355_v31, 7 }
 0x409   : > { %6591 = vpow2.f32 %v6027_v47  ;;  %v3729_v49 = vpop.f32.mrf.mxu2  ;;  %v3742_v50 = vpop.f32.mrf.mxu3 }
 0x40e   : > { %v6590_v52 = vpop.eup %6589 }
 0x40f   : > { %v6592_v55 = vpop.eup %6591  ;;  %v3761_v56 = vadd.f32 1.0, %v6590_v52 }
 0x410   : > { %v3781_v57 = vadd.f32 1.0, %v6592_v55 }
 0x411   : > { %6593 = vrcp.f32 %v3761_v56  ;;  %v3773_v11 = vand.u32 2147483648, %v3761_v56  ;;  %v3771_v13 = vand.u32 2147483647, %v3761_v56  ;;  %vm3767_vm1 = vweird.f32 %v3761_v56 }
 0x412   : > { %6595 = vrcp.f32 %v3781_v57  ;;  %v3793_v29 = vand.u32 2147483648, %v3781_v57  ;;  %vm3787_vm5 = vweird.f32 %v3781_v57  ;;  %v3791_v30 = vand.u32 2147483647, %v3781_v57 }
 0x413   : > { %v3774_v18 = vor.u32 1.1754944e-38, %v3773_v11  ;;  %vm3772_vm3 = vcmp.eq.f32.partialorder %v3771_v13, 8.507059e+37  ;;  %v2895_v11 = vperm.slane %v8355_v31, 5 }
 0x414   : > { %v3794_v38 = vor.u32 1.1754944e-38, %v3793_v29  ;;  %vm3792_vm7 = vcmp.eq.f32.partialorder %v3791_v30, 8.507059e+37 }
 0x417   : > { %v6594_v59 = vpop.eup %6593 }
 0x418   : > { %v6596_v60 = vpop.eup %6595  ;;  %v3763_v45 = vmul.f32 %v6594_v59, %v3761_v56  ;;  %vm3768_vm0 = vweird.f32 %v6594_v59 }
 0x419   : > { %v3783_v62 = vmul.f32 %v6596_v60, %v3781_v57  ;;  %vm3769_vm2 = vmor %vm3767_vm1, %vm3768_vm0  ;;  %vm3788_vm4 = vweird.f32 %v6596_v60 }
 0x41a   : > { %v3764_v0 = vsub.f32 1.0, %v3763_v45  ;;  %vm3789_vm6 = vmor %vm3787_vm5, %vm3788_vm4 }
 0x41b   : > { %v3784_v3 = vsub.f32 1.0, %v3783_v62 }
 0x41c   : > { %v3765_v12 = vmul.f32 %v6594_v59, %v3764_v0 }
 0x41d   : > { %v3785_v14 = vmul.f32 %v6596_v60, %v3784_v3 }
 0x41e   : > { %v3766_v17 = vadd.f32 %v6594_v59, %v3765_v12 }
 0x41f   : > { %v3786_v27 = vadd.f32 %v6596_v60, %v3785_v14 }
 0x420   : > { %v3770_v21 = vsel %vm3769_vm2, %v6594_v59, %v3766_v17 }
 0x421   : > { %v3775_v33 = vsel %vm3772_vm3, %v3774_v18, %v3770_v21  ;;  %v3790_v34 = vsel %vm3789_vm6, %v6596_v60, %v3786_v27  ;;  %v3469_v18 = vadd.f32 %v8332_v10, %v2895_v11 }
 0x422   : > { %v3797_v28 = vmul.f32 %v3775_v33, %v3754_v25  ;;  %v3795_v39 = vsel %vm3792_vm7, %v3794_v38, %v3790_v34 }
 0x423   : > { %v3800_v40 = vsub.f32 1.0, %v3795_v39  ;;  %v3802_v42 = vmul.f32 0.0, %v3795_v39 }
 0x424   : > { %v3798_v32 = vadd.f32 %v3797_v28, %v3430_v46 }
 0x426   : > { %6597 = vtanh.f32 %v3798_v32 }
 0x42c   : > { %v6598_v41 = vpop.eup %6597 }
 0x42d   : > { %v3801_v2 = vmul.f32 %v6598_v41, %v3800_v40 }
 0x42f   : > { %v8370_v8 = vadd.f32 %v3802_v42, %v3801_v2 }
 0x431   : > { %v3804_v53 = vpack.c.bf16 %v8370_v8, %v8370_v8 }
 0x433   : > { %3813 = vmatmul.bf16.vlgmr.msra.gmra.mxu1 %v3804_v53  ;;  %3826 = vmatmul.bf16.vlgmr.msra.gmra.mxu2 %v3804_v53 }
 0x434   : > { %3839 = vmatmul.bf16.vlgmr.msra.gmra.mxu3 %v3804_v53  ;;  %4005 = vmatpush.bf16.msra.mxu1 %v8148_v61  ;;  %v2896_v53 = vperm.slane %v8355_v31, 6 }
 0x438   : > { %4006 = vmatpush.bf16.msra.mxu1 %v8167_v9  ;;  %v2894_v9 = vperm.slane %v8355_v31, 4 }
 0x43c   : > { %4007 = vmatpush.bf16.msra.mxu1 %v8183_v16 }
 0x440   : > { %4008 = vmatpush.bf16.msra.mxu1 %v8199_v24 }
 0x444   : > { %4009 = vmatpush.bf16.msra.mxu1 %v8215_v35  ;;  %v3456_v35 = vadd.f32 %v8330_v7, %v2894_v9  ;;  %v3495_v9 = vadd.f32 %v8328_v6, %v2897_v1 }
 0x448   : > { %4010 = vmatpush.bf16.msra.mxu1 %v8231_v43 }
 0x44c   : > { %4011 = vmatpush.bf16.msra.mxu1 %v8247_v51 }
 0x450   : > { %4012 = vmatpush.bf16.msra.mxu1 %v8262_v58 }
 0x4b0   : > { %v3814_v44 = vpop.f32.mrf.mxu1 }
 0x4b1   : > { %v3815_v61 = vadd.f32 %v3814_v44, %v8359_v36 }
 0x4b3   : > { %v3844_v16 = vadd.f32 %v3815_v61, %v3443_v5  ;;  %v3482_v61 = vadd.f32 %v8326_v4, %v2896_v53  ;;  %v6459_v53 = vld [vmem:[%s8414_s28 + $0x20] sm:$0xff] }
 0x4b5   : > { %v6028_v47 = vmul.f32 -1.442695, %v3844_v16 }
 0x4b6   : > { %v3827_v24 = vpop.f32.mrf.mxu2 }
 0x4b7   : > { %6599 = vpow2.f32 %v6028_v47  ;;  %v3828_v43 = vadd.f32 %v3827_v24, %v8361_v37  ;;  %v3840_v51 = vpop.f32.mrf.mxu3 }
 0x4b8   : > { %v3816_v48 = vpop.f32.mrf.mxu1  ;;  %v3841_v25 = vadd.f32 %v3840_v51, %v8365_v63 }
 0x4b9   : > { %v3864_v58 = vadd.f32 %v3828_v43, %v3456_v35 }
 0x4bb   : > { %v6029_v49 = vmul.f32 -1.442695, %v3864_v58 }
 0x4bd   : > { %v6600_v50 = vpop.eup %6599  ;;  %6601 = vpow2.f32 %v6029_v49 }
 0x4be   : > { %v3848_v52 = vadd.f32 1.0, %v6600_v50  ;;  %v3829_v54 = vpop.f32.mrf.mxu2 }
 0x4bf   : > { %v3842_v55 = vpop.f32.mrf.mxu3 }
 0x4c0   : > { %6603 = vrcp.f32 %v3848_v52  ;;  %v3860_v7 = vand.u32 2147483648, %v3848_v52  ;;  %v3858_v0 = vand.u32 2147483647, %v3848_v52  ;;  %vm3854_vm9 = vweird.f32 %v3848_v52 }
 0x4c2   : > { %v3861_v14 = vor.u32 1.1754944e-38, %v3860_v7  ;;  %vm3859_vm11 = vcmp.eq.f32.partialorder %v3858_v0, 8.507059e+37  ;;  %v2898_v0 = vperm.slane %v8338_v23, 0 }
 0x4c3   : > { %v6602_v56 = vpop.eup %6601 }
 0x4c4   : > { %v3868_v57 = vadd.f32 1.0, %v6602_v56 }
 0x4c6   : > { %v6604_v59 = vpop.eup %6603  ;;  %6605 = vrcp.f32 %v3868_v57  ;;  %v3880_v46 = vand.u32 2147483648, %v3868_v57  ;;  %v3878_v28 = vand.u32 2147483647, %v3868_v57  ;;  %vm3874_vm13 = vweird.f32 %v3868_v57 }
 0x4c7   : > { %v3850_v60 = vmul.f32 %v6604_v59, %v3848_v52  ;;  %vm3855_vm8 = vweird.f32 %v6604_v59 }
 0x4c8   : > { %vm3856_vm10 = vmor %vm3854_vm9, %vm3855_vm8  ;;  %v3881_v34 = vor.u32 1.1754944e-38, %v3880_v46  ;;  %vm3879_vm15 = vcmp.eq.f32.partialorder %v3878_v28, 8.507059e+37 }
 0x4c9   : > { %v3851_v45 = vsub.f32 1.0, %v3850_v60 }
 0x4cb   : > { %v3852_v62 = vmul.f32 %v6604_v59, %v3851_v45 }
 0x4cc   : > { %v6606_v3 = vpop.eup %6605 }
 0x4cd   : > { %v3870_v12 = vmul.f32 %v6606_v3, %v3868_v57  ;;  %v3853_v13 = vadd.f32 %v6604_v59, %v3852_v62  ;;  %vm3875_vm12 = vweird.f32 %v6606_v3 }
 0x4ce   : > { %vm3876_vm14 = vmor %vm3874_vm13, %vm3875_vm12 }
 0x4cf   : > { %v3871_v15 = vsub.f32 1.0, %v3870_v12  ;;  %v3857_v17 = vsel %vm3856_vm10, %v6604_v59, %v3853_v13 }
 0x4d0   : > { %v3862_v21 = vsel %vm3859_vm11, %v3861_v14, %v3857_v17 }
 0x4d1   : > { %v3872_v33 = vmul.f32 %v6606_v3, %v3871_v15  ;;  %v3884_v27 = vmul.f32 %v3862_v21, %v3841_v25  ;;  %v3508_v25 = vadd.f32 %v8347_v22, %v2898_v0 }
 0x4d3   : > { %v3885_v29 = vadd.f32 %v3884_v27, %v3469_v18  ;;  %v3873_v30 = vadd.f32 %v6606_v3, %v3872_v33 }
 0x4d5   : > { %6607 = vtanh.f32 %v3885_v29  ;;  %v3877_v32 = vsel %vm3876_vm14, %v6606_v3, %v3873_v30 }
 0x4d6   : > { %v3882_v38 = vsel %vm3879_vm15, %v3881_v34, %v3877_v32 }
 0x4d7   : > { %v3887_v39 = vsub.f32 1.0, %v3882_v38  ;;  %v3889_v10 = vmul.f32 %v3882_v38, %v8370_v8  ;;  %v6462_v38 = vld [vmem:[%s8414_s28 + $0x38] sm:$0xff] }
 0x4d8   : > { %4134 = vmatpush.bf16.msra.mxu2 %v6462_v38 }
 0x4db   : > { %v6608_v40 = vpop.eup %6607 }
 0x4dc   : > { %v3888_v41 = vmul.f32 %v6608_v40, %v3887_v39  ;;  %v6461_v39 = vld [vmem:[%s8414_s28 + $0x30] sm:$0xff] }
 0x4dd   : > { %4135 = vmatpush.bf16.msra.mxu2 %v6461_v39 }
 0x4de   : > { %v8392_v2 = vadd.f32 %v3889_v10, %v3888_v41  ;;  %v6460_v41 = vld [vmem:[%s8414_s28 + $0x28] sm:$0xff] }
 0x4e0   : > { %v3891_v42 = vpack.c.bf16 %v8392_v2, %v8392_v2 }
 0x4e1   : > { %4136 = vmatpush.bf16.msra.mxu2 %v6460_v41  ;;  %v6586_v41 = vld [vmem:[%s921_s19] ss:$0 sm:$0xff] }
 0x4e2   : > { %3900 = vmatmul.bf16.vlgmr.msrb.gmra.mxu0 %v3891_v42  ;;  %3913 = vmatmul.bf16.vlgmr.msrb.gmra.mxu1 %v3891_v42 }
 0x4e3   : > { %3926 = vmatmul.bf16.vlgmr.msrb.gmra.mxu2 %v3891_v42 }
 0x4e5   : > { %4137 = vmatpush.bf16.msra.mxu2 %v6459_v53 }
 0x55f   : > { %v3901_v44 = vpop.f32.mrf.mxu0  ;;  %v3914_v5 = vpop.f32.mrf.mxu1 }
 0x560   : > { %v3902_v8 = vadd.f32 %v3901_v44, %v8359_v36  ;;  %v3915_v16 = vadd.f32 %v3914_v5, %v8361_v37 }
 0x562   : > { %v3931_v47 = vadd.f32 %v3902_v8, %v3482_v61  ;;  %v3951_v24 = vadd.f32 %v3915_v16, %v3495_v9  ;;  %v6458_v61 = vld [vmem:[%s8414_s28 + $0x18] sm:$0xff] }
 0x563   : > { %4138 = vmatpush.bf16.msra.mxu2 %v6458_v61  ;;  %v6472_v61 = vld [vmem:[%s7446_s25 + $0x8] sm:$0xff] }
 0x564   : > { %v6030_v35 = vmul.f32 -1.442695, %v3931_v47  ;;  %v6031_v43 = vmul.f32 -1.442695, %v3951_v24 }
 0x566   : > { %6609 = vpow2.f32 %v6030_v35  ;;  %v3927_v51 = vpop.f32.mrf.mxu2 }
 0x567   : > { %6611 = vpow2.f32 %v6031_v43  ;;  %v3903_v48 = vpop.f32.mrf.mxu0  ;;  %v3916_v58 = vpop.f32.mrf.mxu1  ;;  %v3928_v12 = vadd.f32 %v3927_v51, %v8365_v63  ;;  %v6456_v43 = vld [vmem:[%s8414_s28 + $0x8] sm:$0xff] }
 0x568   : > { %v6466_v58 = vld [vmem:[%s7432_s30 + $0x18] sm:$0xff] }
 0x569   : > { %4193 = vmatpush.bf16.msra.mxu3 %v6466_v58 }
 0x56c   : > { %v6610_v31 = vpop.eup %6609 }
 0x56d   : > { %v6612_v49 = vpop.eup %6611  ;;  %v3935_v50 = vadd.f32 1.0, %v6610_v31 }
 0x56e   : > { %v3955_v52 = vadd.f32 1.0, %v6612_v49  ;;  %v3929_v4 = vpop.f32.mrf.mxu2  ;;  %v6465_v49 = vld [vmem:[%s7432_s30 + $0x10] sm:$0xff] }
 0x56f   : > { %6613 = vrcp.f32 %v3935_v50  ;;  %v3947_v60 = vand.u32 2147483648, %v3935_v50  ;;  %v3945_v7 = vand.u32 2147483647, %v3935_v50  ;;  %vm3941_vm1 = vweird.f32 %v3935_v50  ;;  %4194 = vmatpush.bf16.msra.mxu3 %v6465_v49 }
 0x570   : > { %6615 = vrcp.f32 %v3955_v52  ;;  %v3967_v18 = vand.u32 2147483648, %v3955_v52  ;;  %vm3961_vm5 = vweird.f32 %v3955_v52  ;;  %v3965_v21 = vand.u32 2147483647, %v3955_v52 }
 0x571   : > { %v3948_v11 = vor.u32 1.1754944e-38, %v3947_v60  ;;  %vm3946_vm3 = vcmp.eq.f32.partialorder %v3945_v7, 8.507059e+37 }
 0x572   : > { %v3968_v27 = vor.u32 1.1754944e-38, %v3967_v18  ;;  %vm3966_vm7 = vcmp.eq.f32.partialorder %v3965_v21, 8.507059e+37 }
 0x575   : > { %v6614_v6 = vpop.eup %6613 }
 0x576   : > { %v6616_v54 = vpop.eup %6615  ;;  %v3937_v55 = vmul.f32 %v6614_v6, %v3935_v50  ;;  %vm3942_vm0 = vweird.f32 %v6614_v6 }
 0x577   : > { %v3957_v56 = vmul.f32 %v6616_v54, %v3955_v52  ;;  %vm3943_vm2 = vmor %vm3941_vm1, %vm3942_vm0  ;;  %vm3962_vm4 = vweird.f32 %v6616_v54  ;;  %vm4185_vm0 = vcmask 523264  }
 0x578   : > { %v3938_v57 = vsub.f32 1.0, %v3937_v55  ;;  %vm3963_vm6 = vmor %vm3961_vm5, %vm3962_vm4  ;;  %vm4328_vm4 = vcmask 517120  }
 0x579   : > { %v3958_v59 = vsub.f32 1.0, %v3957_v56 }
 0x57a   : > { %v3939_v45 = vmul.f32 %v6614_v6, %v3938_v57 }
 0x57b   : > { %v3959_v62 = vmul.f32 %v6616_v54, %v3958_v59 }
 0x57c   : > { %v3940_v3 = vadd.f32 %v6614_v6, %v3939_v45 }
 0x57d   : > { %v3960_v15 = vadd.f32 %v6616_v54, %v3959_v62 }
 0x57e   : > { %v3944_v13 = vsel %vm3943_vm2, %v6614_v6, %v3940_v3  ;;  %v6464_v6 = vld [vmem:[%s7432_s30 + $0x8] sm:$0xff] }
 0x57f   : > { %v3949_v14 = vsel %vm3946_vm3, %v3948_v11, %v3944_v13  ;;  %v3964_v23 = vsel %vm3963_vm6, %v6616_v54, %v3960_v15  ;;  %4195 = vmatpush.bf16.msra.mxu3 %v6464_v6  ;;  %vm4334_vm6 = vcmask 1041920  }
 0x580   : > { %v3971_v17 = vmul.f32 %v3949_v14, %v3928_v12  ;;  %v3969_v46 = vsel %vm3966_vm7, %v3968_v27, %v3964_v23 }
 0x581   : > { %v3974_v28 = vsub.f32 1.0, %v3969_v46  ;;  %v3976_v32 = vmul.f32 %v3969_v46, %v8392_v2  ;;  %v6463_v46 = vld [vmem:[%s7432_s30] sm:$0xff] }
 0x582   : > { %v3972_v33 = vadd.f32 %v3971_v17, %v3508_v25 }
 0x583   : > { %4196 = vmatpush.bf16.msra.mxu3 %v6463_v46 }
 0x584   : > { %6617 = vtanh.f32 %v3972_v33 }
 0x58a   : > { %v6618_v29 = vpop.eup %6617 }
 0x58b   : > { %v3975_v30 = vmul.f32 %v6618_v29, %v3974_v28  ;;  %v6469_v28 = vld [vmem:[%s7439_s23 + $0x10] sm:$0xff]  ;;  %v6468_v29 = vld [vmem:[%s7439_s23 + $0x8] sm:$0xff] }
 0x58d   : > { %v8406_v34 = vadd.f32 %v3976_v32, %v3975_v30  ;;  %v6585_v30 = vld [vmem:[%s902_s13] ss:$0 sm:$0xff]  ;;  %s959_s13 = scalar_lea.vmem [#allocation18], %s7402_s11 }
 0x58e   : > { %v6588_v6 = vld [vmem:[%s959_s13] ss:$0 sm:$0xff] }
 0x58f   : > { %v3978_v22 = vpack.c.bf16 %v8406_v34, %v8406_v34 }
 0x591   : > { %3987 = vmatmul.bf16.vlgmr.msrb.gmra.mxu3 %v3978_v22  ;;  %4000 = vmatmul.bf16.vlgmr.msra.gmra.mxu0 %v3978_v22 }
 0x592   : > { %4013 = vmatmul.bf16.vlgmr.msra.gmra.mxu1 %v3978_v22 }
 0x60e   : > { %v4001_v40 = vpop.f32.mrf.mxu0 }
 0x60f   : > { %v4002_v10 = vadd.f32 %v4001_v40, %v8361_v37  ;;  %v4014_v2 = vpop.f32.mrf.mxu1  ;;  %v6457_v37 = vld [vmem:[%s8414_s28 + $0x10] sm:$0xff] }
 0x610   : > { %4139 = vmatpush.bf16.msra.mxu2 %v6457_v37  ;;  %v4015_v7 = vadd.f32 %v4014_v2, %v8365_v63  ;;  %v6467_v40 = vld [vmem:[%s7439_s23] sm:$0xff] }
 0x611   : > { %v4038_v42 = vadd.f32 %v4002_v10, %v8342_v19 }
 0x613   : > { %v6033_v1 = vmul.f32 -1.442695, %v4038_v42 }
 0x614   : > { %v3988_v44 = vpop.f32.mrf.mxu3  ;;  %4140 = vmatpush.bf16.msra.mxu2 %v6456_v43 }
 0x615   : > { %6619 = vpow2.f32 %v6033_v1  ;;  %v3989_v5 = vadd.f32 %v3988_v44, %v8359_v36  ;;  %v6455_v36 = vld [vmem:[%s8414_s28] sm:$0xff] }
 0x616   : > { %v4003_v9 = vpop.f32.mrf.mxu0  ;;  %v6474_v44 = vld [vmem:[%s7446_s25 + $0x18] sm:$0xff] }
 0x617   : > { %v4018_v8 = vadd.f32 %v3989_v5, %v8349_v26  ;;  %v4016_v16 = vpop.f32.mrf.mxu1  ;;  %4319 = vmatpush.bf16.msrb.mxu0 %v6474_v44  ;;  %v6473_v5 = vld [vmem:[%s7446_s25 + $0x10] sm:$0xff] }
 0x618   : > { %4141 = vmatpush.bf16.msra.mxu2 %v6455_v36  ;;  %v6587_v9 = vld [vmem:[%s940_s21] ss:$0 sm:$0xff] }
 0x619   : > { %v6032_v47 = vmul.f32 -1.442695, %v4018_v8  ;;  %v6471_v8 = vld [vmem:[%s7446_s25] sm:$0xff]  ;;  %s7030_s25 = smov 64  }
 0x61b   : > { %v6620_v24 = vpop.eup %6619  ;;  %6621 = vpow2.f32 %v6032_v47  ;;  %4320 = vmatpush.bf16.msrb.mxu0 %v6473_v5 }
 0x61c   : > { %v4042_v19 = vadd.f32 1.0, %v6620_v24  ;;  %v3990_v35 = vpop.f32.mrf.mxu3 }
 0x61e   : > { %6623 = vrcp.f32 %v4042_v19  ;;  %v4054_v11 = vand.u32 2147483648, %v4042_v19  ;;  %vm4048_vm13 = vweird.f32 %v4042_v19  ;;  %v4052_v13 = vand.u32 2147483647, %v4042_v19 }
 0x61f   : > { %4321 = vmatpush.bf16.msrb.mxu0 %v6472_v61 }
 0x620   : > { %v4055_v25 = vor.u32 1.1754944e-38, %v4054_v11  ;;  %vm4053_vm15 = vcmp.eq.f32.partialorder %v4052_v13, 8.507059e+37 }
 0x621   : > { %v6622_v51 = vpop.eup %6621 }
 0x622   : > { %v4022_v48 = vadd.f32 1.0, %v6622_v51 }
 0x623   : > { %4322 = vmatpush.bf16.msrb.mxu0 %v6471_v8 }
 0x624   : > { %6625 = vrcp.f32 %v4022_v48  ;;  %v6624_v26 = vpop.eup %6623  ;;  %v4034_v55 = vand.u32 2147483648, %v4022_v48  ;;  %v4032_v57 = vand.u32 2147483647, %v4022_v48  ;;  %vm4028_vm9 = vweird.f32 %v4022_v48 }
 0x625   : > { %v4044_v31 = vmul.f32 %v6624_v26, %v4042_v19  ;;  %vm4049_vm12 = vweird.f32 %v6624_v26 }
 0x626   : > { %v4035_v45 = vor.u32 1.1754944e-38, %v4034_v55  ;;  %vm4033_vm11 = vcmp.eq.f32.partialorder %v4032_v57, 8.507059e+37  ;;  %vm4050_vm14 = vmor %vm4048_vm13, %vm4049_vm12 }
 0x627   : > { %v4045_v4 = vsub.f32 1.0, %v4044_v31 }
 0x629   : > { %v4046_v59 = vmul.f32 %v6624_v26, %v4045_v4 }
 0x62a   : > { %v6626_v50 = vpop.eup %6625 }
 0x62b   : > { %v4024_v52 = vmul.f32 %v6626_v50, %v4022_v48  ;;  %vm4029_vm8 = vweird.f32 %v6626_v50  ;;  %v4047_v3 = vadd.f32 %v6624_v26, %v4046_v59 }
 0x62c   : > { %vm4030_vm10 = vmor %vm4028_vm9, %vm4029_vm8 }
 0x62d   : > { %v4025_v54 = vsub.f32 1.0, %v4024_v52  ;;  %v4051_v15 = vsel %vm4050_vm14, %v6624_v26, %v4047_v3 }
 0x62e   : > { %v4056_v63 = vsel %vm4053_vm15, %v4055_v25, %v4051_v15 }
 0x62f   : > { %v4026_v56 = vmul.f32 %v6626_v50, %v4025_v54  ;;  %v4061_v17 = vsub.f32 1.0, %v4056_v63  ;;  %v4063_v33 = vmul.f32 %v4056_v63, %v8406_v34 }
 0x631   : > { %v4027_v60 = vadd.f32 %v6626_v50, %v4026_v56 }
 0x633   : > { %v4031_v62 = vsel %vm4030_vm10, %v6626_v50, %v4027_v60 }
 0x634   : > { %v4036_v0 = vsel %vm4033_vm11, %v4035_v45, %v4031_v62 }
 0x635   : > { %v4058_v12 = vmul.f32 %v4036_v0, %v4015_v7 }
 0x637   : > { %v4059_v14 = vadd.f32 %v4058_v12, %v8344_v20  ;;  %v6470_v20 = vld [vmem:[%s7439_s23 + $0x18] sm:$0xff]  ;;  %s8555_s23 = sld [smem:[#allocation44_spill]] }
 0x638   : > { %4247 = vmatpush.bf16.msrb.mxu3 %v6470_v20 }
 0x639   : > { %6627 = vtanh.f32 %v4059_v14 }
 0x63c   : > { %4248 = vmatpush.bf16.msrb.mxu3 %v6469_v28 }
 0x63d   : > { %s1121_s21 = scalar_lea.vmem %s8555_s23, %s4708_s6 }
 0x63f   : > { %v6628_v18 = vpop.eup %6627 }
 0x640   : > { %v4062_v21 = vmul.f32 %v6628_v18, %v4061_v17  ;;  %4249 = vmatpush.bf16.msrb.mxu3 %v6468_v29 }
 0x642   : > { %v4064_v23 = vadd.f32 %v4063_v33, %v4062_v21 }
 0x644   : > { %v4065_v27 = vpack.c.bf16 %v4064_v23, %v4064_v23  ;;  %4250 = vmatpush.bf16.msrb.mxu3 %v6467_v40 }
 0x646   : > { %4142 = vmatmul.bf16.vlgmr.msra.gmra.mxu2 %v4065_v27 }
 0x6c9   : > { %v4143_v32 = vpop.f32.mrf.mxu2 }
 0x6ca   : > { %v4144_v22 = vadd.f32 %v6585_v30, %v4143_v32 }
 0x6cc   : > { %v4147_v34 = vmax.f32 %v4144_v22, 0.0 }
 0x6ce   : > { %v4148_v38 = vpack.c.bf16 %v4147_v34, %v4147_v34 }
 0x6d0   : > { %6082 = vmatmul.msk.bf16.vlgmr.msra.gmra.mxu3 %vm4185_vm0, %v4148_v38 }
 0x6d1   : > { %v4145_v39 = vpop.f32.mrf.mxu2 }
 0x753   : > { %v4198_v10 = vpop.f32.mrf.mxu3 }
 0x754   : > { %v4199_v2 = vadd.f32 %v6586_v41, %v4198_v10 }
 0x756   : > { %v4202_v42 = vmax.f32 %v4199_v2, 0.0 }
 0x758   : > { %v4203_v53 = vpack.c.bf16 %v4202_v42, %v4202_v42 }
 0x75a   : > { %6099 = vmatmul.msk.bf16.vlgmr.msrb.gmra.mxu3 %vm4185_vm0, %v4203_v53 }
 0x75b   : > { %v4200_v1 = vpop.f32.mrf.mxu3 }
 0x7dd   : > { %v4252_v16 = vpop.f32.mrf.mxu3 }
 0x7de   : > { %v4253_v37 = vadd.f32 %v6587_v9, %v4252_v16 }
 0x7e0   : > { %v6100_v47 = vmul.f32 -1.442695, %v4253_v37 }
 0x7e2   : > { %6629 = vpow2.f32 %v6100_v47 }
 0x7e5   : > { %v4254_v24 = vpop.f32.mrf.mxu3 }
 0x7e8   : > { %v6630_v19 = vpop.eup %6629 }
 0x7e9   : > { %v4259_v35 = vadd.f32 1.0, %v6630_v19 }
 0x7eb   : > { %6631 = vrcp.f32 %v4259_v35  ;;  %v4271_v48 = vand.u32 2147483648, %v4259_v35  ;;  %v4269_v58 = vand.u32 2147483647, %v4259_v35  ;;  %vm4265_vm2 = vweird.f32 %v4259_v35 }
 0x7ed   : > { %v4272_v49 = vor.u32 1.1754944e-38, %v4271_v48  ;;  %vm4270_vm5 = vcmp.eq.f32.partialorder %v4269_v58, 8.507059e+37 }
 0x7f1   : > { %v6632_v43 = vpop.eup %6631 }
 0x7f2   : > { %v4261_v36 = vmul.f32 %v6632_v43, %v4259_v35  ;;  %vm4266_vm1 = vweird.f32 %v6632_v43 }
 0x7f3   : > { %vm4267_vm3 = vmor %vm4265_vm2, %vm4266_vm1 }
 0x7f4   : > { %v4262_v51 = vsub.f32 1.0, %v4261_v36 }
 0x7f6   : > { %v4263_v26 = vmul.f32 %v6632_v43, %v4262_v51 }
 0x7f8   : > { %v4264_v31 = vadd.f32 %v6632_v43, %v4263_v26 }
 0x7fa   : > { %v4268_v50 = vsel %vm4267_vm3, %v6632_v43, %v4264_v31 }
 0x7fb   : > { %v4273_v52 = vsel %vm4270_vm5, %v4272_v49, %v4268_v50 }
 0x7fc   : > { %v4275_v4 = vpack.c.bf16 %v4273_v52, %v4273_v52  ;;  %4329 = vst.msk [vmem:[%s1121_s21] sm:$0x3] %vm4328_vm4, %v4273_v52 }
 0x7fe   : > { %6117 = vmatmul.msk.bf16.vlgmr.msrb.gmra.mxu0 %vm4185_vm0, %v4275_v4 }
 0x87b   : > { %v4324_v54 = vpop.f32.mrf.mxu0 }
 0x87c   : > { %v4325_v55 = vadd.f32 %v6588_v6, %v4324_v54 }
 0x87e   : > { %4331 = vrot.lane.b32.xlu0 %v4325_v55, %s7030_s25 }
 0x883   : > { %v4326_v56 = vpop.f32.mrf.mxu0 }
 0x8f0   : > { %v4332_v57 = vpop.permute.xlu0 %4331 }
 0x8f1   : > { %4335 = vst.msk [vmem:[%s1121_s21] sm:$0x3] %vm4334_vm6, %v4332_v57 }
 0x8f2 PF: > { %s8556_s21 = sld [smem:[#allocation28_spill]] }
 0x8f3   : > { %s8557_s0 = sld [smem:[#allocation25_spill]] }
 0x8f4   : > { %s8558_s30 = sld [smem:[#allocation26_spill]] }
 0x8f5   : > { %s8559_s20 = sld [smem:[#allocation29_spill]] }
 0x8f8   : > { %p44_p8 = scmp.ge.s32.totalorder %s8556_s21, 4  }
 0x8fa   :  { %46 = sbr.rel (!%p44_p8) target bundleno = 28 (0x1c), region = 277 }
 0x8ff   :  { %4355 = vsyncpa [#allocation3], 1 }
 0x900   :  { %4357 = vsyncpa [#allocation3 + $0x1], 1 }
 0x901   :  { %4358 = vsyncpa [#allocation5], 1 }
 0x902   :  { %4360 = vsyncpa [#allocation5 + $0x1], 1 }
 0x903   :  { %4361 = vsyncpa [#allocation8], 1 }
 0x904   :  { %4363 = vsyncpa [#allocation8 + $0x1], 1 }
 0x905   :  { %4364 = vsyncpa [#allocation11], 1 }
 0x906   :  { %4366 = vsyncpa [#allocation11 + $0x1], 1 }
 0x907   :  { %4367 = vsyncpa [#allocation14], 1 }
 0x908   :  { %4369 = vsyncpa [#allocation14 + $0x1], 1 }
 0x909   :  { %4370 = vsyncpa [#allocation17], 1 }
 0x90a   :  { %4372 = vsyncpa [#allocation17 + $0x1], 1 }

</bundles_post_ra>
